<compile_context>
chip_gen: v6e
topology: v6e:2x2x1
jax: 0.10.0
libtpu: 0.0.40
codegen_flags: <defaults>
</compile_context>

<pallas_src>
import jax
import jax.numpy as jnp
from jax import lax
from jax.experimental import pallas as pl
from jax.experimental.pallas import tpu as pltpu

MEL = 32            # mel_bins (small config)
HID = 32            # lstm_hidden_size
LAYERS = 2          # lstm_layers
BATCH = 2
SEQ = 8
LEAKY_SLOPE = 0.01  # F.leaky_relu default negative_slope

# bias-slab rows (f32 slab of shape (8, 6H))
B0_ROW, B1_ROW, BHN0_ROW, BHN1_ROW, BFC_ROW = 0, 1, 2, 3, 4


def slab_rows(mel, H):
    """Row offsets of each weight block inside the single bf16 weight slab."""
    rows, off = {}, 0
    for name, n in (("w0a", mel), ("w0b", mel),
                    ("wrec0", 2 * H),
                    ("w1a", 2 * H), ("w1b", 2 * H),
                    ("wrec1", 2 * H),
                    ("wfca", 2 * H), ("wfcb", 2 * H)):
        rows[name] = off
        off += n
    rows["_total"] = off
    return rows


# --------------------------------------------------------------------------
# Fused Pallas kernel: both BiGRU layers + head in one kernel invocation
# --------------------------------------------------------------------------
def make_fused_kernel(T, B, mel, H):
    """B here is the sublane-padded batch (a multiple of 8)."""
    R = slab_rows(mel, H)
    H2, H4, H6 = 2 * H, 4 * H, 6 * H

    def kernel(x_ref, w_ref, b_ref, out_ref, gx_ref, hs_ref):
        # x_ref  : (T, B, mel) f32   time-major, batch-padded input
        # w_ref  : (Rtot, 6H)  bf16  packed weights (gate-major columns)
        # b_ref  : (8, 6H)     f32   packed biases
        # out_ref: (T*B, mel)  f32   output, rows in (t, b) order
        # gx_ref : (T, B, 6H)  f32   scratch: dir-aligned input-gate slabs
        # hs_ref : (T, B, 2H)  f32   scratch: step t -> [h_f(t) | h_b(T-1-t)]
        bias = b_ref[...]                              # read bias slab once

        def wslab(name, nrows):
            r0 = R[name]
            return w_ref[r0:r0 + nrows, :]             # static, tile-aligned

        def rev_seq(ref):
            # time-reversed flat view of a (T, B, C) ref; off the hot loop
            return jnp.concatenate([ref[T - 1 - t] for t in range(T)], axis=0)

        def input_proj(nat, rev, wa, wb, brow):
            # gx[t] = [fwd gates of input(t) | bwd gates of input(T-1-t)],
            # gate-major columns, so the recurrence only row-slices it.
            gx = (jnp.dot(nat.astype(jnp.bfloat16), wa,
                          preferred_element_type=jnp.float32)
                  + jnp.dot(rev.astype(jnp.bfloat16), wb,
                            preferred_element_type=jnp.float32)
                  + bias[brow:brow + 1, :])
            gx_ref[...] = gx.reshape(T, B, H6)

        def run_layer(wrec_name, bhn_row):
            wrec = wslab(wrec_name, H2)                              # (2H, 6H)
            # pre-broadcast n-gate hidden bias once per layer (hoisted)
            bhn = jnp.broadcast_to(bias[bhn_row:bhn_row + 1, 0:H2], (B, H2))
            h = jnp.zeros((B, H2), jnp.float32)                      # [h_f|h_b]
            for t in range(T):                         # fully unrolled, T static
                gxt = gx_ref[t]                        # (B, 6H) aligned row load
                gh = jnp.dot(h.astype(jnp.bfloat16), wrec,
                             preferred_element_type=jnp.float32)  # ONE MXU dot
                rz = jax.nn.sigmoid(gxt[:, 0:H4] + gh[:, 0:H4])   # r & z fused
                r = rz[:, 0:H2]
                z = rz[:, H2:H4]
                n = jnp.tanh(gxt[:, H4:H6] + r * (gh[:, H4:H6] + bhn))
                h = (1.0 - z) * n + z * h
                hs_ref[t] = h                          # single (B, 2H) store

        # ---- layer 0 ----------------------------------------------------
        x_nat = x_ref[...].reshape(T * B, mel)
        x_rev = rev_seq(x_ref)
        input_proj(x_nat, x_rev, wslab("w0a", mel), wslab("w0b", mel), B0_ROW)
        run_layer("wrec0", BHN0_ROW)

        # ---- layer 1 (direction concat folded into split matmuls) -------
        s_nat = hs_ref[...].reshape(T * B, H2)
        s_rev = rev_seq(hs_ref)
        input_proj(s_nat, s_rev, wslab("w1a", H2), wslab("w1b", H2), B1_ROW)
        run_layer("wrec1", BHN1_ROW)

        # ---- head: leaky_relu -> Linear -> tanh --------------------------
        s1_nat = hs_ref[...].reshape(T * B, H2)
        s1_rev = rev_seq(hs_ref)
        act_f = jnp.where(s1_nat >= 0.0, s1_nat, LEAKY_SLOPE * s1_nat)
        act_r = jnp.where(s1_rev >= 0.0, s1_rev, LEAKY_SLOPE * s1_rev)
        y = (jnp.dot(act_f.astype(jnp.bfloat16), wslab("wfca", H2),
                     preferred_element_type=jnp.float32)
             + jnp.dot(act_r.astype(jnp.bfloat16), wslab("wfcb", H2),
                       preferred_element_type=jnp.float32))[:, 0:mel]
        y = y + bias[BFC_ROW:BFC_ROW + 1, 0:mel]
        out_ref[...] = jnp.tanh(y)

    return kernel


def fused_forward(x_t, w_slab, b_slab, T, BP, mel, H):
    vmem = pl.BlockSpec(memory_space=pltpu.MemorySpace.VMEM)
    return pl.pallas_call(
        make_fused_kernel(T, BP, mel, H),
        out_shape=jax.ShapeDtypeStruct((T * BP, mel), jnp.float32),
        in_specs=[vmem, vmem, vmem],
        out_specs=vmem,
        scratch_shapes=[pltpu.VMEM((T, BP, 6 * H), jnp.float32),   # gx slab
                        pltpu.VMEM((T, BP, 2 * H), jnp.float32)],  # layer out
    )(x_t, w_slab, b_slab)


# --------------------------------------------------------------------------
# Parameters (deterministic, PyTorch-style uniform init)
# --------------------------------------------------------------------------
def init_params(key, mel=MEL, hidden=HID, layers=LAYERS):
    params = {"gru": [], "fc": None}
    k_gru = 1.0 / float(jnp.sqrt(hidden))
    for l in range(layers):
        din = mel if l == 0 else 2 * hidden
        dirs = []
        for _d in range(2):  # 0 = forward, 1 = reverse
            key, k1, k2, k3, k4 = jax.random.split(key, 5)
            wih = jax.random.uniform(k1, (din, 3 * hidden), jnp.float32, -k_gru, k_gru)
            whh = jax.random.uniform(k2, (hidden, 3 * hidden), jnp.float32, -k_gru, k_gru)
            bih = jax.random.uniform(k3, (1, 3 * hidden), jnp.float32, -k_gru, k_gru)
            bhh = jax.random.uniform(k4, (1, 3 * hidden), jnp.float32, -k_gru, k_gru)
            dirs.append((wih, whh, bih, bhh))
        params["gru"].append(dirs)
    key, k1, k2 = jax.random.split(key, 3)
    k_fc = 1.0 / float(jnp.sqrt(2 * hidden))
    wfc = jax.random.uniform(k1, (2 * hidden, mel), jnp.float32, -k_fc, k_fc)
    bfc = jax.random.uniform(k2, (1, mel), jnp.float32, -k_fc, k_fc)
    params["fc"] = (wfc, bfc)
    return params


# --------------------------------------------------------------------------
# One-time (cached outside jit) repacking into two contiguous slabs
# --------------------------------------------------------------------------
def _place_gates(w3, H, direction):
    """(Din, 3H) [r|z|n] -> (Din, 6H) gate-major [r_f r_b | z_f z_b | n_f n_b]."""
    din = w3.shape[0]
    out = jnp.zeros((din, 6 * H), jnp.float32)
    base = direction * H
    for g in range(3):
        out = out.at[:, base + 2 * g * H: base + 2 * g * H + H].set(
            w3[:, g * H:(g + 1) * H])
    return out


def prep_fused_params(params):
    (wih0f, whh0f, bih0f, bhh0f), (wih0b, whh0b, bih0b, bhh0b) = params["gru"][0]
    (wih1f, whh1f, bih1f, bhh1f), (wih1b, whh1b, bih1b, bhh1b) = params["gru"][1]
    wfc, bfc = params["fc"]
    H = whh0f.shape[0]
    mel = wih0f.shape[0]
    H2, H6 = 2 * H, 6 * H

    # layer 0: natural input feeds fwd gates, time-reversed input feeds bwd gates
    w0a = _place_gates(wih0f, H, 0)
    w0b = _place_gates(wih0b, H, 1)

    # layer 1: input is [h_f | h_b]; natural rows give {fwd gates from h_f half,
    # bwd gates from h_b half}, reversed rows give the complementary halves.
    w1a = jnp.concatenate([_place_gates(wih1f[0:H], H, 0),
                           _place_gates(wih1b[H:H2], H, 1)], axis=0)
    w1b = jnp.concatenate([_place_gates(wih1b[0:H], H, 1),
                           _place_gates(wih1f[H:H2], H, 0)], axis=0)

    # block-diagonal recurrent weights: ONE (2H, 6H) dot per step
    wrec0 = jnp.concatenate([_place_gates(whh0f, H, 0),
                             _place_gates(whh0b, H, 1)], axis=0)
    wrec1 = jnp.concatenate([_place_gates(whh1f, H, 0),
                             _place_gates(whh1b, H, 1)], axis=0)

    # head weights split per direction, zero-padded to the slab width
    wfca = jnp.zeros((H2, H6), jnp.float32).at[0:H, 0:mel].set(wfc[0:H])
    wfcb = jnp.zeros((H2, H6), jnp.float32).at[H:H2, 0:mel].set(wfc[H:H2])

    R = slab_rows(mel, H)
    blocks = {"w0a": w0a, "w0b": w0b, "wrec0": wrec0, "w1a": w1a, "w1b": w1b,
              "wrec1": wrec1, "wfca": wfca, "wfcb": wfcb}
    order = [k for k in R if k != "_total"]
    w_slab = jnp.concatenate([blocks[k] for k in order],
                             axis=0).astype(jnp.bfloat16)
    assert w_slab.shape[0] == R["_total"]

    # biases: fold b_hh of the r/z gates into the input bias; b_hn stays separate
    def fold(bih, bhh):
        return bih.at[:, 0:H2].add(bhh[:, 0:H2])

    b0 = _place_gates(fold(bih0f, bhh0f), H, 0) + _place_gates(fold(bih0b, bhh0b), H, 1)
    b1 = _place_gates(fold(bih1f, bhh1f), H, 0) + _place_gates(fold(bih1b, bhh1b), H, 1)
    bhn0 = jnp.concatenate([bhh0f[:, H2:3 * H], bhh0b[:, H2:3 * H]], axis=1)
    bhn1 = jnp.concatenate([bhh1f[:, H2:3 * H], bhh1b[:, H2:3 * H]], axis=1)

    b_slab = jnp.zeros((8, H6), jnp.float32)
    b_slab = b_slab.at[B0_ROW:B0_ROW + 1, :].set(b0)
    b_slab = b_slab.at[B1_ROW:B1_ROW + 1, :].set(b1)
    b_slab = b_slab.at[BHN0_ROW:BHN0_ROW + 1, 0:H2].set(bhn0)
    b_slab = b_slab.at[BHN1_ROW:BHN1_ROW + 1, 0:H2].set(bhn1)
    b_slab = b_slab.at[BFC_ROW:BFC_ROW + 1, 0:mel].set(bfc)
    return w_slab, b_slab


# --------------------------------------------------------------------------
# Model forward (Pallas) and a pure-JAX reference
# --------------------------------------------------------------------------
@jax.jit
def simple_lstm_model_forward(w_slab, b_slab, x):
    """x: (B, T, mel) batch_first (like PyTorch).  Returns (B, T, mel)."""
    B, T, mel = x.shape
    H = b_slab.shape[1] // 6
    BP = ((B + 7) // 8) * 8                      # pad batch rows to 8-sublane tile
    # TODO(synk): the tiny transpose/pad/slice glue stays host-side; moving it
    # in-kernel would require a cross-sublane transpose for a ~KiB array.
    xt = jnp.transpose(x, (1, 0, 2)).astype(jnp.float32)        # (T, B, mel)
    xt = jnp.pad(xt, ((0, 0), (0, BP - B), (0, 0)))             # (T, BP, mel)
    y = fused_forward(xt, w_slab, b_slab, T, BP, mel, H)
    y = y.reshape(T, BP, mel)[:, :B]                            # drop pad rows
    return jnp.transpose(y, (1, 0, 2))                          # (B, T, mel)


def _gru_dir_ref(x_tm, wih, whh, bih, bhh):
    T, B, _ = x_tm.shape
    H = whh.shape[0]
    gx = jnp.einsum("tbd,dg->tbg", x_tm, wih) + bih

    def step(h, gxt):
        gh = h @ whh + bhh
        r = jax.nn.sigmoid(gxt[:, :H] + gh[:, :H])
        z = jax.nn.sigmoid(gxt[:, H:2 * H] + gh[:, H:2 * H])
        n = jnp.tanh(gxt[:, 2 * H:] + r * gh[:, 2 * H:])
        h_new = (1.0 - z) * n + z * h
        return h_new, h_new

    _, hs = lax.scan(step, jnp.zeros((B, H), jnp.float32), gx)
    return hs


def reference_forward(params, x):
    h = jnp.transpose(x, (1, 0, 2)).astype(jnp.float32)
    for dirs in params["gru"]:
        hf = _gru_dir_ref(h, *dirs[0])
        hb = _gru_dir_ref(h[::-1], *dirs[1])[::-1]
        h = jnp.concatenate([hf, hb], axis=-1)
    wfc, bfc = params["fc"]
    h = jnp.where(h >= 0.0, h, LEAKY_SLOPE * h)
    y = jnp.tanh(h @ wfc + bfc)
    return jnp.transpose(y, (1, 0, 2))


if __name__ == "__main__":
    key = jax.random.PRNGKey(0)
    key, kx, kp = jax.random.split(key, 3)
    x = jax.random.normal(kx, (BATCH, SEQ, MEL), jnp.float32)     # (B, T, mel_bins)
    params = init_params(kp)
    w_slab, b_slab = prep_fused_params(params)    # packed ONCE, outside the jit path

    out = jax.block_until_ready(simple_lstm_model_forward(w_slab, b_slab, x))
    ref = reference_forward(params, x)

    assert out.shape == (BATCH, SEQ, MEL), out.shape
    max_err = float(jnp.max(jnp.abs(out - ref)))
    # bf16 matmul operands (f32 accumulation) through 2 recurrent layers drift a
    # few 1e-3..1e-2 from the f32 reference; real wiring bugs show as O(0.1..1).
    assert max_err < 5e-2, max_err
    print("KERNEL_OK")
</pallas_src>

<mosaic_0001>
module attributes {stable_mosaic.version = 11 : i64} {
  func.func @kernel(%arg0: memref<8x8x32xf32, #tpu.memory_space<vmem>>, %arg1: memref<448x192xbf16, #tpu.memory_space<vmem>>, %arg2: memref<8x192xf32, #tpu.memory_space<vmem>>, %arg3: memref<64x32xf32, #tpu.memory_space<vmem>>, %arg4: memref<8x8x192xf32, #tpu.memory_space<vmem>>, %arg5: memref<8x8x64xf32, #tpu.memory_space<vmem>>) attributes {dimension_semantics = [], scalar_prefetch = 0 : i64, scratch_operands = 2 : i64, tpu.core_type = #tpu.core_type<tc>} {
    %c0 = arith.constant 0 : index
    %c0_0 = arith.constant 0 : index
    %0 = vector.load %arg2[%c0, %c0_0] : memref<8x192xf32, #tpu.memory_space<vmem>>, vector<8x192xf32>
    %c0_1 = arith.constant 0 : index
    %c0_2 = arith.constant 0 : index
    %c0_3 = arith.constant 0 : index
    %1 = vector.load %arg0[%c0_1, %c0_2, %c0_3] : memref<8x8x32xf32, #tpu.memory_space<vmem>>, vector<8x8x32xf32>
    %2 = vector.shape_cast %1 : vector<8x8x32xf32> to vector<64x32xf32>
    %c7 = arith.constant 7 : index
    %c0_4 = arith.constant 0 : index
    %c0_5 = arith.constant 0 : index
    %3 = vector.load %arg0[%c7, %c0_4, %c0_5] : memref<8x8x32xf32, #tpu.memory_space<vmem>>, vector<1x8x32xf32>
    %4 = vector.shape_cast %3 : vector<1x8x32xf32> to vector<8x32xf32>
    %c6 = arith.constant 6 : index
    %c0_6 = arith.constant 0 : index
    %c0_7 = arith.constant 0 : index
    %5 = vector.load %arg0[%c6, %c0_6, %c0_7] : memref<8x8x32xf32, #tpu.memory_space<vmem>>, vector<1x8x32xf32>
    %6 = vector.shape_cast %5 : vector<1x8x32xf32> to vector<8x32xf32>
    %c5 = arith.constant 5 : index
    %c0_8 = arith.constant 0 : index
    %c0_9 = arith.constant 0 : index
    %7 = vector.load %arg0[%c5, %c0_8, %c0_9] : memref<8x8x32xf32, #tpu.memory_space<vmem>>, vector<1x8x32xf32>
    %8 = vector.shape_cast %7 : vector<1x8x32xf32> to vector<8x32xf32>
    %c4 = arith.constant 4 : index
    %c0_10 = arith.constant 0 : index
    %c0_11 = arith.constant 0 : index
    %9 = vector.load %arg0[%c4, %c0_10, %c0_11] : memref<8x8x32xf32, #tpu.memory_space<vmem>>, vector<1x8x32xf32>
    %10 = vector.shape_cast %9 : vector<1x8x32xf32> to vector<8x32xf32>
    %c3 = arith.constant 3 : index
    %c0_12 = arith.constant 0 : index
    %c0_13 = arith.constant 0 : index
    %11 = vector.load %arg0[%c3, %c0_12, %c0_13] : memref<8x8x32xf32, #tpu.memory_space<vmem>>, vector<1x8x32xf32>
    %12 = vector.shape_cast %11 : vector<1x8x32xf32> to vector<8x32xf32>
    %c2 = arith.constant 2 : index
    %c0_14 = arith.constant 0 : index
    %c0_15 = arith.constant 0 : index
    %13 = vector.load %arg0[%c2, %c0_14, %c0_15] : memref<8x8x32xf32, #tpu.memory_space<vmem>>, vector<1x8x32xf32>
    %14 = vector.shape_cast %13 : vector<1x8x32xf32> to vector<8x32xf32>
    %c1 = arith.constant 1 : index
    %c0_16 = arith.constant 0 : index
    %c0_17 = arith.constant 0 : index
    %15 = vector.load %arg0[%c1, %c0_16, %c0_17] : memref<8x8x32xf32, #tpu.memory_space<vmem>>, vector<1x8x32xf32>
    %16 = vector.shape_cast %15 : vector<1x8x32xf32> to vector<8x32xf32>
    %c0_18 = arith.constant 0 : index
    %c0_19 = arith.constant 0 : index
    %c0_20 = arith.constant 0 : index
    %17 = vector.load %arg0[%c0_18, %c0_19, %c0_20] : memref<8x8x32xf32, #tpu.memory_space<vmem>>, vector<1x8x32xf32>
    %18 = vector.shape_cast %17 : vector<1x8x32xf32> to vector<8x32xf32>
    %19 = tpu.concatenate %4, %6, %8, %10, %12, %14, %16, %18 in 0 : vector<8x32xf32>, vector<8x32xf32>, vector<8x32xf32>, vector<8x32xf32>, vector<8x32xf32>, vector<8x32xf32>, vector<8x32xf32>, vector<8x32xf32> -> vector<64x32xf32>
    %c0_21 = arith.constant 0 : index
    %c0_22 = arith.constant 0 : index
    %20 = vector.load %arg1[%c0_21, %c0_22] : memref<448x192xbf16, #tpu.memory_space<vmem>>, vector<32x192xbf16>
    %c32 = arith.constant 32 : index
    %c0_23 = arith.constant 0 : index
    %21 = vector.load %arg1[%c32, %c0_23] : memref<448x192xbf16, #tpu.memory_space<vmem>>, vector<32x192xbf16>
    %22 = arith.truncf %2 : vector<64x32xf32> to vector<64x32xbf16>
    %cst = arith.constant dense<0.000000e+00> : vector<64x192xf32>
    %23 = tpu.matmul %22, %20, %cst {dimension_numbers = #tpu.dot_dimension_numbers<[1], [0], [0], [1], [0, 0, 1, 1], [], []>} : vector<64x32xbf16>, vector<32x192xbf16>, vector<64x192xf32> -> vector<64x192xf32>
    %24 = arith.truncf %19 : vector<64x32xf32> to vector<64x32xbf16>
    %cst_24 = arith.constant dense<0.000000e+00> : vector<64x192xf32>
    %25 = tpu.matmul %24, %21, %cst_24 {dimension_numbers = #tpu.dot_dimension_numbers<[1], [0], [0], [1], [0, 0, 1, 1], [], []>} : vector<64x32xbf16>, vector<32x192xbf16>, vector<64x192xf32> -> vector<64x192xf32>
    %26 = arith.addf %23, %25 : vector<64x192xf32>
    %27 = vector.extract_strided_slice %0 {offsets = [0, 0], sizes = [1, 192], strides = [1, 1]} : vector<8x192xf32> to vector<1x192xf32>
    %28 = vector.broadcast %27 : vector<1x192xf32> to vector<64x192xf32>
    %29 = arith.addf %26, %28 : vector<64x192xf32>
    %30 = vector.shape_cast %29 : vector<64x192xf32> to vector<8x8x192xf32>
    %c0_25 = arith.constant 0 : index
    %c0_26 = arith.constant 0 : index
    %c0_27 = arith.constant 0 : index
    %31 = vector.load %arg4[%c0_25, %c0_26, %c0_27] : memref<8x8x192xf32, #tpu.memory_space<vmem>>, vector<8x8x192xf32>
    tpu.vector_store %arg4[%c0_25, %c0_26, %c0_27], %30 {strides = array<i32>} : memref<8x8x192xf32, #tpu.memory_space<vmem>>, vector<8x8x192xf32>,
    %c64 = arith.constant 64 : index
    %c0_28 = arith.constant 0 : index
    %32 = vector.load %arg1[%c64, %c0_28] : memref<448x192xbf16, #tpu.memory_space<vmem>>, vector<64x192xbf16>
    %33 = vector.extract_strided_slice %0 {offsets = [2, 0], sizes = [1, 64], strides = [1, 1]} : vector<8x192xf32> to vector<1x64xf32>
    %34 = vector.shape_cast %33 : vector<1x64xf32> to vector<1x64xf32>
    %35 = vector.broadcast %34 : vector<1x64xf32> to vector<8x64xf32>
    %cst_29 = arith.constant 0.000000e+00 : f32
    %36 = vector.broadcast %cst_29 : f32 to vector<8x64xf32>
    %c0_30 = arith.constant 0 : index
    %c0_31 = arith.constant 0 : index
    %c0_32 = arith.constant 0 : index
    %37 = vector.load %arg4[%c0_30, %c0_31, %c0_32] : memref<8x8x192xf32, #tpu.memory_space<vmem>>, vector<1x8x192xf32>
    %38 = vector.shape_cast %37 : vector<1x8x192xf32> to vector<8x192xf32>
    %39 = arith.truncf %36 : vector<8x64xf32> to vector<8x64xbf16>
    %cst_33 = arith.constant dense<0.000000e+00> : vector<8x192xf32>
    %40 = tpu.matmul %39, %32, %cst_33 {dimension_numbers = #tpu.dot_dimension_numbers<[1], [0], [0], [1], [0, 0, 1, 1], [], []>} : vector<8x64xbf16>, vector<64x192xbf16>, vector<8x192xf32> -> vector<8x192xf32>
    %41 = vector.extract_strided_slice %38 {offsets = [0, 0], sizes = [8, 128], strides = [1, 1]} : vector<8x192xf32> to vector<8x128xf32>
    %42 = vector.extract_strided_slice %40 {offsets = [0, 0], sizes = [8, 128], strides = [1, 1]} : vector<8x192xf32> to vector<8x128xf32>
    %43 = arith.addf %41, %42 : vector<8x128xf32>
    %44 = arith.negf %43 : vector<8x128xf32>
    %45 = math.exp %44 : vector<8x128xf32>
    %cst_34 = arith.constant 1.000000e+00 : f32
    %46 = vector.broadcast %cst_34 : f32 to vector<8x128xf32>
    %47 = arith.addf %46, %45 : vector<8x128xf32>
    %48 = arith.divf %46, %47 : vector<8x128xf32>
    %49 = vector.extract_strided_slice %48 {offsets = [0, 0], sizes = [8, 64], strides = [1, 1]} : vector<8x128xf32> to vector<8x64xf32>
    %50 = vector.extract_strided_slice %48 {offsets = [0, 64], sizes = [8, 64], strides = [1, 1]} : vector<8x128xf32> to vector<8x64xf32>
    %51 = vector.extract_strided_slice %38 {offsets = [0, 128], sizes = [8, 64], strides = [1, 1]} : vector<8x192xf32> to vector<8x64xf32>
    %52 = vector.extract_strided_slice %40 {offsets = [0, 128], sizes = [8, 64], strides = [1, 1]} : vector<8x192xf32> to vector<8x64xf32>
    %53 = arith.addf %52, %35 : vector<8x64xf32>
    %54 = arith.mulf %49, %53 : vector<8x64xf32>
    %55 = arith.addf %51, %54 : vector<8x64xf32>
    %56 = math.tanh %55 : vector<8x64xf32>
    %cst_35 = arith.constant 1.000000e+00 : f32
    %57 = vector.broadcast %cst_35 : f32 to vector<8x64xf32>
    %58 = arith.subf %57, %50 : vector<8x64xf32>
    %59 = arith.mulf %58, %56 : vector<8x64xf32>
    %60 = arith.mulf %50, %36 : vector<8x64xf32>
    %61 = arith.addf %59, %60 : vector<8x64xf32>
    %c0_36 = arith.constant 0 : index
    %c0_37 = arith.constant 0 : index
    %c0_38 = arith.constant 0 : index
    %62 = vector.load %arg5[%c0_36, %c0_37, %c0_38] : memref<8x8x64xf32, #tpu.memory_space<vmem>>, vector<1x8x64xf32>
    %63 = vector.shape_cast %62 : vector<1x8x64xf32> to vector<8x64xf32>
    %64 = vector.shape_cast %61 : vector<8x64xf32> to vector<1x8x64xf32>
    tpu.vector_store %arg5[%c0_36, %c0_37, %c0_38], %64 {strides = array<i32>} : memref<8x8x64xf32, #tpu.memory_space<vmem>>, vector<1x8x64xf32>,
    %c1_39 = arith.constant 1 : index
    %c0_40 = arith.constant 0 : index
    %c0_41 = arith.constant 0 : index
    %65 = vector.load %arg4[%c1_39, %c0_40, %c0_41] : memref<8x8x192xf32, #tpu.memory_space<vmem>>, vector<1x8x192xf32>
    %66 = vector.shape_cast %65 : vector<1x8x192xf32> to vector<8x192xf32>
    %67 = arith.truncf %61 : vector<8x64xf32> to vector<8x64xbf16>
    %cst_42 = arith.constant dense<0.000000e+00> : vector<8x192xf32>
    %68 = tpu.matmul %67, %32, %cst_42 {dimension_numbers = #tpu.dot_dimension_numbers<[1], [0], [0], [1], [0, 0, 1, 1], [], []>} : vector<8x64xbf16>, vector<64x192xbf16>, vector<8x192xf32> -> vector<8x192xf32>
    %69 = vector.extract_strided_slice %66 {offsets = [0, 0], sizes = [8, 128], strides = [1, 1]} : vector<8x192xf32> to vector<8x128xf32>
    %70 = vector.extract_strided_slice %68 {offsets = [0, 0], sizes = [8, 128], strides = [1, 1]} : vector<8x192xf32> to vector<8x128xf32>
    %71 = arith.addf %69, %70 : vector<8x128xf32>
    %72 = arith.negf %71 : vector<8x128xf32>
    %73 = math.exp %72 : vector<8x128xf32>
    %cst_43 = arith.constant 1.000000e+00 : f32
    %74 = vector.broadcast %cst_43 : f32 to vector<8x128xf32>
    %75 = arith.addf %74, %73 : vector<8x128xf32>
    %76 = arith.divf %74, %75 : vector<8x128xf32>
    %77 = vector.extract_strided_slice %76 {offsets = [0, 0], sizes = [8, 64], strides = [1, 1]} : vector<8x128xf32> to vector<8x64xf32>
    %78 = vector.extract_strided_slice %76 {offsets = [0, 64], sizes = [8, 64], strides = [1, 1]} : vector<8x128xf32> to vector<8x64xf32>
    %79 = vector.extract_strided_slice %66 {offsets = [0, 128], sizes = [8, 64], strides = [1, 1]} : vector<8x192xf32> to vector<8x64xf32>
    %80 = vector.extract_strided_slice %68 {offsets = [0, 128], sizes = [8, 64], strides = [1, 1]} : vector<8x192xf32> to vector<8x64xf32>
    %81 = arith.addf %80, %35 : vector<8x64xf32>
    %82 = arith.mulf %77, %81 : vector<8x64xf32>
    %83 = arith.addf %79, %82 : vector<8x64xf32>
    %84 = math.tanh %83 : vector<8x64xf32>
    %cst_44 = arith.constant 1.000000e+00 : f32
    %85 = vector.broadcast %cst_44 : f32 to vector<8x64xf32>
    %86 = arith.subf %85, %78 : vector<8x64xf32>
    %87 = arith.mulf %86, %84 : vector<8x64xf32>
    %88 = arith.mulf %78, %61 : vector<8x64xf32>
    %89 = arith.addf %87, %88 : vector<8x64xf32>
    %c1_45 = arith.constant 1 : index
    %c0_46 = arith.constant 0 : index
    %c0_47 = arith.constant 0 : index
    %90 = vector.load %arg5[%c1_45, %c0_46, %c0_47] : memref<8x8x64xf32, #tpu.memory_space<vmem>>, vector<1x8x64xf32>
    %91 = vector.shape_cast %90 : vector<1x8x64xf32> to vector<8x64xf32>
    %92 = vector.shape_cast %89 : vector<8x64xf32> to vector<1x8x64xf32>
    tpu.vector_store %arg5[%c1_45, %c0_46, %c0_47], %92 {strides = array<i32>} : memref<8x8x64xf32, #tpu.memory_space<vmem>>, vector<1x8x64xf32>,
    %c2_48 = arith.constant 2 : index
    %c0_49 = arith.constant 0 : index
    %c0_50 = arith.constant 0 : index
    %93 = vector.load %arg4[%c2_48, %c0_49, %c0_50] : memref<8x8x192xf32, #tpu.memory_space<vmem>>, vector<1x8x192xf32>
    %94 = vector.shape_cast %93 : vector<1x8x192xf32> to vector<8x192xf32>
    %95 = arith.truncf %89 : vector<8x64xf32> to vector<8x64xbf16>
    %cst_51 = arith.constant dense<0.000000e+00> : vector<8x192xf32>
    %96 = tpu.matmul %95, %32, %cst_51 {dimension_numbers = #tpu.dot_dimension_numbers<[1], [0], [0], [1], [0, 0, 1, 1], [], []>} : vector<8x64xbf16>, vector<64x192xbf16>, vector<8x192xf32> -> vector<8x192xf32>
    %97 = vector.extract_strided_slice %94 {offsets = [0, 0], sizes = [8, 128], strides = [1, 1]} : vector<8x192xf32> to vector<8x128xf32>
    %98 = vector.extract_strided_slice %96 {offsets = [0, 0], sizes = [8, 128], strides = [1, 1]} : vector<8x192xf32> to vector<8x128xf32>
    %99 = arith.addf %97, %98 : vector<8x128xf32>
    %100 = arith.negf %99 : vector<8x128xf32>
    %101 = math.exp %100 : vector<8x128xf32>
    %cst_52 = arith.constant 1.000000e+00 : f32
    %102 = vector.broadcast %cst_52 : f32 to vector<8x128xf32>
    %103 = arith.addf %102, %101 : vector<8x128xf32>
    %104 = arith.divf %102, %103 : vector<8x128xf32>
    %105 = vector.extract_strided_slice %104 {offsets = [0, 0], sizes = [8, 64], strides = [1, 1]} : vector<8x128xf32> to vector<8x64xf32>
    %106 = vector.extract_strided_slice %104 {offsets = [0, 64], sizes = [8, 64], strides = [1, 1]} : vector<8x128xf32> to vector<8x64xf32>
    %107 = vector.extract_strided_slice %94 {offsets = [0, 128], sizes = [8, 64], strides = [1, 1]} : vector<8x192xf32> to vector<8x64xf32>
    %108 = vector.extract_strided_slice %96 {offsets = [0, 128], sizes = [8, 64], strides = [1, 1]} : vector<8x192xf32> to vector<8x64xf32>
    %109 = arith.addf %108, %35 : vector<8x64xf32>
    %110 = arith.mulf %105, %109 : vector<8x64xf32>
    %111 = arith.addf %107, %110 : vector<8x64xf32>
    %112 = math.tanh %111 : vector<8x64xf32>
    %cst_53 = arith.constant 1.000000e+00 : f32
    %113 = vector.broadcast %cst_53 : f32 to vector<8x64xf32>
    %114 = arith.subf %113, %106 : vector<8x64xf32>
    %115 = arith.mulf %114, %112 : vector<8x64xf32>
    %116 = arith.mulf %106, %89 : vector<8x64xf32>
    %117 = arith.addf %115, %116 : vector<8x64xf32>
    %c2_54 = arith.constant 2 : index
    %c0_55 = arith.constant 0 : index
    %c0_56 = arith.constant 0 : index
    %118 = vector.load %arg5[%c2_54, %c0_55, %c0_56] : memref<8x8x64xf32, #tpu.memory_space<vmem>>, vector<1x8x64xf32>
    %119 = vector.shape_cast %118 : vector<1x8x64xf32> to vector<8x64xf32>
    %120 = vector.shape_cast %117 : vector<8x64xf32> to vector<1x8x64xf32>
    tpu.vector_store %arg5[%c2_54, %c0_55, %c0_56], %120 {strides = array<i32>} : memref<8x8x64xf32, #tpu.memory_space<vmem>>, vector<1x8x64xf32>,
    %c3_57 = arith.constant 3 : index
    %c0_58 = arith.constant 0 : index
    %c0_59 = arith.constant 0 : index
    %121 = vector.load %arg4[%c3_57, %c0_58, %c0_59] : memref<8x8x192xf32, #tpu.memory_space<vmem>>, vector<1x8x192xf32>
    %122 = vector.shape_cast %121 : vector<1x8x192xf32> to vector<8x192xf32>
    %123 = arith.truncf %117 : vector<8x64xf32> to vector<8x64xbf16>
    %cst_60 = arith.constant dense<0.000000e+00> : vector<8x192xf32>
    %124 = tpu.matmul %123, %32, %cst_60 {dimension_numbers = #tpu.dot_dimension_numbers<[1], [0], [0], [1], [0, 0, 1, 1], [], []>} : vector<8x64xbf16>, vector<64x192xbf16>, vector<8x192xf32> -> vector<8x192xf32>
    %125 = vector.extract_strided_slice %122 {offsets = [0, 0], sizes = [8, 128], strides = [1, 1]} : vector<8x192xf32> to vector<8x128xf32>
    %126 = vector.extract_strided_slice %124 {offsets = [0, 0], sizes = [8, 128], strides = [1, 1]} : vector<8x192xf32> to vector<8x128xf32>
    %127 = arith.addf %125, %126 : vector<8x128xf32>
    %128 = arith.negf %127 : vector<8x128xf32>
    %129 = math.exp %128 : vector<8x128xf32>
    %cst_61 = arith.constant 1.000000e+00 : f32
    %130 = vector.broadcast %cst_61 : f32 to vector<8x128xf32>
    %131 = arith.addf %130, %129 : vector<8x128xf32>
    %132 = arith.divf %130, %131 : vector<8x128xf32>
    %133 = vector.extract_strided_slice %132 {offsets = [0, 0], sizes = [8, 64], strides = [1, 1]} : vector<8x128xf32> to vector<8x64xf32>
    %134 = vector.extract_strided_slice %132 {offsets = [0, 64], sizes = [8, 64], strides = [1, 1]} : vector<8x128xf32> to vector<8x64xf32>
    %135 = vector.extract_strided_slice %122 {offsets = [0, 128], sizes = [8, 64], strides = [1, 1]} : vector<8x192xf32> to vector<8x64xf32>
    %136 = vector.extract_strided_slice %124 {offsets = [0, 128], sizes = [8, 64], strides = [1, 1]} : vector<8x192xf32> to vector<8x64xf32>
    %137 = arith.addf %136, %35 : vector<8x64xf32>
    %138 = arith.mulf %133, %137 : vector<8x64xf32>
    %139 = arith.addf %135, %138 : vector<8x64xf32>
    %140 = math.tanh %139 : vector<8x64xf32>
    %cst_62 = arith.constant 1.000000e+00 : f32
    %141 = vector.broadcast %cst_62 : f32 to vector<8x64xf32>
    %142 = arith.subf %141, %134 : vector<8x64xf32>
    %143 = arith.mulf %142, %140 : vector<8x64xf32>
    %144 = arith.mulf %134, %117 : vector<8x64xf32>
    %145 = arith.addf %143, %144 : vector<8x64xf32>
    %c3_63 = arith.constant 3 : index
    %c0_64 = arith.constant 0 : index
    %c0_65 = arith.constant 0 : index
    %146 = vector.load %arg5[%c3_63, %c0_64, %c0_65] : memref<8x8x64xf32, #tpu.memory_space<vmem>>, vector<1x8x64xf32>
    %147 = vector.shape_cast %146 : vector<1x8x64xf32> to vector<8x64xf32>
    %148 = vector.shape_cast %145 : vector<8x64xf32> to vector<1x8x64xf32>
    tpu.vector_store %arg5[%c3_63, %c0_64, %c0_65], %148 {strides = array<i32>} : memref<8x8x64xf32, #tpu.memory_space<vmem>>, vector<1x8x64xf32>,
    %c4_66 = arith.constant 4 : index
    %c0_67 = arith.constant 0 : index
    %c0_68 = arith.constant 0 : index
    %149 = vector.load %arg4[%c4_66, %c0_67, %c0_68] : memref<8x8x192xf32, #tpu.memory_space<vmem>>, vector<1x8x192xf32>
    %150 = vector.shape_cast %149 : vector<1x8x192xf32> to vector<8x192xf32>
    %151 = arith.truncf %145 : vector<8x64xf32> to vector<8x64xbf16>
    %cst_69 = arith.constant dense<0.000000e+00> : vector<8x192xf32>
    %152 = tpu.matmul %151, %32, %cst_69 {dimension_numbers = #tpu.dot_dimension_numbers<[1], [0], [0], [1], [0, 0, 1, 1], [], []>} : vector<8x64xbf16>, vector<64x192xbf16>, vector<8x192xf32> -> vector<8x192xf32>
    %153 = vector.extract_strided_slice %150 {offsets = [0, 0], sizes = [8, 128], strides = [1, 1]} : vector<8x192xf32> to vector<8x128xf32>
    %154 = vector.extract_strided_slice %152 {offsets = [0, 0], sizes = [8, 128], strides = [1, 1]} : vector<8x192xf32> to vector<8x128xf32>
    %155 = arith.addf %153, %154 : vector<8x128xf32>
    %156 = arith.negf %155 : vector<8x128xf32>
    %157 = math.exp %156 : vector<8x128xf32>
    %cst_70 = arith.constant 1.000000e+00 : f32
    %158 = vector.broadcast %cst_70 : f32 to vector<8x128xf32>
    %159 = arith.addf %158, %157 : vector<8x128xf32>
    %160 = arith.divf %158, %159 : vector<8x128xf32>
    %161 = vector.extract_strided_slice %160 {offsets = [0, 0], sizes = [8, 64], strides = [1, 1]} : vector<8x128xf32> to vector<8x64xf32>
    %162 = vector.extract_strided_slice %160 {offsets = [0, 64], sizes = [8, 64], strides = [1, 1]} : vector<8x128xf32> to vector<8x64xf32>
    %163 = vector.extract_strided_slice %150 {offsets = [0, 128], sizes = [8, 64], strides = [1, 1]} : vector<8x192xf32> to vector<8x64xf32>
    %164 = vector.extract_strided_slice %152 {offsets = [0, 128], sizes = [8, 64], strides = [1, 1]} : vector<8x192xf32> to vector<8x64xf32>
    %165 = arith.addf %164, %35 : vector<8x64xf32>
    %166 = arith.mulf %161, %165 : vector<8x64xf32>
    %167 = arith.addf %163, %166 : vector<8x64xf32>
    %168 = math.tanh %167 : vector<8x64xf32>
    %cst_71 = arith.constant 1.000000e+00 : f32
    %169 = vector.broadcast %cst_71 : f32 to vector<8x64xf32>
    %170 = arith.subf %169, %162 : vector<8x64xf32>
    %171 = arith.mulf %170, %168 : vector<8x64xf32>
    %172 = arith.mulf %162, %145 : vector<8x64xf32>
    %173 = arith.addf %171, %172 : vector<8x64xf32>
    %c4_72 = arith.constant 4 : index
    %c0_73 = arith.constant 0 : index
    %c0_74 = arith.constant 0 : index
    %174 = vector.load %arg5[%c4_72, %c0_73, %c0_74] : memref<8x8x64xf32, #tpu.memory_space<vmem>>, vector<1x8x64xf32>
    %175 = vector.shape_cast %174 : vector<1x8x64xf32> to vector<8x64xf32>
    %176 = vector.shape_cast %173 : vector<8x64xf32> to vector<1x8x64xf32>
    tpu.vector_store %arg5[%c4_72, %c0_73, %c0_74], %176 {strides = array<i32>} : memref<8x8x64xf32, #tpu.memory_space<vmem>>, vector<1x8x64xf32>,
    %c5_75 = arith.constant 5 : index
    %c0_76 = arith.constant 0 : index
    %c0_77 = arith.constant 0 : index
    %177 = vector.load %arg4[%c5_75, %c0_76, %c0_77] : memref<8x8x192xf32, #tpu.memory_space<vmem>>, vector<1x8x192xf32>
    %178 = vector.shape_cast %177 : vector<1x8x192xf32> to vector<8x192xf32>
    %179 = arith.truncf %173 : vector<8x64xf32> to vector<8x64xbf16>
    %cst_78 = arith.constant dense<0.000000e+00> : vector<8x192xf32>
    %180 = tpu.matmul %179, %32, %cst_78 {dimension_numbers = #tpu.dot_dimension_numbers<[1], [0], [0], [1], [0, 0, 1, 1], [], []>} : vector<8x64xbf16>, vector<64x192xbf16>, vector<8x192xf32> -> vector<8x192xf32>
    %181 = vector.extract_strided_slice %178 {offsets = [0, 0], sizes = [8, 128], strides = [1, 1]} : vector<8x192xf32> to vector<8x128xf32>
    %182 = vector.extract_strided_slice %180 {offsets = [0, 0], sizes = [8, 128], strides = [1, 1]} : vector<8x192xf32> to vector<8x128xf32>
    %183 = arith.addf %181, %182 : vector<8x128xf32>
    %184 = arith.negf %183 : vector<8x128xf32>
    %185 = math.exp %184 : vector<8x128xf32>
    %cst_79 = arith.constant 1.000000e+00 : f32
    %186 = vector.broadcast %cst_79 : f32 to vector<8x128xf32>
    %187 = arith.addf %186, %185 : vector<8x128xf32>
    %188 = arith.divf %186, %187 : vector<8x128xf32>
    %189 = vector.extract_strided_slice %188 {offsets = [0, 0], sizes = [8, 64], strides = [1, 1]} : vector<8x128xf32> to vector<8x64xf32>
    %190 = vector.extract_strided_slice %188 {offsets = [0, 64], sizes = [8, 64], strides = [1, 1]} : vector<8x128xf32> to vector<8x64xf32>
    %191 = vector.extract_strided_slice %178 {offsets = [0, 128], sizes = [8, 64], strides = [1, 1]} : vector<8x192xf32> to vector<8x64xf32>
    %192 = vector.extract_strided_slice %180 {offsets = [0, 128], sizes = [8, 64], strides = [1, 1]} : vector<8x192xf32> to vector<8x64xf32>
    %193 = arith.addf %192, %35 : vector<8x64xf32>
    %194 = arith.mulf %189, %193 : vector<8x64xf32>
    %195 = arith.addf %191, %194 : vector<8x64xf32>
    %196 = math.tanh %195 : vector<8x64xf32>
    %cst_80 = arith.constant 1.000000e+00 : f32
    %197 = vector.broadcast %cst_80 : f32 to vector<8x64xf32>
    %198 = arith.subf %197, %190 : vector<8x64xf32>
    %199 = arith.mulf %198, %196 : vector<8x64xf32>
    %200 = arith.mulf %190, %173 : vector<8x64xf32>
    %201 = arith.addf %199, %200 : vector<8x64xf32>
    %c5_81 = arith.constant 5 : index
    %c0_82 = arith.constant 0 : index
    %c0_83 = arith.constant 0 : index
    %202 = vector.load %arg5[%c5_81, %c0_82, %c0_83] : memref<8x8x64xf32, #tpu.memory_space<vmem>>, vector<1x8x64xf32>
    %203 = vector.shape_cast %202 : vector<1x8x64xf32> to vector<8x64xf32>
    %204 = vector.shape_cast %201 : vector<8x64xf32> to vector<1x8x64xf32>
    tpu.vector_store %arg5[%c5_81, %c0_82, %c0_83], %204 {strides = array<i32>} : memref<8x8x64xf32, #tpu.memory_space<vmem>>, vector<1x8x64xf32>,
    %c6_84 = arith.constant 6 : index
    %c0_85 = arith.constant 0 : index
    %c0_86 = arith.constant 0 : index
    %205 = vector.load %arg4[%c6_84, %c0_85, %c0_86] : memref<8x8x192xf32, #tpu.memory_space<vmem>>, vector<1x8x192xf32>
    %206 = vector.shape_cast %205 : vector<1x8x192xf32> to vector<8x192xf32>
    %207 = arith.truncf %201 : vector<8x64xf32> to vector<8x64xbf16>
    %cst_87 = arith.constant dense<0.000000e+00> : vector<8x192xf32>
    %208 = tpu.matmul %207, %32, %cst_87 {dimension_numbers = #tpu.dot_dimension_numbers<[1], [0], [0], [1], [0, 0, 1, 1], [], []>} : vector<8x64xbf16>, vector<64x192xbf16>, vector<8x192xf32> -> vector<8x192xf32>
    %209 = vector.extract_strided_slice %206 {offsets = [0, 0], sizes = [8, 128], strides = [1, 1]} : vector<8x192xf32> to vector<8x128xf32>
    %210 = vector.extract_strided_slice %208 {offsets = [0, 0], sizes = [8, 128], strides = [1, 1]} : vector<8x192xf32> to vector<8x128xf32>
    %211 = arith.addf %209, %210 : vector<8x128xf32>
    %212 = arith.negf %211 : vector<8x128xf32>
    %213 = math.exp %212 : vector<8x128xf32>
    %cst_88 = arith.constant 1.000000e+00 : f32
    %214 = vector.broadcast %cst_88 : f32 to vector<8x128xf32>
    %215 = arith.addf %214, %213 : vector<8x128xf32>
    %216 = arith.divf %214, %215 : vector<8x128xf32>
    %217 = vector.extract_strided_slice %216 {offsets = [0, 0], sizes = [8, 64], strides = [1, 1]} : vector<8x128xf32> to vector<8x64xf32>
    %218 = vector.extract_strided_slice %216 {offsets = [0, 64], sizes = [8, 64], strides = [1, 1]} : vector<8x128xf32> to vector<8x64xf32>
    %219 = vector.extract_strided_slice %206 {offsets = [0, 128], sizes = [8, 64], strides = [1, 1]} : vector<8x192xf32> to vector<8x64xf32>
    %220 = vector.extract_strided_slice %208 {offsets = [0, 128], sizes = [8, 64], strides = [1, 1]} : vector<8x192xf32> to vector<8x64xf32>
    %221 = arith.addf %220, %35 : vector<8x64xf32>
    %222 = arith.mulf %217, %221 : vector<8x64xf32>
    %223 = arith.addf %219, %222 : vector<8x64xf32>
    %224 = math.tanh %223 : vector<8x64xf32>
    %cst_89 = arith.constant 1.000000e+00 : f32
    %225 = vector.broadcast %cst_89 : f32 to vector<8x64xf32>
    %226 = arith.subf %225, %218 : vector<8x64xf32>
    %227 = arith.mulf %226, %224 : vector<8x64xf32>
    %228 = arith.mulf %218, %201 : vector<8x64xf32>
    %229 = arith.addf %227, %228 : vector<8x64xf32>
    %c6_90 = arith.constant 6 : index
    %c0_91 = arith.constant 0 : index
    %c0_92 = arith.constant 0 : index
    %230 = vector.load %arg5[%c6_90, %c0_91, %c0_92] : memref<8x8x64xf32, #tpu.memory_space<vmem>>, vector<1x8x64xf32>
    %231 = vector.shape_cast %230 : vector<1x8x64xf32> to vector<8x64xf32>
    %232 = vector.shape_cast %229 : vector<8x64xf32> to vector<1x8x64xf32>
    tpu.vector_store %arg5[%c6_90, %c0_91, %c0_92], %232 {strides = array<i32>} : memref<8x8x64xf32, #tpu.memory_space<vmem>>, vector<1x8x64xf32>,
    %c7_93 = arith.constant 7 : index
    %c0_94 = arith.constant 0 : index
    %c0_95 = arith.constant 0 : index
    %233 = vector.load %arg4[%c7_93, %c0_94, %c0_95] : memref<8x8x192xf32, #tpu.memory_space<vmem>>, vector<1x8x192xf32>
    %234 = vector.shape_cast %233 : vector<1x8x192xf32> to vector<8x192xf32>
    %235 = arith.truncf %229 : vector<8x64xf32> to vector<8x64xbf16>
    %cst_96 = arith.constant dense<0.000000e+00> : vector<8x192xf32>
    %236 = tpu.matmul %235, %32, %cst_96 {dimension_numbers = #tpu.dot_dimension_numbers<[1], [0], [0], [1], [0, 0, 1, 1], [], []>} : vector<8x64xbf16>, vector<64x192xbf16>, vector<8x192xf32> -> vector<8x192xf32>
    %237 = vector.extract_strided_slice %234 {offsets = [0, 0], sizes = [8, 128], strides = [1, 1]} : vector<8x192xf32> to vector<8x128xf32>
    %238 = vector.extract_strided_slice %236 {offsets = [0, 0], sizes = [8, 128], strides = [1, 1]} : vector<8x192xf32> to vector<8x128xf32>
    %239 = arith.addf %237, %238 : vector<8x128xf32>
    %240 = arith.negf %239 : vector<8x128xf32>
    %241 = math.exp %240 : vector<8x128xf32>
    %cst_97 = arith.constant 1.000000e+00 : f32
    %242 = vector.broadcast %cst_97 : f32 to vector<8x128xf32>
    %243 = arith.addf %242, %241 : vector<8x128xf32>
    %244 = arith.divf %242, %243 : vector<8x128xf32>
    %245 = vector.extract_strided_slice %244 {offsets = [0, 0], sizes = [8, 64], strides = [1, 1]} : vector<8x128xf32> to vector<8x64xf32>
    %246 = vector.extract_strided_slice %244 {offsets = [0, 64], sizes = [8, 64], strides = [1, 1]} : vector<8x128xf32> to vector<8x64xf32>
    %247 = vector.extract_strided_slice %234 {offsets = [0, 128], sizes = [8, 64], strides = [1, 1]} : vector<8x192xf32> to vector<8x64xf32>
    %248 = vector.extract_strided_slice %236 {offsets = [0, 128], sizes = [8, 64], strides = [1, 1]} : vector<8x192xf32> to vector<8x64xf32>
    %249 = arith.addf %248, %35 : vector<8x64xf32>
    %250 = arith.mulf %245, %249 : vector<8x64xf32>
    %251 = arith.addf %247, %250 : vector<8x64xf32>
    %252 = math.tanh %251 : vector<8x64xf32>
    %cst_98 = arith.constant 1.000000e+00 : f32
    %253 = vector.broadcast %cst_98 : f32 to vector<8x64xf32>
    %254 = arith.subf %253, %246 : vector<8x64xf32>
    %255 = arith.mulf %254, %252 : vector<8x64xf32>
    %256 = arith.mulf %246, %229 : vector<8x64xf32>
    %257 = arith.addf %255, %256 : vector<8x64xf32>
    %c7_99 = arith.constant 7 : index
    %c0_100 = arith.constant 0 : index
    %c0_101 = arith.constant 0 : index
    %258 = vector.load %arg5[%c7_99, %c0_100, %c0_101] : memref<8x8x64xf32, #tpu.memory_space<vmem>>, vector<1x8x64xf32>
    %259 = vector.shape_cast %258 : vector<1x8x64xf32> to vector<8x64xf32>
    %260 = vector.shape_cast %257 : vector<8x64xf32> to vector<1x8x64xf32>
    tpu.vector_store %arg5[%c7_99, %c0_100, %c0_101], %260 {strides = array<i32>} : memref<8x8x64xf32, #tpu.memory_space<vmem>>, vector<1x8x64xf32>,
    %c0_102 = arith.constant 0 : index
    %c0_103 = arith.constant 0 : index
    %c0_104 = arith.constant 0 : index
    %261 = vector.load %arg5[%c0_102, %c0_103, %c0_104] : memref<8x8x64xf32, #tpu.memory_space<vmem>>, vector<8x8x64xf32>
    %262 = vector.shape_cast %261 : vector<8x8x64xf32> to vector<64x64xf32>
    %c7_105 = arith.constant 7 : index
    %c0_106 = arith.constant 0 : index
    %c0_107 = arith.constant 0 : index
    %263 = vector.load %arg5[%c7_105, %c0_106, %c0_107] : memref<8x8x64xf32, #tpu.memory_space<vmem>>, vector<1x8x64xf32>
    %264 = vector.shape_cast %263 : vector<1x8x64xf32> to vector<8x64xf32>
    %c6_108 = arith.constant 6 : index
    %c0_109 = arith.constant 0 : index
    %c0_110 = arith.constant 0 : index
    %265 = vector.load %arg5[%c6_108, %c0_109, %c0_110] : memref<8x8x64xf32, #tpu.memory_space<vmem>>, vector<1x8x64xf32>
    %266 = vector.shape_cast %265 : vector<1x8x64xf32> to vector<8x64xf32>
    %c5_111 = arith.constant 5 : index
    %c0_112 = arith.constant 0 : index
    %c0_113 = arith.constant 0 : index
    %267 = vector.load %arg5[%c5_111, %c0_112, %c0_113] : memref<8x8x64xf32, #tpu.memory_space<vmem>>, vector<1x8x64xf32>
    %268 = vector.shape_cast %267 : vector<1x8x64xf32> to vector<8x64xf32>
    %c4_114 = arith.constant 4 : index
    %c0_115 = arith.constant 0 : index
    %c0_116 = arith.constant 0 : index
    %269 = vector.load %arg5[%c4_114, %c0_115, %c0_116] : memref<8x8x64xf32, #tpu.memory_space<vmem>>, vector<1x8x64xf32>
    %270 = vector.shape_cast %269 : vector<1x8x64xf32> to vector<8x64xf32>
    %c3_117 = arith.constant 3 : index
    %c0_118 = arith.constant 0 : index
    %c0_119 = arith.constant 0 : index
    %271 = vector.load %arg5[%c3_117, %c0_118, %c0_119] : memref<8x8x64xf32, #tpu.memory_space<vmem>>, vector<1x8x64xf32>
    %272 = vector.shape_cast %271 : vector<1x8x64xf32> to vector<8x64xf32>
    %c2_120 = arith.constant 2 : index
    %c0_121 = arith.constant 0 : index
    %c0_122 = arith.constant 0 : index
    %273 = vector.load %arg5[%c2_120, %c0_121, %c0_122] : memref<8x8x64xf32, #tpu.memory_space<vmem>>, vector<1x8x64xf32>
    %274 = vector.shape_cast %273 : vector<1x8x64xf32> to vector<8x64xf32>
    %c1_123 = arith.constant 1 : index
    %c0_124 = arith.constant 0 : index
    %c0_125 = arith.constant 0 : index
    %275 = vector.load %arg5[%c1_123, %c0_124, %c0_125] : memref<8x8x64xf32, #tpu.memory_space<vmem>>, vector<1x8x64xf32>
    %276 = vector.shape_cast %275 : vector<1x8x64xf32> to vector<8x64xf32>
    %c0_126 = arith.constant 0 : index
    %c0_127 = arith.constant 0 : index
    %c0_128 = arith.constant 0 : index
    %277 = vector.load %arg5[%c0_126, %c0_127, %c0_128] : memref<8x8x64xf32, #tpu.memory_space<vmem>>, vector<1x8x64xf32>
    %278 = vector.shape_cast %277 : vector<1x8x64xf32> to vector<8x64xf32>
    %279 = tpu.concatenate %264, %266, %268, %270, %272, %274, %276, %278 in 0 : vector<8x64xf32>, vector<8x64xf32>, vector<8x64xf32>, vector<8x64xf32>, vector<8x64xf32>, vector<8x64xf32>, vector<8x64xf32>, vector<8x64xf32> -> vector<64x64xf32>
    %c128 = arith.constant 128 : index
    %c0_129 = arith.constant 0 : index
    %280 = vector.load %arg1[%c128, %c0_129] : memref<448x192xbf16, #tpu.memory_space<vmem>>, vector<64x192xbf16>
    %c192 = arith.constant 192 : index
    %c0_130 = arith.constant 0 : index
    %281 = vector.load %arg1[%c192, %c0_130] : memref<448x192xbf16, #tpu.memory_space<vmem>>, vector<64x192xbf16>
    %282 = arith.truncf %262 : vector<64x64xf32> to vector<64x64xbf16>
    %cst_131 = arith.constant dense<0.000000e+00> : vector<64x192xf32>
    %283 = tpu.matmul %282, %280, %cst_131 {dimension_numbers = #tpu.dot_dimension_numbers<[1], [0], [0], [1], [0, 0, 1, 1], [], []>} : vector<64x64xbf16>, vector<64x192xbf16>, vector<64x192xf32> -> vector<64x192xf32>
    %284 = arith.truncf %279 : vector<64x64xf32> to vector<64x64xbf16>
    %cst_132 = arith.constant dense<0.000000e+00> : vector<64x192xf32>
    %285 = tpu.matmul %284, %281, %cst_132 {dimension_numbers = #tpu.dot_dimension_numbers<[1], [0], [0], [1], [0, 0, 1, 1], [], []>} : vector<64x64xbf16>, vector<64x192xbf16>, vector<64x192xf32> -> vector<64x192xf32>
    %286 = arith.addf %283, %285 : vector<64x192xf32>
    %287 = vector.extract_strided_slice %0 {offsets = [1, 0], sizes = [1, 192], strides = [1, 1]} : vector<8x192xf32> to vector<1x192xf32>
    %288 = vector.broadcast %287 : vector<1x192xf32> to vector<64x192xf32>
    %289 = arith.addf %286, %288 : vector<64x192xf32>
    %290 = vector.shape_cast %289 : vector<64x192xf32> to vector<8x8x192xf32>
    %c0_133 = arith.constant 0 : index
    %c0_134 = arith.constant 0 : index
    %c0_135 = arith.constant 0 : index
    %291 = vector.load %arg4[%c0_133, %c0_134, %c0_135] : memref<8x8x192xf32, #tpu.memory_space<vmem>>, vector<8x8x192xf32>
    tpu.vector_store %arg4[%c0_133, %c0_134, %c0_135], %290 {strides = array<i32>} : memref<8x8x192xf32, #tpu.memory_space<vmem>>, vector<8x8x192xf32>,
    %c256 = arith.constant 256 : index
    %c0_136 = arith.constant 0 : index
    %292 = vector.load %arg1[%c256, %c0_136] : memref<448x192xbf16, #tpu.memory_space<vmem>>, vector<64x192xbf16>
    %293 = vector.extract_strided_slice %0 {offsets = [3, 0], sizes = [1, 64], strides = [1, 1]} : vector<8x192xf32> to vector<1x64xf32>
    %294 = vector.shape_cast %293 : vector<1x64xf32> to vector<1x64xf32>
    %295 = vector.broadcast %294 : vector<1x64xf32> to vector<8x64xf32>
    %cst_137 = arith.constant 0.000000e+00 : f32
    %296 = vector.broadcast %cst_137 : f32 to vector<8x64xf32>
    %c0_138 = arith.constant 0 : index
    %c0_139 = arith.constant 0 : index
    %c0_140 = arith.constant 0 : index
    %297 = vector.load %arg4[%c0_138, %c0_139, %c0_140] : memref<8x8x192xf32, #tpu.memory_space<vmem>>, vector<1x8x192xf32>
    %298 = vector.shape_cast %297 : vector<1x8x192xf32> to vector<8x192xf32>
    %299 = arith.truncf %296 : vector<8x64xf32> to vector<8x64xbf16>
    %cst_141 = arith.constant dense<0.000000e+00> : vector<8x192xf32>
    %300 = tpu.matmul %299, %292, %cst_141 {dimension_numbers = #tpu.dot_dimension_numbers<[1], [0], [0], [1], [0, 0, 1, 1], [], []>} : vector<8x64xbf16>, vector<64x192xbf16>, vector<8x192xf32> -> vector<8x192xf32>
    %301 = vector.extract_strided_slice %298 {offsets = [0, 0], sizes = [8, 128], strides = [1, 1]} : vector<8x192xf32> to vector<8x128xf32>
    %302 = vector.extract_strided_slice %300 {offsets = [0, 0], sizes = [8, 128], strides = [1, 1]} : vector<8x192xf32> to vector<8x128xf32>
    %303 = arith.addf %301, %302 : vector<8x128xf32>
    %304 = arith.negf %303 : vector<8x128xf32>
    %305 = math.exp %304 : vector<8x128xf32>
    %cst_142 = arith.constant 1.000000e+00 : f32
    %306 = vector.broadcast %cst_142 : f32 to vector<8x128xf32>
    %307 = arith.addf %306, %305 : vector<8x128xf32>
    %308 = arith.divf %306, %307 : vector<8x128xf32>
    %309 = vector.extract_strided_slice %308 {offsets = [0, 0], sizes = [8, 64], strides = [1, 1]} : vector<8x128xf32> to vector<8x64xf32>
    %310 = vector.extract_strided_slice %308 {offsets = [0, 64], sizes = [8, 64], strides = [1, 1]} : vector<8x128xf32> to vector<8x64xf32>
    %311 = vector.extract_strided_slice %298 {offsets = [0, 128], sizes = [8, 64], strides = [1, 1]} : vector<8x192xf32> to vector<8x64xf32>
    %312 = vector.extract_strided_slice %300 {offsets = [0, 128], sizes = [8, 64], strides = [1, 1]} : vector<8x192xf32> to vector<8x64xf32>
    %313 = arith.addf %312, %295 : vector<8x64xf32>
    %314 = arith.mulf %309, %313 : vector<8x64xf32>
    %315 = arith.addf %311, %314 : vector<8x64xf32>
    %316 = math.tanh %315 : vector<8x64xf32>
    %cst_143 = arith.constant 1.000000e+00 : f32
    %317 = vector.broadcast %cst_143 : f32 to vector<8x64xf32>
    %318 = arith.subf %317, %310 : vector<8x64xf32>
    %319 = arith.mulf %318, %316 : vector<8x64xf32>
    %320 = arith.mulf %310, %296 : vector<8x64xf32>
    %321 = arith.addf %319, %320 : vector<8x64xf32>
    %c0_144 = arith.constant 0 : index
    %c0_145 = arith.constant 0 : index
    %c0_146 = arith.constant 0 : index
    %322 = vector.load %arg5[%c0_144, %c0_145, %c0_146] : memref<8x8x64xf32, #tpu.memory_space<vmem>>, vector<1x8x64xf32>
    %323 = vector.shape_cast %322 : vector<1x8x64xf32> to vector<8x64xf32>
    %324 = vector.shape_cast %321 : vector<8x64xf32> to vector<1x8x64xf32>
    tpu.vector_store %arg5[%c0_144, %c0_145, %c0_146], %324 {strides = array<i32>} : memref<8x8x64xf32, #tpu.memory_space<vmem>>, vector<1x8x64xf32>,
    %c1_147 = arith.constant 1 : index
    %c0_148 = arith.constant 0 : index
    %c0_149 = arith.constant 0 : index
    %325 = vector.load %arg4[%c1_147, %c0_148, %c0_149] : memref<8x8x192xf32, #tpu.memory_space<vmem>>, vector<1x8x192xf32>
    %326 = vector.shape_cast %325 : vector<1x8x192xf32> to vector<8x192xf32>
    %327 = arith.truncf %321 : vector<8x64xf32> to vector<8x64xbf16>
    %cst_150 = arith.constant dense<0.000000e+00> : vector<8x192xf32>
    %328 = tpu.matmul %327, %292, %cst_150 {dimension_numbers = #tpu.dot_dimension_numbers<[1], [0], [0], [1], [0, 0, 1, 1], [], []>} : vector<8x64xbf16>, vector<64x192xbf16>, vector<8x192xf32> -> vector<8x192xf32>
    %329 = vector.extract_strided_slice %326 {offsets = [0, 0], sizes = [8, 128], strides = [1, 1]} : vector<8x192xf32> to vector<8x128xf32>
    %330 = vector.extract_strided_slice %328 {offsets = [0, 0], sizes = [8, 128], strides = [1, 1]} : vector<8x192xf32> to vector<8x128xf32>
    %331 = arith.addf %329, %330 : vector<8x128xf32>
    %332 = arith.negf %331 : vector<8x128xf32>
    %333 = math.exp %332 : vector<8x128xf32>
    %cst_151 = arith.constant 1.000000e+00 : f32
    %334 = vector.broadcast %cst_151 : f32 to vector<8x128xf32>
    %335 = arith.addf %334, %333 : vector<8x128xf32>
    %336 = arith.divf %334, %335 : vector<8x128xf32>
    %337 = vector.extract_strided_slice %336 {offsets = [0, 0], sizes = [8, 64], strides = [1, 1]} : vector<8x128xf32> to vector<8x64xf32>
    %338 = vector.extract_strided_slice %336 {offsets = [0, 64], sizes = [8, 64], strides = [1, 1]} : vector<8x128xf32> to vector<8x64xf32>
    %339 = vector.extract_strided_slice %326 {offsets = [0, 128], sizes = [8, 64], strides = [1, 1]} : vector<8x192xf32> to vector<8x64xf32>
    %340 = vector.extract_strided_slice %328 {offsets = [0, 128], sizes = [8, 64], strides = [1, 1]} : vector<8x192xf32> to vector<8x64xf32>
    %341 = arith.addf %340, %295 : vector<8x64xf32>
    %342 = arith.mulf %337, %341 : vector<8x64xf32>
    %343 = arith.addf %339, %342 : vector<8x64xf32>
    %344 = math.tanh %343 : vector<8x64xf32>
    %cst_152 = arith.constant 1.000000e+00 : f32
    %345 = vector.broadcast %cst_152 : f32 to vector<8x64xf32>
    %346 = arith.subf %345, %338 : vector<8x64xf32>
    %347 = arith.mulf %346, %344 : vector<8x64xf32>
    %348 = arith.mulf %338, %321 : vector<8x64xf32>
    %349 = arith.addf %347, %348 : vector<8x64xf32>
    %c1_153 = arith.constant 1 : index
    %c0_154 = arith.constant 0 : index
    %c0_155 = arith.constant 0 : index
    %350 = vector.load %arg5[%c1_153, %c0_154, %c0_155] : memref<8x8x64xf32, #tpu.memory_space<vmem>>, vector<1x8x64xf32>
    %351 = vector.shape_cast %350 : vector<1x8x64xf32> to vector<8x64xf32>
    %352 = vector.shape_cast %349 : vector<8x64xf32> to vector<1x8x64xf32>
    tpu.vector_store %arg5[%c1_153, %c0_154, %c0_155], %352 {strides = array<i32>} : memref<8x8x64xf32, #tpu.memory_space<vmem>>, vector<1x8x64xf32>,
    %c2_156 = arith.constant 2 : index
    %c0_157 = arith.constant 0 : index
    %c0_158 = arith.constant 0 : index
    %353 = vector.load %arg4[%c2_156, %c0_157, %c0_158] : memref<8x8x192xf32, #tpu.memory_space<vmem>>, vector<1x8x192xf32>
    %354 = vector.shape_cast %353 : vector<1x8x192xf32> to vector<8x192xf32>
    %355 = arith.truncf %349 : vector<8x64xf32> to vector<8x64xbf16>
    %cst_159 = arith.constant dense<0.000000e+00> : vector<8x192xf32>
    %356 = tpu.matmul %355, %292, %cst_159 {dimension_numbers = #tpu.dot_dimension_numbers<[1], [0], [0], [1], [0, 0, 1, 1], [], []>} : vector<8x64xbf16>, vector<64x192xbf16>, vector<8x192xf32> -> vector<8x192xf32>
    %357 = vector.extract_strided_slice %354 {offsets = [0, 0], sizes = [8, 128], strides = [1, 1]} : vector<8x192xf32> to vector<8x128xf32>
    %358 = vector.extract_strided_slice %356 {offsets = [0, 0], sizes = [8, 128], strides = [1, 1]} : vector<8x192xf32> to vector<8x128xf32>
    %359 = arith.addf %357, %358 : vector<8x128xf32>
    %360 = arith.negf %359 : vector<8x128xf32>
    %361 = math.exp %360 : vector<8x128xf32>
    %cst_160 = arith.constant 1.000000e+00 : f32
    %362 = vector.broadcast %cst_160 : f32 to vector<8x128xf32>
    %363 = arith.addf %362, %361 : vector<8x128xf32>
    %364 = arith.divf %362, %363 : vector<8x128xf32>
    %365 = vector.extract_strided_slice %364 {offsets = [0, 0], sizes = [8, 64], strides = [1, 1]} : vector<8x128xf32> to vector<8x64xf32>
    %366 = vector.extract_strided_slice %364 {offsets = [0, 64], sizes = [8, 64], strides = [1, 1]} : vector<8x128xf32> to vector<8x64xf32>
    %367 = vector.extract_strided_slice %354 {offsets = [0, 128], sizes = [8, 64], strides = [1, 1]} : vector<8x192xf32> to vector<8x64xf32>
    %368 = vector.extract_strided_slice %356 {offsets = [0, 128], sizes = [8, 64], strides = [1, 1]} : vector<8x192xf32> to vector<8x64xf32>
    %369 = arith.addf %368, %295 : vector<8x64xf32>
    %370 = arith.mulf %365, %369 : vector<8x64xf32>
    %371 = arith.addf %367, %370 : vector<8x64xf32>
    %372 = math.tanh %371 : vector<8x64xf32>
    %cst_161 = arith.constant 1.000000e+00 : f32
    %373 = vector.broadcast %cst_161 : f32 to vector<8x64xf32>
    %374 = arith.subf %373, %366 : vector<8x64xf32>
    %375 = arith.mulf %374, %372 : vector<8x64xf32>
    %376 = arith.mulf %366, %349 : vector<8x64xf32>
    %377 = arith.addf %375, %376 : vector<8x64xf32>
    %c2_162 = arith.constant 2 : index
    %c0_163 = arith.constant 0 : index
    %c0_164 = arith.constant 0 : index
    %378 = vector.load %arg5[%c2_162, %c0_163, %c0_164] : memref<8x8x64xf32, #tpu.memory_space<vmem>>, vector<1x8x64xf32>
    %379 = vector.shape_cast %378 : vector<1x8x64xf32> to vector<8x64xf32>
    %380 = vector.shape_cast %377 : vector<8x64xf32> to vector<1x8x64xf32>
    tpu.vector_store %arg5[%c2_162, %c0_163, %c0_164], %380 {strides = array<i32>} : memref<8x8x64xf32, #tpu.memory_space<vmem>>, vector<1x8x64xf32>,
    %c3_165 = arith.constant 3 : index
    %c0_166 = arith.constant 0 : index
    %c0_167 = arith.constant 0 : index
    %381 = vector.load %arg4[%c3_165, %c0_166, %c0_167] : memref<8x8x192xf32, #tpu.memory_space<vmem>>, vector<1x8x192xf32>
    %382 = vector.shape_cast %381 : vector<1x8x192xf32> to vector<8x192xf32>
    %383 = arith.truncf %377 : vector<8x64xf32> to vector<8x64xbf16>
    %cst_168 = arith.constant dense<0.000000e+00> : vector<8x192xf32>
    %384 = tpu.matmul %383, %292, %cst_168 {dimension_numbers = #tpu.dot_dimension_numbers<[1], [0], [0], [1], [0, 0, 1, 1], [], []>} : vector<8x64xbf16>, vector<64x192xbf16>, vector<8x192xf32> -> vector<8x192xf32>
    %385 = vector.extract_strided_slice %382 {offsets = [0, 0], sizes = [8, 128], strides = [1, 1]} : vector<8x192xf32> to vector<8x128xf32>
    %386 = vector.extract_strided_slice %384 {offsets = [0, 0], sizes = [8, 128], strides = [1, 1]} : vector<8x192xf32> to vector<8x128xf32>
    %387 = arith.addf %385, %386 : vector<8x128xf32>
    %388 = arith.negf %387 : vector<8x128xf32>
    %389 = math.exp %388 : vector<8x128xf32>
    %cst_169 = arith.constant 1.000000e+00 : f32
    %390 = vector.broadcast %cst_169 : f32 to vector<8x128xf32>
    %391 = arith.addf %390, %389 : vector<8x128xf32>
    %392 = arith.divf %390, %391 : vector<8x128xf32>
    %393 = vector.extract_strided_slice %392 {offsets = [0, 0], sizes = [8, 64], strides = [1, 1]} : vector<8x128xf32> to vector<8x64xf32>
    %394 = vector.extract_strided_slice %392 {offsets = [0, 64], sizes = [8, 64], strides = [1, 1]} : vector<8x128xf32> to vector<8x64xf32>
    %395 = vector.extract_strided_slice %382 {offsets = [0, 128], sizes = [8, 64], strides = [1, 1]} : vector<8x192xf32> to vector<8x64xf32>
    %396 = vector.extract_strided_slice %384 {offsets = [0, 128], sizes = [8, 64], strides = [1, 1]} : vector<8x192xf32> to vector<8x64xf32>
    %397 = arith.addf %396, %295 : vector<8x64xf32>
    %398 = arith.mulf %393, %397 : vector<8x64xf32>
    %399 = arith.addf %395, %398 : vector<8x64xf32>
    %400 = math.tanh %399 : vector<8x64xf32>
    %cst_170 = arith.constant 1.000000e+00 : f32
    %401 = vector.broadcast %cst_170 : f32 to vector<8x64xf32>
    %402 = arith.subf %401, %394 : vector<8x64xf32>
    %403 = arith.mulf %402, %400 : vector<8x64xf32>
    %404 = arith.mulf %394, %377 : vector<8x64xf32>
    %405 = arith.addf %403, %404 : vector<8x64xf32>
    %c3_171 = arith.constant 3 : index
    %c0_172 = arith.constant 0 : index
    %c0_173 = arith.constant 0 : index
    %406 = vector.load %arg5[%c3_171, %c0_172, %c0_173] : memref<8x8x64xf32, #tpu.memory_space<vmem>>, vector<1x8x64xf32>
    %407 = vector.shape_cast %406 : vector<1x8x64xf32> to vector<8x64xf32>
    %408 = vector.shape_cast %405 : vector<8x64xf32> to vector<1x8x64xf32>
    tpu.vector_store %arg5[%c3_171, %c0_172, %c0_173], %408 {strides = array<i32>} : memref<8x8x64xf32, #tpu.memory_space<vmem>>, vector<1x8x64xf32>,
    %c4_174 = arith.constant 4 : index
    %c0_175 = arith.constant 0 : index
    %c0_176 = arith.constant 0 : index
    %409 = vector.load %arg4[%c4_174, %c0_175, %c0_176] : memref<8x8x192xf32, #tpu.memory_space<vmem>>, vector<1x8x192xf32>
    %410 = vector.shape_cast %409 : vector<1x8x192xf32> to vector<8x192xf32>
    %411 = arith.truncf %405 : vector<8x64xf32> to vector<8x64xbf16>
    %cst_177 = arith.constant dense<0.000000e+00> : vector<8x192xf32>
    %412 = tpu.matmul %411, %292, %cst_177 {dimension_numbers = #tpu.dot_dimension_numbers<[1], [0], [0], [1], [0, 0, 1, 1], [], []>} : vector<8x64xbf16>, vector<64x192xbf16>, vector<8x192xf32> -> vector<8x192xf32>
    %413 = vector.extract_strided_slice %410 {offsets = [0, 0], sizes = [8, 128], strides = [1, 1]} : vector<8x192xf32> to vector<8x128xf32>
    %414 = vector.extract_strided_slice %412 {offsets = [0, 0], sizes = [8, 128], strides = [1, 1]} : vector<8x192xf32> to vector<8x128xf32>
    %415 = arith.addf %413, %414 : vector<8x128xf32>
    %416 = arith.negf %415 : vector<8x128xf32>
    %417 = math.exp %416 : vector<8x128xf32>
    %cst_178 = arith.constant 1.000000e+00 : f32
    %418 = vector.broadcast %cst_178 : f32 to vector<8x128xf32>
    %419 = arith.addf %418, %417 : vector<8x128xf32>
    %420 = arith.divf %418, %419 : vector<8x128xf32>
    %421 = vector.extract_strided_slice %420 {offsets = [0, 0], sizes = [8, 64], strides = [1, 1]} : vector<8x128xf32> to vector<8x64xf32>
    %422 = vector.extract_strided_slice %420 {offsets = [0, 64], sizes = [8, 64], strides = [1, 1]} : vector<8x128xf32> to vector<8x64xf32>
    %423 = vector.extract_strided_slice %410 {offsets = [0, 128], sizes = [8, 64], strides = [1, 1]} : vector<8x192xf32> to vector<8x64xf32>
    %424 = vector.extract_strided_slice %412 {offsets = [0, 128], sizes = [8, 64], strides = [1, 1]} : vector<8x192xf32> to vector<8x64xf32>
    %425 = arith.addf %424, %295 : vector<8x64xf32>
    %426 = arith.mulf %421, %425 : vector<8x64xf32>
    %427 = arith.addf %423, %426 : vector<8x64xf32>
    %428 = math.tanh %427 : vector<8x64xf32>
    %cst_179 = arith.constant 1.000000e+00 : f32
    %429 = vector.broadcast %cst_179 : f32 to vector<8x64xf32>
    %430 = arith.subf %429, %422 : vector<8x64xf32>
    %431 = arith.mulf %430, %428 : vector<8x64xf32>
    %432 = arith.mulf %422, %405 : vector<8x64xf32>
    %433 = arith.addf %431, %432 : vector<8x64xf32>
    %c4_180 = arith.constant 4 : index
    %c0_181 = arith.constant 0 : index
    %c0_182 = arith.constant 0 : index
    %434 = vector.load %arg5[%c4_180, %c0_181, %c0_182] : memref<8x8x64xf32, #tpu.memory_space<vmem>>, vector<1x8x64xf32>
    %435 = vector.shape_cast %434 : vector<1x8x64xf32> to vector<8x64xf32>
    %436 = vector.shape_cast %433 : vector<8x64xf32> to vector<1x8x64xf32>
    tpu.vector_store %arg5[%c4_180, %c0_181, %c0_182], %436 {strides = array<i32>} : memref<8x8x64xf32, #tpu.memory_space<vmem>>, vector<1x8x64xf32>,
    %c5_183 = arith.constant 5 : index
    %c0_184 = arith.constant 0 : index
    %c0_185 = arith.constant 0 : index
    %437 = vector.load %arg4[%c5_183, %c0_184, %c0_185] : memref<8x8x192xf32, #tpu.memory_space<vmem>>, vector<1x8x192xf32>
    %438 = vector.shape_cast %437 : vector<1x8x192xf32> to vector<8x192xf32>
    %439 = arith.truncf %433 : vector<8x64xf32> to vector<8x64xbf16>
    %cst_186 = arith.constant dense<0.000000e+00> : vector<8x192xf32>
    %440 = tpu.matmul %439, %292, %cst_186 {dimension_numbers = #tpu.dot_dimension_numbers<[1], [0], [0], [1], [0, 0, 1, 1], [], []>} : vector<8x64xbf16>, vector<64x192xbf16>, vector<8x192xf32> -> vector<8x192xf32>
    %441 = vector.extract_strided_slice %438 {offsets = [0, 0], sizes = [8, 128], strides = [1, 1]} : vector<8x192xf32> to vector<8x128xf32>
    %442 = vector.extract_strided_slice %440 {offsets = [0, 0], sizes = [8, 128], strides = [1, 1]} : vector<8x192xf32> to vector<8x128xf32>
    %443 = arith.addf %441, %442 : vector<8x128xf32>
    %444 = arith.negf %443 : vector<8x128xf32>
    %445 = math.exp %444 : vector<8x128xf32>
    %cst_187 = arith.constant 1.000000e+00 : f32
    %446 = vector.broadcast %cst_187 : f32 to vector<8x128xf32>
    %447 = arith.addf %446, %445 : vector<8x128xf32>
    %448 = arith.divf %446, %447 : vector<8x128xf32>
    %449 = vector.extract_strided_slice %448 {offsets = [0, 0], sizes = [8, 64], strides = [1, 1]} : vector<8x128xf32> to vector<8x64xf32>
    %450 = vector.extract_strided_slice %448 {offsets = [0, 64], sizes = [8, 64], strides = [1, 1]} : vector<8x128xf32> to vector<8x64xf32>
    %451 = vector.extract_strided_slice %438 {offsets = [0, 128], sizes = [8, 64], strides = [1, 1]} : vector<8x192xf32> to vector<8x64xf32>
    %452 = vector.extract_strided_slice %440 {offsets = [0, 128], sizes = [8, 64], strides = [1, 1]} : vector<8x192xf32> to vector<8x64xf32>
    %453 = arith.addf %452, %295 : vector<8x64xf32>
    %454 = arith.mulf %449, %453 : vector<8x64xf32>
    %455 = arith.addf %451, %454 : vector<8x64xf32>
    %456 = math.tanh %455 : vector<8x64xf32>
    %cst_188 = arith.constant 1.000000e+00 : f32
    %457 = vector.broadcast %cst_188 : f32 to vector<8x64xf32>
    %458 = arith.subf %457, %450 : vector<8x64xf32>
    %459 = arith.mulf %458, %456 : vector<8x64xf32>
    %460 = arith.mulf %450, %433 : vector<8x64xf32>
    %461 = arith.addf %459, %460 : vector<8x64xf32>
    %c5_189 = arith.constant 5 : index
    %c0_190 = arith.constant 0 : index
    %c0_191 = arith.constant 0 : index
    %462 = vector.load %arg5[%c5_189, %c0_190, %c0_191] : memref<8x8x64xf32, #tpu.memory_space<vmem>>, vector<1x8x64xf32>
    %463 = vector.shape_cast %462 : vector<1x8x64xf32> to vector<8x64xf32>
    %464 = vector.shape_cast %461 : vector<8x64xf32> to vector<1x8x64xf32>
    tpu.vector_store %arg5[%c5_189, %c0_190, %c0_191], %464 {strides = array<i32>} : memref<8x8x64xf32, #tpu.memory_space<vmem>>, vector<1x8x64xf32>,
    %c6_192 = arith.constant 6 : index
    %c0_193 = arith.constant 0 : index
    %c0_194 = arith.constant 0 : index
    %465 = vector.load %arg4[%c6_192, %c0_193, %c0_194] : memref<8x8x192xf32, #tpu.memory_space<vmem>>, vector<1x8x192xf32>
    %466 = vector.shape_cast %465 : vector<1x8x192xf32> to vector<8x192xf32>
    %467 = arith.truncf %461 : vector<8x64xf32> to vector<8x64xbf16>
    %cst_195 = arith.constant dense<0.000000e+00> : vector<8x192xf32>
    %468 = tpu.matmul %467, %292, %cst_195 {dimension_numbers = #tpu.dot_dimension_numbers<[1], [0], [0], [1], [0, 0, 1, 1], [], []>} : vector<8x64xbf16>, vector<64x192xbf16>, vector<8x192xf32> -> vector<8x192xf32>
    %469 = vector.extract_strided_slice %466 {offsets = [0, 0], sizes = [8, 128], strides = [1, 1]} : vector<8x192xf32> to vector<8x128xf32>
    %470 = vector.extract_strided_slice %468 {offsets = [0, 0], sizes = [8, 128], strides = [1, 1]} : vector<8x192xf32> to vector<8x128xf32>
    %471 = arith.addf %469, %470 : vector<8x128xf32>
    %472 = arith.negf %471 : vector<8x128xf32>
    %473 = math.exp %472 : vector<8x128xf32>
    %cst_196 = arith.constant 1.000000e+00 : f32
    %474 = vector.broadcast %cst_196 : f32 to vector<8x128xf32>
    %475 = arith.addf %474, %473 : vector<8x128xf32>
    %476 = arith.divf %474, %475 : vector<8x128xf32>
    %477 = vector.extract_strided_slice %476 {offsets = [0, 0], sizes = [8, 64], strides = [1, 1]} : vector<8x128xf32> to vector<8x64xf32>
    %478 = vector.extract_strided_slice %476 {offsets = [0, 64], sizes = [8, 64], strides = [1, 1]} : vector<8x128xf32> to vector<8x64xf32>
    %479 = vector.extract_strided_slice %466 {offsets = [0, 128], sizes = [8, 64], strides = [1, 1]} : vector<8x192xf32> to vector<8x64xf32>
    %480 = vector.extract_strided_slice %468 {offsets = [0, 128], sizes = [8, 64], strides = [1, 1]} : vector<8x192xf32> to vector<8x64xf32>
    %481 = arith.addf %480, %295 : vector<8x64xf32>
    %482 = arith.mulf %477, %481 : vector<8x64xf32>
    %483 = arith.addf %479, %482 : vector<8x64xf32>
    %484 = math.tanh %483 : vector<8x64xf32>
    %cst_197 = arith.constant 1.000000e+00 : f32
    %485 = vector.broadcast %cst_197 : f32 to vector<8x64xf32>
    %486 = arith.subf %485, %478 : vector<8x64xf32>
    %487 = arith.mulf %486, %484 : vector<8x64xf32>
    %488 = arith.mulf %478, %461 : vector<8x64xf32>
    %489 = arith.addf %487, %488 : vector<8x64xf32>
    %c6_198 = arith.constant 6 : index
    %c0_199 = arith.constant 0 : index
    %c0_200 = arith.constant 0 : index
    %490 = vector.load %arg5[%c6_198, %c0_199, %c0_200] : memref<8x8x64xf32, #tpu.memory_space<vmem>>, vector<1x8x64xf32>
    %491 = vector.shape_cast %490 : vector<1x8x64xf32> to vector<8x64xf32>
    %492 = vector.shape_cast %489 : vector<8x64xf32> to vector<1x8x64xf32>
    tpu.vector_store %arg5[%c6_198, %c0_199, %c0_200], %492 {strides = array<i32>} : memref<8x8x64xf32, #tpu.memory_space<vmem>>, vector<1x8x64xf32>,
    %c7_201 = arith.constant 7 : index
    %c0_202 = arith.constant 0 : index
    %c0_203 = arith.constant 0 : index
    %493 = vector.load %arg4[%c7_201, %c0_202, %c0_203] : memref<8x8x192xf32, #tpu.memory_space<vmem>>, vector<1x8x192xf32>
    %494 = vector.shape_cast %493 : vector<1x8x192xf32> to vector<8x192xf32>
    %495 = arith.truncf %489 : vector<8x64xf32> to vector<8x64xbf16>
    %cst_204 = arith.constant dense<0.000000e+00> : vector<8x192xf32>
    %496 = tpu.matmul %495, %292, %cst_204 {dimension_numbers = #tpu.dot_dimension_numbers<[1], [0], [0], [1], [0, 0, 1, 1], [], []>} : vector<8x64xbf16>, vector<64x192xbf16>, vector<8x192xf32> -> vector<8x192xf32>
    %497 = vector.extract_strided_slice %494 {offsets = [0, 0], sizes = [8, 128], strides = [1, 1]} : vector<8x192xf32> to vector<8x128xf32>
    %498 = vector.extract_strided_slice %496 {offsets = [0, 0], sizes = [8, 128], strides = [1, 1]} : vector<8x192xf32> to vector<8x128xf32>
    %499 = arith.addf %497, %498 : vector<8x128xf32>
    %500 = arith.negf %499 : vector<8x128xf32>
    %501 = math.exp %500 : vector<8x128xf32>
    %cst_205 = arith.constant 1.000000e+00 : f32
    %502 = vector.broadcast %cst_205 : f32 to vector<8x128xf32>
    %503 = arith.addf %502, %501 : vector<8x128xf32>
    %504 = arith.divf %502, %503 : vector<8x128xf32>
    %505 = vector.extract_strided_slice %504 {offsets = [0, 0], sizes = [8, 64], strides = [1, 1]} : vector<8x128xf32> to vector<8x64xf32>
    %506 = vector.extract_strided_slice %504 {offsets = [0, 64], sizes = [8, 64], strides = [1, 1]} : vector<8x128xf32> to vector<8x64xf32>
    %507 = vector.extract_strided_slice %494 {offsets = [0, 128], sizes = [8, 64], strides = [1, 1]} : vector<8x192xf32> to vector<8x64xf32>
    %508 = vector.extract_strided_slice %496 {offsets = [0, 128], sizes = [8, 64], strides = [1, 1]} : vector<8x192xf32> to vector<8x64xf32>
    %509 = arith.addf %508, %295 : vector<8x64xf32>
    %510 = arith.mulf %505, %509 : vector<8x64xf32>
    %511 = arith.addf %507, %510 : vector<8x64xf32>
    %512 = math.tanh %511 : vector<8x64xf32>
    %cst_206 = arith.constant 1.000000e+00 : f32
    %513 = vector.broadcast %cst_206 : f32 to vector<8x64xf32>
    %514 = arith.subf %513, %506 : vector<8x64xf32>
    %515 = arith.mulf %514, %512 : vector<8x64xf32>
    %516 = arith.mulf %506, %489 : vector<8x64xf32>
    %517 = arith.addf %515, %516 : vector<8x64xf32>
    %c7_207 = arith.constant 7 : index
    %c0_208 = arith.constant 0 : index
    %c0_209 = arith.constant 0 : index
    %518 = vector.load %arg5[%c7_207, %c0_208, %c0_209] : memref<8x8x64xf32, #tpu.memory_space<vmem>>, vector<1x8x64xf32>
    %519 = vector.shape_cast %518 : vector<1x8x64xf32> to vector<8x64xf32>
    %520 = vector.shape_cast %517 : vector<8x64xf32> to vector<1x8x64xf32>
    tpu.vector_store %arg5[%c7_207, %c0_208, %c0_209], %520 {strides = array<i32>} : memref<8x8x64xf32, #tpu.memory_space<vmem>>, vector<1x8x64xf32>,
    %c0_210 = arith.constant 0 : index
    %c0_211 = arith.constant 0 : index
    %c0_212 = arith.constant 0 : index
    %521 = vector.load %arg5[%c0_210, %c0_211, %c0_212] : memref<8x8x64xf32, #tpu.memory_space<vmem>>, vector<8x8x64xf32>
    %522 = vector.shape_cast %521 : vector<8x8x64xf32> to vector<64x64xf32>
    %c7_213 = arith.constant 7 : index
    %c0_214 = arith.constant 0 : index
    %c0_215 = arith.constant 0 : index
    %523 = vector.load %arg5[%c7_213, %c0_214, %c0_215] : memref<8x8x64xf32, #tpu.memory_space<vmem>>, vector<1x8x64xf32>
    %524 = vector.shape_cast %523 : vector<1x8x64xf32> to vector<8x64xf32>
    %c6_216 = arith.constant 6 : index
    %c0_217 = arith.constant 0 : index
    %c0_218 = arith.constant 0 : index
    %525 = vector.load %arg5[%c6_216, %c0_217, %c0_218] : memref<8x8x64xf32, #tpu.memory_space<vmem>>, vector<1x8x64xf32>
    %526 = vector.shape_cast %525 : vector<1x8x64xf32> to vector<8x64xf32>
    %c5_219 = arith.constant 5 : index
    %c0_220 = arith.constant 0 : index
    %c0_221 = arith.constant 0 : index
    %527 = vector.load %arg5[%c5_219, %c0_220, %c0_221] : memref<8x8x64xf32, #tpu.memory_space<vmem>>, vector<1x8x64xf32>
    %528 = vector.shape_cast %527 : vector<1x8x64xf32> to vector<8x64xf32>
    %c4_222 = arith.constant 4 : index
    %c0_223 = arith.constant 0 : index
    %c0_224 = arith.constant 0 : index
    %529 = vector.load %arg5[%c4_222, %c0_223, %c0_224] : memref<8x8x64xf32, #tpu.memory_space<vmem>>, vector<1x8x64xf32>
    %530 = vector.shape_cast %529 : vector<1x8x64xf32> to vector<8x64xf32>
    %c3_225 = arith.constant 3 : index
    %c0_226 = arith.constant 0 : index
    %c0_227 = arith.constant 0 : index
    %531 = vector.load %arg5[%c3_225, %c0_226, %c0_227] : memref<8x8x64xf32, #tpu.memory_space<vmem>>, vector<1x8x64xf32>
    %532 = vector.shape_cast %531 : vector<1x8x64xf32> to vector<8x64xf32>
    %c2_228 = arith.constant 2 : index
    %c0_229 = arith.constant 0 : index
    %c0_230 = arith.constant 0 : index
    %533 = vector.load %arg5[%c2_228, %c0_229, %c0_230] : memref<8x8x64xf32, #tpu.memory_space<vmem>>, vector<1x8x64xf32>
    %534 = vector.shape_cast %533 : vector<1x8x64xf32> to vector<8x64xf32>
    %c1_231 = arith.constant 1 : index
    %c0_232 = arith.constant 0 : index
    %c0_233 = arith.constant 0 : index
    %535 = vector.load %arg5[%c1_231, %c0_232, %c0_233] : memref<8x8x64xf32, #tpu.memory_space<vmem>>, vector<1x8x64xf32>
    %536 = vector.shape_cast %535 : vector<1x8x64xf32> to vector<8x64xf32>
    %c0_234 = arith.constant 0 : index
    %c0_235 = arith.constant 0 : index
    %c0_236 = arith.constant 0 : index
    %537 = vector.load %arg5[%c0_234, %c0_235, %c0_236] : memref<8x8x64xf32, #tpu.memory_space<vmem>>, vector<1x8x64xf32>
    %538 = vector.shape_cast %537 : vector<1x8x64xf32> to vector<8x64xf32>
    %539 = tpu.concatenate %524, %526, %528, %530, %532, %534, %536, %538 in 0 : vector<8x64xf32>, vector<8x64xf32>, vector<8x64xf32>, vector<8x64xf32>, vector<8x64xf32>, vector<8x64xf32>, vector<8x64xf32>, vector<8x64xf32> -> vector<64x64xf32>
    %cst_237 = arith.constant 0.000000e+00 : f32
    %540 = vector.broadcast %cst_237 : f32 to vector<64x64xf32>
    %541 = arith.cmpf oge, %522, %540 : vector<64x64xf32>
    %cst_238 = arith.constant 0.00999999977 : f32
    %542 = vector.broadcast %cst_238 : f32 to vector<64x64xf32>
    %543 = arith.mulf %542, %522 : vector<64x64xf32>
    %544 = arith.select %541, %522, %543 : vector<64x64xi1>, vector<64x64xf32>
    %cst_239 = arith.constant 0.000000e+00 : f32
    %545 = vector.broadcast %cst_239 : f32 to vector<64x64xf32>
    %546 = arith.cmpf oge, %539, %545 : vector<64x64xf32>
    %cst_240 = arith.constant 0.00999999977 : f32
    %547 = vector.broadcast %cst_240 : f32 to vector<64x64xf32>
    %548 = arith.mulf %547, %539 : vector<64x64xf32>
    %549 = arith.select %546, %539, %548 : vector<64x64xi1>, vector<64x64xf32>
    %550 = arith.truncf %544 : vector<64x64xf32> to vector<64x64xbf16>
    %c320 = arith.constant 320 : index
    %c0_241 = arith.constant 0 : index
    %551 = vector.load %arg1[%c320, %c0_241] : memref<448x192xbf16, #tpu.memory_space<vmem>>, vector<64x192xbf16>
    %cst_242 = arith.constant dense<0.000000e+00> : vector<64x192xf32>
    %552 = tpu.matmul %550, %551, %cst_242 {dimension_numbers = #tpu.dot_dimension_numbers<[1], [0], [0], [1], [0, 0, 1, 1], [], []>} : vector<64x64xbf16>, vector<64x192xbf16>, vector<64x192xf32> -> vector<64x192xf32>
    %553 = arith.truncf %549 : vector<64x64xf32> to vector<64x64xbf16>
    %c384 = arith.constant 384 : index
    %c0_243 = arith.constant 0 : index
    %554 = vector.load %arg1[%c384, %c0_243] : memref<448x192xbf16, #tpu.memory_space<vmem>>, vector<64x192xbf16>
    %cst_244 = arith.constant dense<0.000000e+00> : vector<64x192xf32>
    %555 = tpu.matmul %553, %554, %cst_244 {dimension_numbers = #tpu.dot_dimension_numbers<[1], [0], [0], [1], [0, 0, 1, 1], [], []>} : vector<64x64xbf16>, vector<64x192xbf16>, vector<64x192xf32> -> vector<64x192xf32>
    %556 = arith.addf %552, %555 : vector<64x192xf32>
    %557 = vector.extract_strided_slice %556 {offsets = [0, 0], sizes = [64, 32], strides = [1, 1]} : vector<64x192xf32> to vector<64x32xf32>
    %558 = vector.extract_strided_slice %0 {offsets = [4, 0], sizes = [1, 32], strides = [1, 1]} : vector<8x192xf32> to vector<1x32xf32>
    %559 = vector.broadcast %558 : vector<1x32xf32> to vector<64x32xf32>
    %560 = arith.addf %557, %559 : vector<64x32xf32>
    %561 = math.tanh %560 : vector<64x32xf32>
    %c0_245 = arith.constant 0 : index
    %c0_246 = arith.constant 0 : index
    %562 = vector.load %arg3[%c0_245, %c0_246] : memref<64x32xf32, #tpu.memory_space<vmem>>, vector<64x32xf32>
    tpu.vector_store %arg3[%c0_245, %c0_246], %561 {strides = array<i32>} : memref<64x32xf32, #tpu.memory_space<vmem>>, vector<64x32xf32>,
    return
  }
}

</mosaic_0001>

<bundles_post_ra>
// kernel: simple_lstm_model_forward.1
= control target key start
LH: loop header
LB: loop body
LE: loop exit
PB: predicated region body
PF: predicated region fallthrough
CT: control target
= control target key end

     0   :  { %v2593_v1 = vmov 0   ;;  %vm75_vm0 = vcmask 261120   ;;  %v266_v33 = vlaneseq  ;;  %vm291_vm1 = vcmask 523264   ;;  %s2594_s9 = smov 64   ;;  %s3356_s1 = inlined_call_operand.vmem [shape: bf16[448,192], index: 1, kind: input, shape index: {}]   ;;  %s3357_s0 = inlined_call_operand.vmem [shape: f32[8,8,32], index: 0, kind: input, shape index: {}]   ;;  %s3358_s2 = inlined_call_operand.vmem [shape: f32[8,192], index: 2, kind: input, shape index: {}]   ;;  %s3359_s3 = inlined_call_operand.vmem [shape: f32[64,32], index: 3, kind: output, shape index: {}]  }
   0x1   :  { %v2396_v0 = vld [vmem:[%s3356_s1 + $0x34] ss:$8 sps:$4 sm:$0xff]   ;;  %120 = vmatprep.mubr.bf16.mxu0 %v2593_v1  ;;  %225 = vmatprep.mubr.bf16.mxu1 %v2593_v1  ;;  %v2400_v3 = vld [vmem:[%s3356_s1 + $0x30] ss:$8 sps:$4 sm:$0xff]   ;;  %v2402_v5 = vld [vmem:[%s3356_s1 + $0x24] ss:$8 sps:$4 sm:$0xff]  }
   0x2   :  { %v2398_v2 = vld [vmem:[%s3356_s1 + $0x14] ss:$8 sps:$4 sm:$0xff]   ;;  %100 = vmatprep.subr.bf16.mxu0 %v2396_v0  ;;  %v2401_v4 = vld [vmem:[%s3356_s1 + $0x10] ss:$8 sps:$4 sm:$0xff]   ;;  %v2404_v6 = vld [vmem:[%s3356_s1 + $0x4] ss:$8 sps:$4 sm:$0xff]  }
   0x3   :  { %205 = vmatprep.subr.bf16.mxu1 %v2398_v2  ;;  %101 = vmatpush1.bf16.msra.mxu0 %v2400_v3  ;;  %v2406_v7 = vld [vmem:[%s3356_s1 + $0x20] ss:$8 sps:$4 sm:$0xff]   ;;  %v2277_v9 = vld [vmem:[%s3357_s0 + $0x38] sm:$0xff]  ;;  %v2278_v10 = vld [vmem:[%s3357_s0 + $0x30] sm:$0xff]  ;;  %v2749_v34 = vshrl.u32 %v266_v33, 7 }
   0x4   :  { %206 = vmatpush1.bf16.msra.mxu1 %v2401_v4  ;;  %102 = vmatprep.subr.bf16.mxu0 %v2402_v5  ;;  %v2407_v8 = vld [vmem:[%s3356_s1] ss:$8 sps:$4 sm:$0xff]   ;;  %v51_v13 = vpack.c.bf16 %v2278_v10, %v2277_v9  ;;  %v2656_v15 = vld [vmem:[%s3356_s1 + $0x74] ss:$8 sps:$4 sm:$0xff]   ;;  %v2661_v16 = vld [vmem:[%s3356_s1 + $0x70] ss:$8 sps:$4 sm:$0xff]   ;;  %v50_v32 = vpack.c.bf16 %v2277_v9, %v2278_v10 }
   0x5   :  { %207 = vmatprep.subr.bf16.mxu1 %v2404_v6  ;;  %v17_v11 = vld [vmem:[%s3357_s0] sm:$0xff]  ;;  %v18_v12 = vld [vmem:[%s3357_s0 + $0x8] sm:$0xff]  ;;  %v19_v20 = vld [vmem:[%s3357_s0 + $0x10] sm:$0xff]  ;;  %v268_v36 = vsub.s32 0, %v2749_v34 }
   0x6   :  { %v47_v14 = vpack.c.bf16 %v18_v12, %v17_v11  ;;  %v2279_v17 = vld [vmem:[%s3357_s0 + $0x28] sm:$0xff]  ;;  %v2280_v18 = vld [vmem:[%s3357_s0 + $0x20] sm:$0xff]  ;;  %v20_v21 = vld [vmem:[%s3357_s0 + $0x18] sm:$0xff]  ;;  %v54_v31 = vpack.c.bf16 %v17_v11, %v18_v12 }
   0x7   :  { %103 = vmatpush1.bf16.msra.mxu0 %v2406_v7  ;;  %v2674_v19 = vld [vmem:[%s3356_s1 + $0x64] ss:$8 sps:$4 sm:$0xff]   ;;  %v2689_v22 = vld [vmem:[%s3356_s1 + $0x60] ss:$8 sps:$4 sm:$0xff]   ;;  %v2696_v23 = vld [vmem:[%s3356_s1 + $0x54] ss:$8 sps:$4 sm:$0xff]   ;;  %v52_v24 = vpack.c.bf16 %v2280_v18, %v2279_v17  ;;  %v48_v25 = vpack.c.bf16 %v20_v21, %v19_v20  ;;  %v53_v29 = vpack.c.bf16 %v19_v20, %v20_v21  ;;  %v49_v30 = vpack.c.bf16 %v2279_v17, %v2280_v18 }
   0x8   :  { %208 = vmatpush1.bf16.msra.mxu1 %v2407_v8  ;;  %372 = vmatprep.subr.bf16.mxu0 %v2656_v15  ;;  %v2702_v26 = vld [vmem:[%s3356_s1 + $0x50] ss:$8 sps:$4 sm:$0xff]   ;;  %v2709_v27 = vld [vmem:[%s3356_s1 + $0x44] ss:$8 sps:$4 sm:$0xff]   ;;  %v2718_v28 = vld [vmem:[%s3356_s1 + $0x40] ss:$8 sps:$4 sm:$0xff]  }
   0x9   :  { %447 = vmatprep.subr.bf16.mxu1 %v2656_v15  ;;  %v2754_v35 = vld [vmem:[%s3358_s2 + $0x8] sm:$0xff]  ;;  %v2763_v40 = vld [vmem:[%s3358_s2] sm:$0xff] }
   0xa   :  { %2288 = vmatmul.mubr.msk.bf16.vlgmr.msra.gmra.mxu0 %vm75_vm0, %v51_v13  ;;  %v2758_v39 = vrot.slane %v2754_v35, %v268_v36  ;;  %v269_v46 = vrot.slane %v2763_v40, %v268_v36 }
   0xb   :  { %2296 = vmatmul.mubr.msk.bf16.vlgmr.msra.gmra.mxu1 %vm75_vm0, %v47_v14  ;;  %373 = vmatpush1.bf16.msra.mxu0 %v2661_v16 }
   0xc   :  { %130 = vmatprep.mubr.bf16.mxu0 %v2593_v1  ;;  %235 = vmatprep.mubr.bf16.mxu1 %v2593_v1 }
   0xd   :  { %374 = vmatprep.subr.bf16.mxu0 %v2674_v19  ;;  %448 = vmatpush1.bf16.msra.mxu1 %v2661_v16 }
   0xe   :  { %449 = vmatprep.subr.bf16.mxu1 %v2674_v19 }
   0xf   :  { %375 = vmatpush1.bf16.msra.mxu0 %v2689_v22 }
  0x10   :  { %376 = vmatprep.subr.bf16.mxu0 %v2696_v23 }
  0x11   :  { %450 = vmatpush1.bf16.msra.mxu1 %v2689_v22 }
  0x12   :  { %2289 = vmatmul.mubr.msk.bf16.gmra.mxu0 %vm75_vm0, %v52_v24  ;;  %451 = vmatprep.subr.bf16.mxu1 %v2696_v23 }
  0x13   :  { %2297 = vmatmul.mubr.msk.bf16.gmra.mxu1 %vm75_vm0, %v48_v25  ;;  %140 = vmatprep.mubr.bf16.mxu0 %v2593_v1 }
  0x14   :  { %245 = vmatprep.mubr.bf16.mxu1 %v2593_v1  ;;  %377 = vmatpush1.bf16.msra.mxu0 %v2702_v26 }
  0x15   :  { %378 = vmatprep.subr.bf16.mxu0 %v2709_v27  ;;  %452 = vmatpush1.bf16.msra.mxu1 %v2702_v26 }
  0x16   :  { %453 = vmatprep.subr.bf16.mxu1 %v2709_v27 }
  0x18   :  { %379 = vmatpush1.bf16.msra.mxu0 %v2718_v28 }
  0x19   :  { %454 = vmatpush1.bf16.msra.mxu1 %v2718_v28  ;;  %523 = vmatprep.subr.bf16.mxu0 %v2656_v15 }
  0x1a   :  { %2290 = vmatmul.mubr.msk.bf16.gmra.mxu0 %vm75_vm0, %v53_v29  ;;  %599 = vmatprep.subr.bf16.mxu1 %v2656_v15 }
  0x1b   :  { %2298 = vmatmul.mubr.msk.bf16.gmra.mxu1 %vm75_vm0, %v49_v30  ;;  %150 = vmatprep.mubr.bf16.mxu0 %v2593_v1 }
  0x1c   :  { %255 = vmatprep.mubr.bf16.mxu1 %v2593_v1 }
  0x22   :  { %2291 = vmatmul.mubr.msk.bf16.gmra.mxu0 %vm75_vm0, %v54_v31 }
  0x23   :  { %2299 = vmatmul.mubr.msk.bf16.gmra.mxu1 %vm75_vm0, %v50_v32  ;;  %396 = vmatprep.mubr.bf16.mxu0 %v2593_v1 }
  0x24   :  { %471 = vmatprep.mubr.bf16.mxu1 %v2593_v1 }
  0x2a   :  { %397 = vmatmul.mubr.bf16.vlgmr.msra.gmra.mxu0 %v2593_v1 }
  0x2b   :  { %524 = vmatpush1.bf16.msra.mxu0 %v2661_v16  ;;  %547 = vmatprep.mubr.bf16.mxu0 %v2593_v1 }
  0x2c   :  { %525 = vmatprep.subr.bf16.mxu0 %v2674_v19 }
  0x2f   :  { %526 = vmatpush1.bf16.msra.mxu0 %v2689_v22 }
  0x30   :  { %527 = vmatprep.subr.bf16.mxu0 %v2696_v23 }
  0x33   :  { %528 = vmatpush1.bf16.msra.mxu0 %v2702_v26 }
  0x34   :  { %529 = vmatprep.subr.bf16.mxu0 %v2709_v27 }
  0x37   :  { %530 = vmatpush1.bf16.msra.mxu0 %v2718_v28 }
  0x38   :  { %675 = vmatprep.subr.bf16.mxu0 %v2656_v15 }
  0xca   :  { %v122_v37 = vpop.f32.mrf.mxu0 }
  0xcb   :  { %v227_v38 = vpop.f32.mrf.mxu1 }
  0xcc   :  { %v124_v41 = vpop.f32.mrf.mxu0 }
  0xcd   :  { %v229_v42 = vpop.f32.mrf.mxu1 }
  0xce   :  { %v230_v43 = vadd.f32 %v229_v42, %v124_v41  ;;  %v126_v44 = vpop.f32.mrf.mxu0  ;;  %v228_v42 = vadd.f32 %v227_v38, %v122_v37 }
  0xcf   :  { %v231_v45 = vpop.f32.mrf.mxu1 }
  0xd0   :  { %v275_v47 = vadd.f32 %v2758_v39, %v230_v43  ;;  %v232_v48 = vadd.f32 %v231_v45, %v126_v44  ;;  %v128_v49 = vpop.f32.mrf.mxu0 }
  0xd1   :  { %v233_v50 = vpop.f32.mrf.mxu1 }
  0xd2   :  { %292 = vst.msk [vmem:[#allocation2 + $0x8] sm:$0xff] %vm291_vm1, %v275_v47  ;;  %v2768_v51 = vadd.f32 %v269_v46, %v232_v48  ;;  %v234_v52 = vadd.f32 %v233_v50, %v128_v49  ;;  %v132_v53 = vpop.f32.mrf.mxu0 }
  0xd3   :  { %v237_v54 = vpop.f32.mrf.mxu1 }
  0xd4   :  { %v277_v55 = vadd.f32 %v2758_v39, %v234_v52  ;;  %v238_v56 = vadd.f32 %v237_v54, %v132_v53  ;;  %v134_v57 = vpop.f32.mrf.mxu0  ;;  %v274_v53 = vadd.f32 %v269_v46, %v228_v42 }
  0xd5   :  { %v239_v58 = vpop.f32.mrf.mxu1 }
  0xd6   :  { %294 = vst.msk [vmem:[#allocation2 + $0x18] sm:$0xff] %vm291_vm1, %v277_v55  ;;  %v2772_v59 = vadd.f32 %v269_v46, %v238_v56  ;;  %v240_v60 = vadd.f32 %v239_v58, %v134_v57  ;;  %v136_v61 = vpop.f32.mrf.mxu0 }
  0xd7   :  { %v241_v62 = vpop.f32.mrf.mxu1 }
  0xd8   :  { %v279_v63 = vadd.f32 %v2758_v39, %v240_v60  ;;  %v242_v0 = vadd.f32 %v241_v62, %v136_v61  ;;  %v138_v2 = vpop.f32.mrf.mxu0 }
  0xd9   :  { %v243_v3 = vpop.f32.mrf.mxu1 }
  0xda   :  { %296 = vst.msk [vmem:[#allocation2 + $0x28] sm:$0xff] %vm291_vm1, %v279_v63  ;;  %v2776_v4 = vadd.f32 %v269_v46, %v242_v0  ;;  %v244_v5 = vadd.f32 %v243_v3, %v138_v2  ;;  %v142_v6 = vpop.f32.mrf.mxu0  ;;  %v317_v0 = vsub.s32 2, %v2749_v34 }
  0xdb   :  { %v247_v7 = vpop.f32.mrf.mxu1 }
  0xdc   :  { %v281_v8 = vadd.f32 %v2758_v39, %v244_v5  ;;  %v248_v9 = vadd.f32 %v247_v7, %v142_v6  ;;  %v144_v10 = vpop.f32.mrf.mxu0  ;;  %v320_v5 = vld [vmem:[#allocation2 + $0x8] sm:$0xff] }
  0xdd   :  { %v249_v11 = vpop.f32.mrf.mxu1  ;;  %v431_v42 = vld [vmem:[#allocation2 + $0x18] sm:$0xff] }
  0xde   :  { %298 = vst.msk [vmem:[#allocation2 + $0x38] sm:$0xff] %vm291_vm1, %v281_v8  ;;  %v2780_v12 = vadd.f32 %v269_v46, %v248_v9  ;;  %v250_v13 = vadd.f32 %v249_v11, %v144_v10  ;;  %v146_v14 = vpop.f32.mrf.mxu0 }
  0xdf   :  { %v251_v17 = vpop.f32.mrf.mxu1 }
  0xe0   :  { %v283_v18 = vadd.f32 %v2758_v39, %v250_v13  ;;  %v252_v20 = vadd.f32 %v251_v17, %v146_v14  ;;  %v148_v21 = vpop.f32.mrf.mxu0 }
  0xe1   :  { %v253_v24 = vpop.f32.mrf.mxu1 }
  0xe2   :  { %300 = vst.msk [vmem:[#allocation2 + $0x48] sm:$0xff] %vm291_vm1, %v283_v18  ;;  %v2784_v25 = vadd.f32 %v269_v46, %v252_v20  ;;  %v254_v29 = vadd.f32 %v253_v24, %v148_v21  ;;  %v152_v30 = vpop.f32.mrf.mxu0 }
  0xe3   :  { %v257_v31 = vpop.f32.mrf.mxu1 }
  0xe4   :  { %v285_v32 = vadd.f32 %v2758_v39, %v254_v29  ;;  %v258_v33 = vadd.f32 %v257_v31, %v152_v30  ;;  %v154_v36 = vpop.f32.mrf.mxu0 }
  0xe5   :  { %v259_v41 = vpop.f32.mrf.mxu1 }
  0xe6   :  { %302 = vst.msk [vmem:[#allocation2 + $0x58] sm:$0xff] %vm291_vm1, %v285_v32  ;;  %v2788_v43 = vadd.f32 %v269_v46, %v258_v33  ;;  %v260_v44 = vadd.f32 %v259_v41, %v154_v36  ;;  %v156_v45 = vpop.f32.mrf.mxu0 }
  0xe7   :  { %v261_v47 = vpop.f32.mrf.mxu1 }
  0xe8   :  { %v287_v48 = vadd.f32 %v2758_v39, %v260_v44  ;;  %v262_v49 = vadd.f32 %v261_v47, %v156_v45  ;;  %v158_v50 = vpop.f32.mrf.mxu0 }
  0xe9   :  { %v263_v52 = vpop.f32.mrf.mxu1 }
  0xea   :  { %304 = vst.msk [vmem:[#allocation2 + $0x68] sm:$0xff] %vm291_vm1, %v287_v48  ;;  %v2792_v54 = vadd.f32 %v269_v46, %v262_v49  ;;  %v264_v55 = vadd.f32 %v263_v52, %v158_v50  ;;  %v398_v56 = vpop.f32.mrf.mxu0  ;;  %v2798_v46 = vrot.slane %v2763_v40, %v317_v0 }
  0xeb   :  { %v405_v38 = vadd.f32 %v398_v56, %v274_v53 }
  0xec   :  { %v289_v37 = vadd.f32 %v2758_v39, %v264_v55  ;;  %v400_v57 = vpop.f32.mrf.mxu0 }
  0xed   :  { %v2308_v58 = vmul.f32 -1.442695, %v405_v38  ;;  %v412_v2 = vadd.f32 %v400_v57, %v2798_v46 }
  0xee   :  { %306 = vst.msk [vmem:[#allocation2 + $0x78] sm:$0xff] %vm291_vm1, %v289_v37  ;;  %v402_v60 = vpop.f32.mrf.mxu0 }
  0xef   :  { %2480 = vpow2.f32 %v2308_v58 }
  0xf0   :  { %v403_v61 = vpop.f32.mrf.mxu0 }
  0xfc   :  { %v2481_v62 = vpop.eup %2480 }
  0xfd   :  { %v409_v63 = vadd.f32 1.0, %v2481_v62 }
  0xff   :  { %2482 = vrcp.f32 %v409_v63 }
 0x10c   :  { %v2483_v3 = vpop.eup %2482 }
 0x10d   :  { %v413_v39 = vmul.f32 %v2483_v3, %v412_v2  ;;  %v416_v8 = vsub.f32 1.0, %v2483_v3  ;;  %v422_v10 = vmul.f32 0.0, %v2483_v3  ;;  %v507_v2 = vld [vmem:[#allocation2 + $0x28] sm:$0xff] }
 0x10f   :  { %v414_v6 = vadd.f32 %v413_v39, %v320_v5 }
 0x111   :  { %2484 = vtanh.f32 %v414_v6 }
 0x11e   :  { %v2485_v7 = vpop.eup %2484 }
 0x11f   :  { %418 = vrot.lane.b32.xlu0 %v2485_v7, %s2594_s9 }
 0x191   :  { %v419_v9 = vpop.permute.xlu0 %418 }
 0x192   :  { %v421_v11 = vmul.f32 %v419_v9, %v416_v8 }
 0x194   :  { %v2802_v13 = vadd.f32 %v422_v10, %v421_v11 }
 0x196   :  { %v432_v14 = vpack.c.bf16 %v2802_v13, %v2802_v13 }
 0x198   :  { %434 = vrot.lane.b32.xlu0 %v432_v14, %s2594_s9 }
 0x20a   :  { %v435_v17 = vpop.permute.xlu0 %434 }
 0x20b   :  { %2309 = vmatmul.mubr.msk.bf16.vlgmr.msra.gmra.mxu1 %vm291_vm1, %v435_v17 }
 0x20c   :  { %600 = vmatpush1.bf16.msra.mxu1 %v2661_v16  ;;  %623 = vmatprep.mubr.bf16.mxu1 %v2593_v1 }
 0x20d   :  { %601 = vmatprep.subr.bf16.mxu1 %v2674_v19 }
 0x210   :  { %602 = vmatpush1.bf16.msra.mxu1 %v2689_v22 }
 0x211   :  { %603 = vmatprep.subr.bf16.mxu1 %v2696_v23 }
 0x214   :  { %604 = vmatpush1.bf16.msra.mxu1 %v2702_v26 }
 0x215   :  { %605 = vmatprep.subr.bf16.mxu1 %v2709_v27 }
 0x218   :  { %606 = vmatpush1.bf16.msra.mxu1 %v2718_v28 }
 0x219   :  { %751 = vmatprep.subr.bf16.mxu1 %v2656_v15 }
 0x2cb   :  { %v473_v18 = vpop.f32.mrf.mxu1 }
 0x2cc   :  { %v480_v20 = vadd.f32 %v473_v18, %v2768_v51 }
 0x2cd   :  { %v475_v21 = vpop.f32.mrf.mxu1 }
 0x2ce   :  { %v2310_v24 = vmul.f32 -1.442695, %v480_v20  ;;  %v487_v33 = vadd.f32 %v475_v21, %v2798_v46 }
 0x2cf   :  { %v477_v29 = vpop.f32.mrf.mxu1 }
 0x2d0   :  { %2486 = vpow2.f32 %v2310_v24 }
 0x2d1   :  { %v478_v30 = vpop.f32.mrf.mxu1 }
 0x2dd   :  { %v2487_v31 = vpop.eup %2486 }
 0x2de   :  { %v484_v32 = vadd.f32 1.0, %v2487_v31 }
 0x2e0   :  { %2488 = vrcp.f32 %v484_v32 }
 0x2ed   :  { %v2489_v36 = vpop.eup %2488 }
 0x2ee   :  { %v488_v41 = vmul.f32 %v2489_v36, %v487_v33  ;;  %v491_v47 = vsub.f32 1.0, %v2489_v36  ;;  %v497_v48 = vmul.f32 %v2489_v36, %v2802_v13  ;;  %v583_v33 = vld [vmem:[#allocation2 + $0x38] sm:$0xff] }
 0x2f0   :  { %v489_v44 = vadd.f32 %v488_v41, %v431_v42 }
 0x2f2   :  { %2490 = vtanh.f32 %v489_v44 }
 0x2ff   :  { %v2491_v45 = vpop.eup %2490 }
 0x300   :  { %493 = vrot.lane.b32.xlu1 %v2491_v45, %s2594_s9 }
 0x372   :  { %v494_v51 = vpop.permute.xlu1 %493 }
 0x373   :  { %v496_v49 = vmul.f32 %v494_v51, %v491_v47 }
 0x375   :  { %v2821_v50 = vadd.f32 %v497_v48, %v496_v49 }
 0x377   :  { %v508_v52 = vpack.c.bf16 %v2821_v50, %v2821_v50 }
 0x379   :  { %510 = vrot.lane.b32.xlu1 %v508_v52, %s2594_s9 }
 0x3eb   :  { %v511_v53 = vpop.permute.xlu1 %510 }
 0x3ec   :  { %2311 = vmatmul.mubr.msk.bf16.vlgmr.msra.gmra.mxu0 %vm291_vm1, %v511_v53 }
 0x3ed   :  { %676 = vmatpush1.bf16.msra.mxu0 %v2661_v16  ;;  %699 = vmatprep.mubr.bf16.mxu0 %v2593_v1 }
 0x3ee   :  { %677 = vmatprep.subr.bf16.mxu0 %v2674_v19 }
 0x3f1   :  { %678 = vmatpush1.bf16.msra.mxu0 %v2689_v22 }
 0x3f2   :  { %679 = vmatprep.subr.bf16.mxu0 %v2696_v23 }
 0x3f5   :  { %680 = vmatpush1.bf16.msra.mxu0 %v2702_v26 }
 0x3f6   :  { %681 = vmatprep.subr.bf16.mxu0 %v2709_v27 }
 0x3f9   :  { %682 = vmatpush1.bf16.msra.mxu0 %v2718_v28 }
 0x3fa   :  { %827 = vmatprep.subr.bf16.mxu0 %v2656_v15 }
 0x4ac   :  { %v549_v55 = vpop.f32.mrf.mxu0 }
 0x4ad   :  { %v556_v56 = vadd.f32 %v549_v55, %v2772_v59 }
 0x4ae   :  { %v551_v37 = vpop.f32.mrf.mxu0 }
 0x4af   :  { %v2312_v38 = vmul.f32 -1.442695, %v556_v56  ;;  %v563_v62 = vadd.f32 %v551_v37, %v2798_v46 }
 0x4b0   :  { %v553_v57 = vpop.f32.mrf.mxu0 }
 0x4b1   :  { %2492 = vpow2.f32 %v2312_v38 }
 0x4b2   :  { %v554_v58 = vpop.f32.mrf.mxu0 }
 0x4be   :  { %v2493_v60 = vpop.eup %2492 }
 0x4bf   :  { %v560_v61 = vadd.f32 1.0, %v2493_v60 }
 0x4c1   :  { %2494 = vrcp.f32 %v560_v61  ;;  %v659_v61 = vld [vmem:[#allocation2 + $0x48] sm:$0xff] }
 0x4ce   :  { %v2495_v63 = vpop.eup %2494 }
 0x4cf   :  { %v564_v0 = vmul.f32 %v2495_v63, %v563_v62  ;;  %v567_v5 = vsub.f32 1.0, %v2495_v63  ;;  %v573_v6 = vmul.f32 %v2495_v63, %v2821_v50 }
 0x4d1   :  { %v565_v3 = vadd.f32 %v564_v0, %v507_v2 }
 0x4d3   :  { %2496 = vtanh.f32 %v565_v3 }
 0x4e0   :  { %v2497_v39 = vpop.eup %2496 }
 0x4e1   :  { %569 = vrot.lane.b32.xlu0 %v2497_v39, %s2594_s9 }
 0x553   :  { %v570_v59 = vpop.permute.xlu0 %569 }
 0x554   :  { %v572_v7 = vmul.f32 %v570_v59, %v567_v5 }
 0x556   :  { %v2840_v8 = vadd.f32 %v573_v6, %v572_v7 }
 0x558   :  { %v584_v9 = vpack.c.bf16 %v2840_v8, %v2840_v8 }
 0x55a   :  { %586 = vrot.lane.b32.xlu1 %v584_v9, %s2594_s9 }
 0x5cc   :  { %v587_v10 = vpop.permute.xlu1 %586 }
 0x5cd   :  { %2313 = vmatmul.mubr.msk.bf16.vlgmr.msra.gmra.mxu1 %vm291_vm1, %v587_v10 }
 0x5ce   :  { %752 = vmatpush1.bf16.msra.mxu1 %v2661_v16  ;;  %775 = vmatprep.mubr.bf16.mxu1 %v2593_v1 }
 0x5cf   :  { %753 = vmatprep.subr.bf16.mxu1 %v2674_v19 }
 0x5d2   :  { %754 = vmatpush1.bf16.msra.mxu1 %v2689_v22 }
 0x5d3   :  { %755 = vmatprep.subr.bf16.mxu1 %v2696_v23 }
 0x5d6   :  { %756 = vmatpush1.bf16.msra.mxu1 %v2702_v26 }
 0x5d7   :  { %757 = vmatprep.subr.bf16.mxu1 %v2709_v27 }
 0x5da   :  { %758 = vmatpush1.bf16.msra.mxu1 %v2718_v28 }
 0x5db   :  { %903 = vmatprep.subr.bf16.mxu1 %v2656_v15 }
 0x68d   :  { %v625_v11 = vpop.f32.mrf.mxu1 }
 0x68e   :  { %v632_v14 = vadd.f32 %v625_v11, %v2776_v4 }
 0x68f   :  { %v627_v17 = vpop.f32.mrf.mxu1 }
 0x690   :  { %v2314_v18 = vmul.f32 -1.442695, %v632_v14  ;;  %v639_v30 = vadd.f32 %v627_v17, %v2798_v46 }
 0x691   :  { %v629_v20 = vpop.f32.mrf.mxu1 }
 0x692   :  { %2498 = vpow2.f32 %v2314_v18 }
 0x693   :  { %v630_v21 = vpop.f32.mrf.mxu1 }
 0x69f   :  { %v2499_v24 = vpop.eup %2498 }
 0x6a0   :  { %v636_v29 = vadd.f32 1.0, %v2499_v24 }
 0x6a2   :  { %2500 = vrcp.f32 %v636_v29 }
 0x6af   :  { %v2501_v31 = vpop.eup %2500 }
 0x6b0   :  { %v640_v32 = vmul.f32 %v2501_v31, %v639_v30  ;;  %v643_v15 = vsub.f32 1.0, %v2501_v31  ;;  %v649_v42 = vmul.f32 %v2501_v31, %v2840_v8 }
 0x6b2   :  { %v641_v36 = vadd.f32 %v640_v32, %v583_v33 }
 0x6b4   :  { %2502 = vtanh.f32 %v641_v36 }
 0x6c1   :  { %v2503_v41 = vpop.eup %2502 }
 0x6c2   :  { %645 = vrot.lane.b32.xlu0 %v2503_v41, %s2594_s9 }
 0x734   :  { %v646_v4 = vpop.permute.xlu0 %645 }
 0x735   :  { %v648_v44 = vmul.f32 %v646_v4, %v643_v15 }
 0x737   :  { %v2859_v45 = vadd.f32 %v649_v42, %v648_v44 }
 0x739   :  { %v660_v47 = vpack.c.bf16 %v2859_v45, %v2859_v45 }
 0x73b   :  { %662 = vrot.lane.b32.xlu1 %v660_v47, %s2594_s9 }
 0x7ad   :  { %v663_v51 = vpop.permute.xlu1 %662 }
 0x7ae   :  { %2315 = vmatmul.mubr.msk.bf16.vlgmr.msra.gmra.mxu0 %vm291_vm1, %v663_v51 }
 0x7af   :  { %828 = vmatpush1.bf16.msra.mxu0 %v2661_v16  ;;  %851 = vmatprep.mubr.bf16.mxu0 %v2593_v1 }
 0x7b0   :  { %829 = vmatprep.subr.bf16.mxu0 %v2674_v19 }
 0x7b3   :  { %830 = vmatpush1.bf16.msra.mxu0 %v2689_v22 }
 0x7b4   :  { %831 = vmatprep.subr.bf16.mxu0 %v2696_v23 }
 0x7b7   :  { %832 = vmatpush1.bf16.msra.mxu0 %v2702_v26 }
 0x7b8   :  { %833 = vmatprep.subr.bf16.mxu0 %v2709_v27 }
 0x7bb   :  { %834 = vmatpush1.bf16.msra.mxu0 %v2718_v28 }
 0x86e   :  { %v701_v48 = vpop.f32.mrf.mxu0 }
 0x86f   :  { %v708_v49 = vadd.f32 %v701_v48, %v2780_v12  ;;  %v811_v48 = vld [vmem:[#allocation2 + $0x68] sm:$0xff] }
 0x870   :  { %v703_v52 = vpop.f32.mrf.mxu0 }
 0x871   :  { %v2316_v53 = vmul.f32 -1.442695, %v708_v49  ;;  %v715_v57 = vadd.f32 %v703_v52, %v2798_v46 }
 0x872   :  { %v705_v55 = vpop.f32.mrf.mxu0 }
 0x873   :  { %2504 = vpow2.f32 %v2316_v53 }
 0x874   :  { %v706_v56 = vpop.f32.mrf.mxu0 }
 0x880   :  { %v2505_v37 = vpop.eup %2504 }
 0x881   :  { %v712_v38 = vadd.f32 1.0, %v2505_v37 }
 0x883   :  { %2506 = vrcp.f32 %v712_v38 }
 0x890   :  { %v2507_v58 = vpop.eup %2506 }
 0x891   :  { %v716_v60 = vmul.f32 %v2507_v58, %v715_v57  ;;  %v719_v0 = vsub.f32 1.0, %v2507_v58  ;;  %v725_v2 = vmul.f32 %v2507_v58, %v2859_v45 }
 0x893   :  { %v717_v62 = vadd.f32 %v716_v60, %v659_v61 }
 0x895   :  { %2508 = vtanh.f32 %v717_v62 }
 0x8a2   :  { %v2509_v63 = vpop.eup %2508 }
 0x8a3   :  { %721 = vrot.lane.b32.xlu0 %v2509_v63, %s2594_s9 }
 0x915   :  { %v722_v12 = vpop.permute.xlu0 %721 }
 0x916   :  { %v724_v3 = vmul.f32 %v722_v12, %v719_v0 }
 0x918   :  { %v2877_v39 = vadd.f32 %v725_v2, %v724_v3 }
 0x91a   :  { %v736_v5 = vpack.c.bf16 %v2877_v39, %v2877_v39 }
 0x91c   :  { %738 = vrot.lane.b32.xlu1 %v736_v5, %s2594_s9 }
 0x98e   :  { %v739_v59 = vpop.permute.xlu1 %738 }
 0x98f   :  { %2317 = vmatmul.mubr.msk.bf16.vlgmr.msra.gmra.mxu1 %vm291_vm1, %v739_v59 }
 0x990   :  { %904 = vmatpush1.bf16.msra.mxu1 %v2661_v16  ;;  %927 = vmatprep.mubr.bf16.mxu1 %v2593_v1 }
 0x991   :  { %905 = vmatprep.subr.bf16.mxu1 %v2674_v19 }
 0x994   :  { %906 = vmatpush1.bf16.msra.mxu1 %v2689_v22 }
 0x995   :  { %907 = vmatprep.subr.bf16.mxu1 %v2696_v23 }
 0x998   :  { %908 = vmatpush1.bf16.msra.mxu1 %v2702_v26  ;;  %v735_v26 = vld [vmem:[#allocation2 + $0x58] sm:$0xff] }
 0x999   :  { %909 = vmatprep.subr.bf16.mxu1 %v2709_v27 }
 0x99c   :  { %910 = vmatpush1.bf16.msra.mxu1 %v2718_v28 }
 0xa4f   :  { %v777_v6 = vpop.f32.mrf.mxu1 }
 0xa50   :  { %v784_v7 = vadd.f32 %v777_v6, %v2784_v25 }
 0xa51   :  { %v779_v9 = vpop.f32.mrf.mxu1 }
 0xa52   :  { %v2318_v10 = vmul.f32 -1.442695, %v784_v7  ;;  %v791_v22 = vadd.f32 %v779_v9, %v2798_v46  ;;  %v887_v7 = vld [vmem:[#allocation2 + $0x78] sm:$0xff] }
 0xa53   :  { %v781_v16 = vpop.f32.mrf.mxu1 }
 0xa54   :  { %2510 = vpow2.f32 %v2318_v10  ;;  %v2422_v16 = vld [vmem:[%s3356_s1 + $0xf4] ss:$8 sps:$4 sm:$0xff]  }
 0xa55   :  { %v782_v11 = vpop.f32.mrf.mxu1  ;;  %1060 = vmatprep.subr.bf16.mxu0 %v2422_v16 }
 0xa56   :  { %v2423_v11 = vld [vmem:[%s3356_s1 + $0xe0] ss:$8 sps:$4 sm:$0xff]  }
 0xa61   :  { %v2511_v14 = vpop.eup %2510 }
 0xa62   :  { %v788_v19 = vadd.f32 1.0, %v2511_v14  ;;  %v2426_v14 = vld [vmem:[%s3356_s1 + $0xd0] ss:$8 sps:$4 sm:$0xff]  }
 0xa64   :  { %2512 = vrcp.f32 %v788_v19  ;;  %v2428_v19 = vld [vmem:[%s3356_s1 + $0xd4] ss:$8 sps:$4 sm:$0xff]  }
 0xa71   :  { %v2513_v23 = vpop.eup %2512 }
 0xa72   :  { %v792_v17 = vmul.f32 %v2513_v23, %v791_v22  ;;  %v795_v28 = vsub.f32 1.0, %v2513_v23  ;;  %v801_v20 = vmul.f32 %v2513_v23, %v2877_v39  ;;  %v2429_v22 = vld [vmem:[%s3356_s1 + $0xc0] ss:$8 sps:$4 sm:$0xff]   ;;  %v2431_v23 = vld [vmem:[%s3356_s1 + $0xc4] ss:$8 sps:$4 sm:$0xff]  }
 0xa74   :  { %v793_v18 = vadd.f32 %v792_v17, %v735_v26  ;;  %v2432_v17 = vld [vmem:[%s3356_s1 + $0xb0] ss:$8 sps:$4 sm:$0xff]   ;;  %v2434_v26 = vld [vmem:[%s3356_s1 + $0xb4] ss:$8 sps:$4 sm:$0xff]  }
 0xa75   :  { %1185 = vmatprep.subr.bf16.mxu1 %v2434_v26 }
 0xa76   :  { %2514 = vtanh.f32 %v793_v18 }
 0xa83   :  { %v2515_v27 = vpop.eup %2514 }
 0xa84   :  { %797 = vrot.lane.b32.xlu0 %v2515_v27, %s2594_s9 }
 0xaf6   :  { %v798_v25 = vpop.permute.xlu0 %797 }
 0xaf7   :  { %v800_v21 = vmul.f32 %v798_v25, %v795_v28  ;;  %v2437_v28 = vld [vmem:[%s3356_s1 + $0xa4] ss:$8 sps:$4 sm:$0xff]  }
 0xaf9   :  { %v2895_v24 = vadd.f32 %v801_v20, %v800_v21  ;;  %v2435_v21 = vld [vmem:[%s3356_s1 + $0xa0] ss:$8 sps:$4 sm:$0xff]  }
 0xafb   :  { %v812_v29 = vpack.c.bf16 %v2895_v24, %v2895_v24 }
 0xafd   :  { %814 = vrot.lane.b32.xlu1 %v812_v29, %s2594_s9  ;;  %v2962_v29 = vld [vmem:[%s3356_s1 + $0x134] ss:$8 sps:$4 sm:$0xff]  }
 0xb6f   :  { %v815_v30 = vpop.permute.xlu1 %814 }
 0xb70   :  { %2319 = vmatmul.mubr.msk.bf16.vlgmr.msra.gmra.mxu0 %vm291_vm1, %v815_v30 }
 0xb71   :  { %1084 = vmatprep.mubr.bf16.mxu0 %v2593_v1 }
 0xc30   :  { %v853_v31 = vpop.f32.mrf.mxu0 }
 0xc31   :  { %v860_v32 = vadd.f32 %v853_v31, %v2788_v43  ;;  %v2441_v31 = vld [vmem:[%s3356_s1 + $0x90] ss:$8 sps:$4 sm:$0xff]  }
 0xc32   :  { %v855_v33 = vpop.f32.mrf.mxu0 }
 0xc33   :  { %v2320_v36 = vmul.f32 -1.442695, %v860_v32  ;;  %v867_v44 = vadd.f32 %v855_v33, %v2798_v46  ;;  %v2443_v32 = vld [vmem:[%s3356_s1 + $0x94] ss:$8 sps:$4 sm:$0xff]   ;;  %v2446_v33 = vld [vmem:[%s3356_s1 + $0x84] ss:$8 sps:$4 sm:$0xff]  }
 0xc34   :  { %v857_v41 = vpop.f32.mrf.mxu0 }
 0xc35   :  { %2516 = vpow2.f32 %v2320_v36  ;;  %v2444_v36 = vld [vmem:[%s3356_s1 + $0x80] ss:$8 sps:$4 sm:$0xff]  }
 0xc36   :  { %v858_v15 = vpop.f32.mrf.mxu0 }
 0xc42   :  { %v2517_v4 = vpop.eup %2516 }
 0xc43   :  { %v864_v42 = vadd.f32 1.0, %v2517_v4 }
 0xc45   :  { %2518 = vrcp.f32 %v864_v42 }
 0xc52   :  { %v2519_v47 = vpop.eup %2518 }
 0xc53   :  { %v868_v51 = vmul.f32 %v2519_v47, %v867_v44  ;;  %v871_v53 = vsub.f32 1.0, %v2519_v47  ;;  %v877_v55 = vmul.f32 %v2519_v47, %v2895_v24  ;;  %v2990_v44 = vld [vmem:[%s3356_s1 + $0x130] ss:$8 sps:$4 sm:$0xff]  }
 0xc55   :  { %v869_v49 = vadd.f32 %v868_v51, %v811_v48  ;;  %v3004_v51 = vld [vmem:[%s3356_s1 + $0x120] ss:$8 sps:$4 sm:$0xff]   ;;  %v3011_v48 = vld [vmem:[%s3356_s1 + $0x114] ss:$8 sps:$4 sm:$0xff]  }
 0xc57   :  { %2520 = vtanh.f32 %v869_v49 }
 0xc64   :  { %v2521_v52 = vpop.eup %2520 }
 0xc65   :  { %873 = vrot.lane.b32.xlu0 %v2521_v52, %s2594_s9 }
 0xcd7   :  { %v874_v43 = vpop.permute.xlu0 %873 }
 0xcd8   :  { %v876_v56 = vmul.f32 %v874_v43, %v871_v53  ;;  %v3017_v53 = vld [vmem:[%s3356_s1 + $0x110] ss:$8 sps:$4 sm:$0xff]  }
 0xcda   :  { %v878_v37 = vadd.f32 %v877_v55, %v876_v56  ;;  %v3023_v55 = vld [vmem:[%s3356_s1 + $0x104] ss:$8 sps:$4 sm:$0xff]  }
 0xcdc   :  { %v888_v38 = vpack.c.bf16 %v878_v37, %v878_v37 }
 0xcde   :  { %890 = vrot.lane.b32.xlu1 %v888_v38, %s2594_s9  ;;  %v3031_v38 = vld [vmem:[%s3356_s1 + $0x100] ss:$8 sps:$4 sm:$0xff]  }
 0xce2   :  { %880 = vrot.lane.b32.xlu1 %v878_v37, %s2594_s9 }
 0xce6   :  { %728 = vrot.lane.b32.xlu1 %v2877_v39, %s2594_s9 }
 0xcea   :  { %576 = vrot.lane.b32.xlu1 %v2840_v8, %s2594_s9 }
 0xcee   :  { %425 = vrot.lane.b32.xlu1 %v2802_v13, %s2594_s9 }
 0xd50   :  { %v891_v57 = vpop.permute.xlu1 %890 }
 0xd51   :  { %2321 = vmatmul.mubr.msk.bf16.vlgmr.msra.gmra.mxu1 %vm291_vm1, %v891_v57 }
 0xd52   :  { %1209 = vmatprep.mubr.bf16.mxu1 %v2593_v1  ;;  %1186 = vmatpush1.bf16.msra.mxu1 %v2432_v17 }
 0xd53   :  { %1187 = vmatprep.subr.bf16.mxu1 %v2437_v28 }
 0xd54   :  { %v881_v58 = vpop.permute.xlu1 %880 }
 0xd55   :  { %884 = vst.msk [vmem:[#allocation3 + $0x30] sm:$0xff] %vm291_vm1, %v881_v58 }
 0xd56   :  { %1188 = vmatpush1.bf16.msra.mxu1 %v2435_v21 }
 0xd57   :  { %1189 = vmatprep.subr.bf16.mxu1 %v2443_v32 }
 0xd58   :  { %v729_v60 = vpop.permute.xlu1 %728 }
 0xd59   :  { %732 = vst.msk [vmem:[#allocation3 + $0x20] sm:$0xff] %vm291_vm1, %v729_v60 }
 0xd5a   :  { %1190 = vmatpush1.bf16.msra.mxu1 %v2441_v31 }
 0xd5b   :  { %1191 = vmatprep.subr.bf16.mxu1 %v2446_v33 }
 0xd5c   :  { %v577_v61 = vpop.permute.xlu1 %576  ;;  %v970_v42 = vld [vmem:[#allocation3 + $0x30] sm:$0xff] }
 0xd5d   :  { %580 = vst.msk [vmem:[#allocation3 + $0x10] sm:$0xff] %vm291_vm1, %v577_v61 }
 0xd5e   :  { %1192 = vmatpush1.bf16.msra.mxu1 %v2444_v36 }
 0xd5f   :  { %1426 = vmatprep.subr.bf16.mxu1 %v2962_v29 }
 0xd60   :  { %v426_v62 = vpop.permute.xlu1 %425  ;;  %v972_v52 = vld [vmem:[#allocation3 + $0x20] sm:$0xff] }
 0xd61   :  { %428 = vst.msk [vmem:[#allocation3] sm:$0xff] %vm291_vm1, %v426_v62 }
 0xd64   :  { %v974_v60 = vld [vmem:[#allocation3 + $0x10] sm:$0xff] }
 0xd68   :  { %v961_v56 = vld [vmem:[#allocation3] sm:$0xff] }
 0xe11   :  { %v929_v8 = vpop.f32.mrf.mxu1 }
 0xe12   :  { %v936_v13 = vadd.f32 %v929_v8, %v2792_v54  ;;  %v2420_v54 = vld [vmem:[%s3356_s1 + $0xf0] ss:$8 sps:$4 sm:$0xff]  }
 0xe13   :  { %v931_v63 = vpop.f32.mrf.mxu1  ;;  %1061 = vmatpush1.bf16.msra.mxu0 %v2420_v54 }
 0xe14   :  { %v2322_v0 = vmul.f32 -1.442695, %v936_v13  ;;  %v943_v5 = vadd.f32 %v931_v63, %v2798_v46  ;;  %v2425_v46 = vld [vmem:[%s3356_s1 + $0xe4] ss:$8 sps:$4 sm:$0xff]  }
 0xe15   :  { %v933_v12 = vpop.f32.mrf.mxu1  ;;  %1062 = vmatprep.subr.bf16.mxu0 %v2425_v46 }
 0xe16   :  { %2522 = vpow2.f32 %v2322_v0 }
 0xe17   :  { %v934_v2 = vpop.f32.mrf.mxu1  ;;  %1063 = vmatpush1.bf16.msra.mxu0 %v2423_v11 }
 0xe18   :  { %1064 = vmatprep.subr.bf16.mxu0 %v2428_v19 }
 0xe1b   :  { %1065 = vmatpush1.bf16.msra.mxu0 %v2426_v14 }
 0xe1c   :  { %1066 = vmatprep.subr.bf16.mxu0 %v2431_v23 }
 0xe1f   :  { %1067 = vmatpush1.bf16.msra.mxu0 %v2429_v22 }
 0xe20   :  { %1352 = vmatprep.subr.bf16.mxu0 %v2962_v29 }
 0xe23   :  { %v2523_v3 = vpop.eup %2522 }
 0xe24   :  { %v940_v39 = vadd.f32 1.0, %v2523_v3 }
 0xe26   :  { %2524 = vrcp.f32 %v940_v39  ;;  %v1252_v39 = vsub.s32 1, %v2749_v34 }
 0xe28   :  { %v3071_v54 = vrot.slane %v2754_v35, %v1252_v39 }
 0xe33   :  { %v2525_v59 = vpop.eup %2524 }
 0xe34   :  { %v944_v6 = vmul.f32 %v2525_v59, %v943_v5  ;;  %v947_v18 = vsub.f32 1.0, %v2525_v59  ;;  %v953_v25 = vmul.f32 %v2525_v59, %v878_v37 }
 0xe36   :  { %v945_v9 = vadd.f32 %v944_v6, %v887_v7  ;;  %v3068_v6 = vrot.slane %v2763_v40, %v1252_v39 }
 0xe38   :  { %2526 = vtanh.f32 %v945_v9 }
 0xe45   :  { %v2527_v10 = vpop.eup %2526 }
 0xe46   :  { %949 = vrot.lane.b32.xlu0 %v2527_v10, %s2594_s9 }
 0xeb8   :  { %v950_v27 = vpop.permute.xlu0 %949 }
 0xeb9   :  { %v952_v20 = vmul.f32 %v950_v27, %v947_v18 }
 0xebb   :  { %v954_v30 = vadd.f32 %v953_v25, %v952_v20 }
 0xebd   :  { %956 = vrot.lane.b32.xlu0 %v954_v30, %s2594_s9 }
 0xec1   :  { %804 = vrot.lane.b32.xlu0 %v2895_v24, %s2594_s9 }
 0xec5   :  { %652 = vrot.lane.b32.xlu0 %v2859_v45, %s2594_s9 }
 0xec9   :  { %500 = vrot.lane.b32.xlu0 %v2821_v50, %s2594_s9  ;;  %v2996_v50 = vld [vmem:[%s3356_s1 + $0x124] ss:$8 sps:$4 sm:$0xff]  }
 0xf2f   :  { %v957_v41 = vpop.permute.xlu0 %956 }
 0xf30   :  { %960 = vst.msk [vmem:[#allocation3 + $0x38] sm:$0xff] %vm291_vm1, %v957_v41 }
 0xf33   :  { %v805_v15 = vpop.permute.xlu0 %804 }
 0xf34   :  { %808 = vst.msk [vmem:[#allocation3 + $0x28] sm:$0xff] %vm291_vm1, %v805_v15 }
 0xf37   :  { %v653_v24 = vpop.permute.xlu0 %652  ;;  %v969_v4 = vld [vmem:[#allocation3 + $0x38] sm:$0xff] }
 0xf38   :  { %656 = vst.msk [vmem:[#allocation3 + $0x18] sm:$0xff] %vm291_vm1, %v653_v24  ;;  %v996_v45 = vpack.c.bf16 %v970_v42, %v969_v4  ;;  %v995_v63 = vpack.c.bf16 %v969_v4, %v970_v42 }
 0xf3a   :  { %2331 = vmatmul.mubr.msk.bf16.vlgmr.msra.gmra.mxu0 %vm291_vm1, %v996_v45 }
 0xf3b   :  { %1353 = vmatpush1.bf16.msra.mxu0 %v2990_v44  ;;  %v501_v47 = vpop.permute.xlu0 %500  ;;  %1094 = vmatprep.mubr.bf16.mxu0 %v2593_v1  ;;  %v971_v49 = vld [vmem:[#allocation3 + $0x28] sm:$0xff] }
 0xf3c   :  { %504 = vst.msk [vmem:[#allocation3 + $0x8] sm:$0xff] %vm291_vm1, %v501_v47  ;;  %1354 = vmatprep.subr.bf16.mxu0 %v2996_v50  ;;  %v997_v43 = vpack.c.bf16 %v972_v52, %v971_v49  ;;  %v994_v13 = vpack.c.bf16 %v971_v49, %v972_v52 }
 0xf3f   :  { %1355 = vmatpush1.bf16.msra.mxu0 %v3004_v51  ;;  %v973_v58 = vld [vmem:[#allocation3 + $0x18] sm:$0xff] }
 0xf40   :  { %1356 = vmatprep.subr.bf16.mxu0 %v3011_v48  ;;  %v998_v61 = vpack.c.bf16 %v974_v60, %v973_v58  ;;  %v993_v62 = vpack.c.bf16 %v973_v58, %v974_v60 }
 0xf42   :  { %2332 = vmatmul.mubr.msk.bf16.gmra.mxu0 %vm291_vm1, %v997_v43 }
 0xf43   :  { %v962_v37 = vld [vmem:[#allocation3 + $0x8] sm:$0xff]  ;;  %1104 = vmatprep.mubr.bf16.mxu0 %v2593_v1  ;;  %1357 = vmatpush1.bf16.msra.mxu0 %v3017_v53 }
 0xf44   :  { %v992_v57 = vpack.c.bf16 %v962_v37, %v961_v56  ;;  %1358 = vmatprep.subr.bf16.mxu0 %v3023_v55  ;;  %v999_v8 = vpack.c.bf16 %v961_v56, %v962_v37 }
 0xf46   :  { %2343 = vmatmul.mubr.msk.bf16.vlgmr.msra.gmra.mxu1 %vm291_vm1, %v992_v57 }
 0xf47   :  { %1219 = vmatprep.mubr.bf16.mxu1 %v2593_v1  ;;  %1359 = vmatpush1.bf16.msra.mxu0 %v3031_v38 }
 0xf48   :  { %1427 = vmatpush1.bf16.msra.mxu1 %v2990_v44  ;;  %1500 = vmatprep.subr.bf16.mxu0 %v2962_v29 }
 0xf49   :  { %1428 = vmatprep.subr.bf16.mxu1 %v2996_v50 }
 0xf4a   :  { %2333 = vmatmul.mubr.msk.bf16.gmra.mxu0 %vm291_vm1, %v998_v61 }
 0xf4b   :  { %1114 = vmatprep.mubr.bf16.mxu0 %v2593_v1 }
 0xf4c   :  { %1429 = vmatpush1.bf16.msra.mxu1 %v3004_v51 }
 0xf4d   :  { %1430 = vmatprep.subr.bf16.mxu1 %v3011_v48 }
 0xf4e   :  { %2344 = vmatmul.mubr.msk.bf16.gmra.mxu1 %vm291_vm1, %v993_v62 }
 0xf4f   :  { %1229 = vmatprep.mubr.bf16.mxu1 %v2593_v1 }
 0xf50   :  { %1431 = vmatpush1.bf16.msra.mxu1 %v3017_v53 }
 0xf51   :  { %1432 = vmatprep.subr.bf16.mxu1 %v3023_v55 }
 0xf52   :  { %2334 = vmatmul.mubr.msk.bf16.gmra.mxu0 %vm291_vm1, %v999_v8 }
 0xf53   :  { %1376 = vmatprep.mubr.bf16.mxu0 %v2593_v1 }
 0xf54   :  { %1433 = vmatpush1.bf16.msra.mxu1 %v3031_v38 }
 0xf55   :  { %1574 = vmatprep.subr.bf16.mxu1 %v2962_v29 }
 0xf56   :  { %2345 = vmatmul.mubr.msk.bf16.gmra.mxu1 %vm291_vm1, %v994_v13 }
 0xf57   :  { %1239 = vmatprep.mubr.bf16.mxu1 %v2593_v1 }
 0xf5a   :  { %1377 = vmatmul.mubr.bf16.vlgmr.msra.gmra.mxu0 %v2593_v1 }
 0xf5b   :  { %1501 = vmatpush1.bf16.msra.mxu0 %v2990_v44  ;;  %1524 = vmatprep.mubr.bf16.mxu0 %v2593_v1 }
 0xf5c   :  { %1502 = vmatprep.subr.bf16.mxu0 %v2996_v50 }
 0xf5e   :  { %2346 = vmatmul.mubr.msk.bf16.gmra.mxu1 %vm291_vm1, %v995_v63 }
 0xf5f   :  { %1450 = vmatprep.mubr.bf16.mxu1 %v2593_v1  ;;  %1503 = vmatpush1.bf16.msra.mxu0 %v3004_v51 }
 0xf60   :  { %1504 = vmatprep.subr.bf16.mxu0 %v3011_v48 }
 0xf63   :  { %1505 = vmatpush1.bf16.msra.mxu0 %v3017_v53 }
 0xf64   :  { %1506 = vmatprep.subr.bf16.mxu0 %v3023_v55 }
 0xf67   :  { %1507 = vmatpush1.bf16.msra.mxu0 %v3031_v38 }
 0xf68   :  { %1648 = vmatprep.subr.bf16.mxu0 %v2962_v29 }
 0xffa   :  { %v1086_v0 = vpop.f32.mrf.mxu0 }
 0xffc   :  { %v1088_v12 = vpop.f32.mrf.mxu0 }
 0xffe   :  { %v1090_v2 = vpop.f32.mrf.mxu0 }
0x1000   :  { %v1092_v3 = vpop.f32.mrf.mxu0 }
0x1002   :  { %v1096_v5 = vpop.f32.mrf.mxu0 }
0x1004   :  { %v1098_v59 = vpop.f32.mrf.mxu0 }
0x1006   :  { %v1100_v7 = vpop.f32.mrf.mxu0  ;;  %v1211_v9 = vpop.f32.mrf.mxu1 }
0x1007   :  { %v1212_v10 = vadd.f32 %v1211_v9, %v1086_v0 }
0x1008   :  { %v1102_v16 = vpop.f32.mrf.mxu0  ;;  %v1213_v46 = vpop.f32.mrf.mxu1 }
0x1009   :  { %v1258_v11 = vadd.f32 %v3068_v6, %v1212_v10  ;;  %v1214_v14 = vadd.f32 %v1213_v46, %v1088_v12 }
0x100a   :  { %v1106_v19 = vpop.f32.mrf.mxu0  ;;  %v1215_v22 = vpop.f32.mrf.mxu1 }
0x100b   :  { %v1259_v23 = vadd.f32 %v3071_v54, %v1214_v14  ;;  %v1216_v17 = vadd.f32 %v1215_v22, %v1090_v2 }
0x100c   :  { %v1108_v26 = vpop.f32.mrf.mxu0  ;;  %v1217_v18 = vpop.f32.mrf.mxu1 }
0x100d   :  { %1275 = vst.msk [vmem:[#allocation2 + $0x8] sm:$0xff] %vm291_vm1, %v1259_v23  ;;  %v3077_v40 = vadd.f32 %v3068_v6, %v1216_v17  ;;  %v1218_v27 = vadd.f32 %v1217_v18, %v1092_v3 }
0x100e   :  { %v1110_v35 = vpop.f32.mrf.mxu0  ;;  %v1221_v28 = vpop.f32.mrf.mxu1 }
0x100f   :  { %v1261_v25 = vadd.f32 %v3071_v54, %v1218_v27  ;;  %v1222_v20 = vadd.f32 %v1221_v28, %v1096_v5  ;;  %v3115_v28 = vld [vmem:[%s3358_s2] sm:$0xff] }
0x1010   :  { %v1112_v21 = vpop.f32.mrf.mxu0  ;;  %v1223_v30 = vpop.f32.mrf.mxu1 }
0x1011   :  { %1277 = vst.msk [vmem:[#allocation2 + $0x18] sm:$0xff] %vm291_vm1, %v1261_v25  ;;  %v3082_v31 = vadd.f32 %v3068_v6, %v1222_v20  ;;  %v1224_v32 = vadd.f32 %v1223_v30, %v1098_v59 }
0x1012   :  { %v1116_v33 = vpop.f32.mrf.mxu0  ;;  %v1225_v36 = vpop.f32.mrf.mxu1 }
0x1013   :  { %v1263_v41 = vadd.f32 %v3071_v54, %v1224_v32  ;;  %v1226_v15 = vadd.f32 %v1225_v36, %v1100_v7 }
0x1014   :  { %v1118_v24 = vpop.f32.mrf.mxu0  ;;  %v1227_v4 = vpop.f32.mrf.mxu1 }
0x1015   :  { %1279 = vst.msk [vmem:[#allocation2 + $0x28] sm:$0xff] %vm291_vm1, %v1263_v41  ;;  %v3087_v42 = vadd.f32 %v3068_v6, %v1226_v15  ;;  %v1228_v45 = vadd.f32 %v1227_v4, %v1102_v16 }
0x1016   :  { %v1120_v47 = vpop.f32.mrf.mxu0  ;;  %v1231_v49 = vpop.f32.mrf.mxu1 }
0x1017   :  { %v1265_v52 = vadd.f32 %v3071_v54, %v1228_v45  ;;  %v1232_v43 = vadd.f32 %v1231_v49, %v1106_v19 }
0x1018   :  { %v1122_v56 = vpop.f32.mrf.mxu0  ;;  %v1233_v37 = vpop.f32.mrf.mxu1 }
0x1019   :  { %1281 = vst.msk [vmem:[#allocation2 + $0x38] sm:$0xff] %vm291_vm1, %v1265_v52  ;;  %v3092_v57 = vadd.f32 %v3068_v6, %v1232_v43  ;;  %v1234_v58 = vadd.f32 %v1233_v37, %v1108_v26 }
0x101a   :  { %v1235_v60 = vpop.f32.mrf.mxu1  ;;  %v1378_v61 = vpop.f32.mrf.mxu0 }
0x101b   :  { %v1267_v62 = vadd.f32 %v3071_v54, %v1234_v58  ;;  %v1236_v8 = vadd.f32 %v1235_v60, %v1110_v35  ;;  %v1385_v13 = vadd.f32 %v1378_v61, %v1258_v11  ;;  %v1300_v35 = vsub.s32 3, %v2749_v34 }
0x101c   :  { %v1237_v63 = vpop.f32.mrf.mxu1  ;;  %v1380_v0 = vpop.f32.mrf.mxu0 }
0x101d   :  { %1283 = vst.msk [vmem:[#allocation2 + $0x48] sm:$0xff] %vm291_vm1, %v1267_v62  ;;  %v3097_v12 = vadd.f32 %v3068_v6, %v1236_v8  ;;  %v2355_v2 = vmul.f32 -1.442695, %v1385_v13  ;;  %v1238_v3 = vadd.f32 %v1237_v63, %v1112_v21  ;;  %v3118_v25 = vrot.slane %v3115_v28, %v1300_v35  ;;  %v1410_v13 = vld [vmem:[#allocation2 + $0x18] sm:$0xff]  ;;  %v1484_v35 = vld [vmem:[#allocation2 + $0x28] sm:$0xff] }
0x101e   :  { %v1241_v39 = vpop.f32.mrf.mxu1  ;;  %v1382_v5 = vpop.f32.mrf.mxu0 }
0x101f   :  { %2528 = vpow2.f32 %v2355_v2  ;;  %v1269_v59 = vadd.f32 %v3071_v54, %v1238_v3  ;;  %v1242_v7 = vadd.f32 %v1241_v39, %v1116_v33 }
0x1020   :  { %v1243_v9 = vpop.f32.mrf.mxu1  ;;  %v1383_v10 = vpop.f32.mrf.mxu0 }
0x1021   :  { %1285 = vst.msk [vmem:[#allocation2 + $0x58] sm:$0xff] %vm291_vm1, %v1269_v59  ;;  %v3102_v16 = vadd.f32 %v3068_v6, %v1242_v7  ;;  %v1244_v46 = vadd.f32 %v1243_v9, %v1118_v24 }
0x1022   :  { %v1245_v11 = vpop.f32.mrf.mxu1 }
0x1023   :  { %v1271_v14 = vadd.f32 %v3071_v54, %v1244_v46  ;;  %v1246_v19 = vadd.f32 %v1245_v11, %v1120_v47 }
0x1024   :  { %v1247_v22 = vpop.f32.mrf.mxu1 }
0x1025   :  { %1287 = vst.msk [vmem:[#allocation2 + $0x68] sm:$0xff] %vm291_vm1, %v1271_v14  ;;  %v3107_v23 = vadd.f32 %v3068_v6, %v1246_v19  ;;  %v1248_v17 = vadd.f32 %v1247_v22, %v1122_v56  ;;  %v1392_v6 = vadd.f32 %v1380_v0, %v3118_v25 }
0x1027   :  { %v1273_v26 = vadd.f32 %v3071_v54, %v1248_v17  ;;  %v1303_v54 = vld [vmem:[#allocation2 + $0x8] sm:$0xff] }
0x1029   :  { %1289 = vst.msk [vmem:[#allocation2 + $0x78] sm:$0xff] %vm291_vm1, %v1273_v26 }
0x102c   :  { %v2529_v18 = vpop.eup %2528 }
0x102d   :  { %v1389_v27 = vadd.f32 1.0, %v2529_v18 }
0x102f   :  { %2530 = vrcp.f32 %v1389_v27 }
0x103c   :  { %v2531_v20 = vpop.eup %2530 }
0x103d   :  { %v1393_v21 = vmul.f32 %v2531_v20, %v1392_v6  ;;  %v1396_v33 = vsub.f32 1.0, %v2531_v20  ;;  %v1402_v41 = vmul.f32 0.0, %v2531_v20 }
0x103f   :  { %v1394_v30 = vadd.f32 %v1393_v21, %v1303_v54 }
0x1041   :  { %2532 = vtanh.f32 %v1394_v30 }
0x104e   :  { %v2533_v32 = vpop.eup %2532 }
0x104f   :  { %1398 = vrot.lane.b32.xlu1 %v2533_v32, %s2594_s9 }
0x10c1   :  { %v1399_v36 = vpop.permute.xlu1 %1398 }
0x10c2   :  { %v1401_v15 = vmul.f32 %v1399_v36, %v1396_v33 }
0x10c4   :  { %v3122_v24 = vadd.f32 %v1402_v41, %v1401_v15 }
0x10c6   :  { %v1411_v4 = vpack.c.bf16 %v3122_v24, %v3122_v24 }
0x10c8   :  { %1413 = vrot.lane.b32.xlu0 %v1411_v4, %s2594_s9 }
0x113a   :  { %v1414_v45 = vpop.permute.xlu0 %1413 }
0x113b   :  { %2356 = vmatmul.mubr.msk.bf16.vlgmr.msra.gmra.mxu1 %vm291_vm1, %v1414_v45 }
0x113c   :  { %1575 = vmatpush1.bf16.msra.mxu1 %v2990_v44  ;;  %1598 = vmatprep.mubr.bf16.mxu1 %v2593_v1 }
0x113d   :  { %1576 = vmatprep.subr.bf16.mxu1 %v2996_v50 }
0x1140   :  { %1577 = vmatpush1.bf16.msra.mxu1 %v3004_v51 }
0x1141   :  { %1578 = vmatprep.subr.bf16.mxu1 %v3011_v48 }
0x1144   :  { %1579 = vmatpush1.bf16.msra.mxu1 %v3017_v53 }
0x1145   :  { %1580 = vmatprep.subr.bf16.mxu1 %v3023_v55 }
0x1148   :  { %1581 = vmatpush1.bf16.msra.mxu1 %v3031_v38 }
0x1149   :  { %1722 = vmatprep.subr.bf16.mxu1 %v2962_v29 }
0x11fb   :  { %v1452_v47 = vpop.f32.mrf.mxu1 }
0x11fc   :  { %v1459_v49 = vadd.f32 %v1452_v47, %v3077_v40 }
0x11fd   :  { %v1454_v52 = vpop.f32.mrf.mxu1 }
0x11fe   :  { %v2357_v43 = vmul.f32 -1.442695, %v1459_v49  ;;  %v1466_v61 = vadd.f32 %v1454_v52, %v3118_v25 }
0x11ff   :  { %v1456_v56 = vpop.f32.mrf.mxu1 }
0x1200   :  { %2534 = vpow2.f32 %v2357_v43 }
0x1201   :  { %v1457_v37 = vpop.f32.mrf.mxu1 }
0x120d   :  { %v2535_v58 = vpop.eup %2534 }
0x120e   :  { %v1463_v60 = vadd.f32 1.0, %v2535_v58 }
0x1210   :  { %2536 = vrcp.f32 %v1463_v60  ;;  %v1558_v60 = vld [vmem:[#allocation2 + $0x38] sm:$0xff] }
0x121d   :  { %v2537_v62 = vpop.eup %2536 }
0x121e   :  { %v1467_v8 = vmul.f32 %v2537_v62, %v1466_v61  ;;  %v1470_v2 = vsub.f32 1.0, %v2537_v62  ;;  %v1476_v3 = vmul.f32 %v2537_v62, %v3122_v24 }
0x1220   :  { %v1468_v63 = vadd.f32 %v1467_v8, %v1410_v13 }
0x1222   :  { %2538 = vtanh.f32 %v1468_v63 }
0x122f   :  { %v2539_v0 = vpop.eup %2538 }
0x1230   :  { %1472 = vrot.lane.b32.xlu1 %v2539_v0, %s2594_s9 }
0x12a2   :  { %v1473_v40 = vpop.permute.xlu1 %1472 }
0x12a3   :  { %v1475_v39 = vmul.f32 %v1473_v40, %v1470_v2 }
0x12a5   :  { %v3141_v5 = vadd.f32 %v1476_v3, %v1475_v39 }
0x12a7   :  { %v1485_v59 = vpack.c.bf16 %v3141_v5, %v3141_v5 }
0x12a9   :  { %1487 = vrot.lane.b32.xlu0 %v1485_v59, %s2594_s9 }
0x131b   :  { %v1488_v7 = vpop.permute.xlu0 %1487 }
0x131c   :  { %2358 = vmatmul.mubr.msk.bf16.vlgmr.msra.gmra.mxu0 %vm291_vm1, %v1488_v7 }
0x131d   :  { %1649 = vmatpush1.bf16.msra.mxu0 %v2990_v44  ;;  %1672 = vmatprep.mubr.bf16.mxu0 %v2593_v1 }
0x131e   :  { %1650 = vmatprep.subr.bf16.mxu0 %v2996_v50 }
0x1321   :  { %1651 = vmatpush1.bf16.msra.mxu0 %v3004_v51 }
0x1322   :  { %1652 = vmatprep.subr.bf16.mxu0 %v3011_v48 }
0x1325   :  { %1653 = vmatpush1.bf16.msra.mxu0 %v3017_v53 }
0x1326   :  { %1654 = vmatprep.subr.bf16.mxu0 %v3023_v55 }
0x1329   :  { %1655 = vmatpush1.bf16.msra.mxu0 %v3031_v38 }
0x132a   :  { %1796 = vmatprep.subr.bf16.mxu0 %v2962_v29 }
0x13dc   :  { %v1526_v9 = vpop.f32.mrf.mxu0 }
0x13dd   :  { %v1533_v10 = vadd.f32 %v1526_v9, %v3082_v31 }
0x13de   :  { %v1528_v46 = vpop.f32.mrf.mxu0 }
0x13df   :  { %v2359_v11 = vmul.f32 -1.442695, %v1533_v10  ;;  %v1540_v26 = vadd.f32 %v1528_v46, %v3118_v25 }
0x13e0   :  { %v1530_v14 = vpop.f32.mrf.mxu0 }
0x13e1   :  { %2540 = vpow2.f32 %v2359_v11 }
0x13e2   :  { %v1531_v19 = vpop.f32.mrf.mxu0 }
0x13ee   :  { %v2541_v22 = vpop.eup %2540 }
0x13ef   :  { %v1537_v17 = vadd.f32 1.0, %v2541_v22  ;;  %v1632_v22 = vld [vmem:[#allocation2 + $0x48] sm:$0xff] }
0x13f1   :  { %2542 = vrcp.f32 %v1537_v17 }
0x13fe   :  { %v2543_v18 = vpop.eup %2542 }
0x13ff   :  { %v1541_v27 = vmul.f32 %v2543_v18, %v1540_v26  ;;  %v1544_v21 = vsub.f32 1.0, %v2543_v18  ;;  %v1550_v54 = vmul.f32 %v2543_v18, %v3141_v5 }
0x1401   :  { %v1542_v6 = vadd.f32 %v1541_v27, %v1484_v35 }
0x1403   :  { %2544 = vtanh.f32 %v1542_v6 }
0x1410   :  { %v2545_v20 = vpop.eup %2544 }
0x1411   :  { %1546 = vrot.lane.b32.xlu1 %v2545_v20, %s2594_s9 }
0x1483   :  { %v1547_v31 = vpop.permute.xlu1 %1546 }
0x1484   :  { %v1549_v30 = vmul.f32 %v1547_v31, %v1544_v21 }
0x1486   :  { %v3160_v32 = vadd.f32 %v1550_v54, %v1549_v30 }
0x1488   :  { %v1559_v33 = vpack.c.bf16 %v3160_v32, %v3160_v32 }
0x148a   :  { %1561 = vrot.lane.b32.xlu0 %v1559_v33, %s2594_s9 }
0x14fc   :  { %v1562_v36 = vpop.permute.xlu0 %1561 }
0x14fd   :  { %2360 = vmatmul.mubr.msk.bf16.vlgmr.msra.gmra.mxu1 %vm291_vm1, %v1562_v36 }
0x14fe   :  { %1723 = vmatpush1.bf16.msra.mxu1 %v2990_v44  ;;  %1746 = vmatprep.mubr.bf16.mxu1 %v2593_v1 }
0x14ff   :  { %1724 = vmatprep.subr.bf16.mxu1 %v2996_v50 }
0x1502   :  { %1725 = vmatpush1.bf16.msra.mxu1 %v3004_v51 }
0x1503   :  { %1726 = vmatprep.subr.bf16.mxu1 %v3011_v48 }
0x1506   :  { %1727 = vmatpush1.bf16.msra.mxu1 %v3017_v53 }
0x1507   :  { %1728 = vmatprep.subr.bf16.mxu1 %v3023_v55 }
0x150a   :  { %1729 = vmatpush1.bf16.msra.mxu1 %v3031_v38 }
0x150b   :  { %1870 = vmatprep.subr.bf16.mxu1 %v2962_v29 }
0x15bd   :  { %v1600_v41 = vpop.f32.mrf.mxu1 }
0x15be   :  { %v1607_v15 = vadd.f32 %v1600_v41, %v3087_v42 }
0x15bf   :  { %v1602_v4 = vpop.f32.mrf.mxu1 }
0x15c0   :  { %v2361_v45 = vmul.f32 -1.442695, %v1607_v15  ;;  %v1614_v56 = vadd.f32 %v1602_v4, %v3118_v25 }
0x15c1   :  { %v1604_v47 = vpop.f32.mrf.mxu1 }
0x15c2   :  { %2546 = vpow2.f32 %v2361_v45 }
0x15c3   :  { %v1605_v49 = vpop.f32.mrf.mxu1 }
0x15cf   :  { %v2547_v52 = vpop.eup %2546 }
0x15d0   :  { %v1611_v43 = vadd.f32 1.0, %v2547_v52 }
0x15d2   :  { %2548 = vrcp.f32 %v1611_v43 }
0x15df   :  { %v2549_v37 = vpop.eup %2548 }
0x15e0   :  { %v1615_v58 = vmul.f32 %v2549_v37, %v1614_v56  ;;  %v1618_v29 = vsub.f32 1.0, %v2549_v37  ;;  %v1624_v8 = vmul.f32 %v2549_v37, %v3160_v32 }
0x15e2   :  { %v1616_v61 = vadd.f32 %v1615_v58, %v1558_v60 }
0x15e4   :  { %2550 = vtanh.f32 %v1616_v61 }
0x15f1   :  { %v2551_v62 = vpop.eup %2550 }
0x15f2   :  { %1620 = vrot.lane.b32.xlu1 %v2551_v62, %s2594_s9 }
0x1664   :  { %v1621_v42 = vpop.permute.xlu1 %1620 }
0x1665   :  { %v1623_v13 = vmul.f32 %v1621_v42, %v1618_v29 }
0x1667   :  { %v3179_v63 = vadd.f32 %v1624_v8, %v1623_v13 }
0x1669   :  { %v1633_v0 = vpack.c.bf16 %v3179_v63, %v3179_v63 }
0x166b   :  { %1635 = vrot.lane.b32.xlu0 %v1633_v0, %s2594_s9 }
0x16dd   :  { %v1636_v2 = vpop.permute.xlu0 %1635 }
0x16de   :  { %2362 = vmatmul.mubr.msk.bf16.vlgmr.msra.gmra.mxu0 %vm291_vm1, %v1636_v2  ;;  %v1780_v2 = vld [vmem:[#allocation2 + $0x68] sm:$0xff] }
0x16df   :  { %1797 = vmatpush1.bf16.msra.mxu0 %v2990_v44  ;;  %1820 = vmatprep.mubr.bf16.mxu0 %v2593_v1 }
0x16e0   :  { %1798 = vmatprep.subr.bf16.mxu0 %v2996_v50 }
0x16e3   :  { %1799 = vmatpush1.bf16.msra.mxu0 %v3004_v51 }
0x16e4   :  { %1800 = vmatprep.subr.bf16.mxu0 %v3011_v48 }
0x16e7   :  { %1801 = vmatpush1.bf16.msra.mxu0 %v3017_v53 }
0x16e8   :  { %1802 = vmatprep.subr.bf16.mxu0 %v3023_v55 }
0x16eb   :  { %1803 = vmatpush1.bf16.msra.mxu0 %v3031_v38 }
0x179e   :  { %v1674_v40 = vpop.f32.mrf.mxu0 }
0x179f   :  { %v1681_v3 = vadd.f32 %v1674_v40, %v3092_v57 }
0x17a0   :  { %v1676_v39 = vpop.f32.mrf.mxu0 }
0x17a1   :  { %v2363_v59 = vmul.f32 -1.442695, %v1681_v3  ;;  %v1688_v11 = vadd.f32 %v1676_v39, %v3118_v25 }
0x17a2   :  { %v1678_v7 = vpop.f32.mrf.mxu0 }
0x17a3   :  { %2552 = vpow2.f32 %v2363_v59 }
0x17a4   :  { %v1679_v9 = vpop.f32.mrf.mxu0 }
0x17b0   :  { %v2553_v10 = vpop.eup %2552 }
0x17b1   :  { %v1685_v46 = vadd.f32 1.0, %v2553_v10 }
0x17b3   :  { %2554 = vrcp.f32 %v1685_v46 }
0x17c0   :  { %v2555_v14 = vpop.eup %2554 }
0x17c1   :  { %v1689_v19 = vmul.f32 %v2555_v14, %v1688_v11  ;;  %v1692_v18 = vsub.f32 1.0, %v2555_v14  ;;  %v1698_v27 = vmul.f32 %v2555_v14, %v3179_v63 }
0x17c3   :  { %v1690_v17 = vadd.f32 %v1689_v19, %v1632_v22 }
0x17c5   :  { %2556 = vtanh.f32 %v1690_v17 }
0x17d2   :  { %v2557_v26 = vpop.eup %2556 }
0x17d3   :  { %1694 = vrot.lane.b32.xlu1 %v2557_v26, %s2594_s9 }
0x1845   :  { %v1695_v57 = vpop.permute.xlu1 %1694 }
0x1846   :  { %v1697_v35 = vmul.f32 %v1695_v57, %v1692_v18 }
0x1848   :  { %v3197_v6 = vadd.f32 %v1698_v27, %v1697_v35 }
0x184a   :  { %v1707_v20 = vpack.c.bf16 %v3197_v6, %v3197_v6 }
0x184c   :  { %1709 = vrot.lane.b32.xlu0 %v1707_v20, %s2594_s9 }
0x18be   :  { %v1710_v21 = vpop.permute.xlu0 %1709 }
0x18bf   :  { %2364 = vmatmul.mubr.msk.bf16.vlgmr.msra.gmra.mxu1 %vm291_vm1, %v1710_v21 }
0x18c0   :  { %1871 = vmatpush1.bf16.msra.mxu1 %v2990_v44  ;;  %1894 = vmatprep.mubr.bf16.mxu1 %v2593_v1 }
0x18c1   :  { %1872 = vmatprep.subr.bf16.mxu1 %v2996_v50 }
0x18c4   :  { %1873 = vmatpush1.bf16.msra.mxu1 %v3004_v51 }
0x18c5   :  { %1874 = vmatprep.subr.bf16.mxu1 %v3011_v48 }
0x18c8   :  { %1875 = vmatpush1.bf16.msra.mxu1 %v3017_v53  ;;  %v1706_v53 = vld [vmem:[#allocation2 + $0x58] sm:$0xff] }
0x18c9   :  { %1876 = vmatprep.subr.bf16.mxu1 %v3023_v55 }
0x18cc   :  { %1877 = vmatpush1.bf16.msra.mxu1 %v3031_v38 }
0x197f   :  { %v1748_v31 = vpop.f32.mrf.mxu1 }
0x1980   :  { %v1755_v54 = vadd.f32 %v1748_v31, %v3097_v12  ;;  %v1854_v31 = vld [vmem:[#allocation2 + $0x78] sm:$0xff] }
0x1981   :  { %v1750_v30 = vpop.f32.mrf.mxu1 }
0x1982   :  { %v2365_v33 = vmul.f32 -1.442695, %v1755_v54  ;;  %v1762_v51 = vadd.f32 %v1750_v30, %v3118_v25  ;;  %v2458_v30 = vld [vmem:[%s3356_s1 + $0x174] ss:$8 sps:$4 sm:$0xff]  }
0x1983   :  { %v1752_v44 = vpop.f32.mrf.mxu1  ;;  %2188 = vmatprep.subr.bf16.mxu1 %v2458_v30 }
0x1984   :  { %2558 = vpow2.f32 %v2365_v33  ;;  %v2461_v33 = vld [vmem:[%s3356_s1 + $0x164] ss:$8 sps:$4 sm:$0xff]   ;;  %v2464_v44 = vld [vmem:[%s3356_s1 + $0x154] ss:$8 sps:$4 sm:$0xff]  }
0x1985   :  { %v1753_v36 = vpop.f32.mrf.mxu1 }
0x1986   :  { %v2462_v36 = vld [vmem:[%s3356_s1 + $0x150] ss:$8 sps:$4 sm:$0xff]  }
0x1991   :  { %v2559_v41 = vpop.eup %2558 }
0x1992   :  { %v1759_v50 = vadd.f32 1.0, %v2559_v41  ;;  %v2467_v41 = vld [vmem:[%s3356_s1 + $0x144] ss:$8 sps:$4 sm:$0xff]  }
0x1994   :  { %2560 = vrcp.f32 %v1759_v50 }
0x19a1   :  { %v2561_v48 = vpop.eup %2560 }
0x19a2   :  { %v1763_v15 = vmul.f32 %v2561_v48, %v1762_v51  ;;  %v1766_v38 = vsub.f32 1.0, %v2561_v48  ;;  %v1772_v45 = vmul.f32 %v2561_v48, %v3197_v6  ;;  %v2465_v51 = vld [vmem:[%s3356_s1 + $0x140] ss:$8 sps:$4 sm:$0xff]   ;;  %v2468_v48 = vld [vmem:[%s3356_s1 + $0x1b0] ss:$8 sps:$4 sm:$0xff]  }
0x19a4   :  { %v1764_v4 = vadd.f32 %v1763_v15, %v1706_v53  ;;  %v2470_v15 = vld [vmem:[%s3356_s1 + $0x1b4] ss:$8 sps:$4 sm:$0xff]   ;;  %v2473_v53 = vld [vmem:[%s3356_s1 + $0x1a4] ss:$8 sps:$4 sm:$0xff]  }
0x19a5   :  { %2071 = vmatprep.subr.bf16.mxu0 %v2470_v15 }
0x19a6   :  { %2562 = vtanh.f32 %v1764_v4  ;;  %v2471_v4 = vld [vmem:[%s3356_s1 + $0x1a0] ss:$8 sps:$4 sm:$0xff]  }
0x19b3   :  { %v2563_v55 = vpop.eup %2562 }
0x19b4   :  { %1768 = vrot.lane.b32.xlu1 %v2563_v55, %s2594_s9  ;;  %v2474_v55 = vld [vmem:[%s3356_s1 + $0x190] ss:$8 sps:$4 sm:$0xff]  }
0x1a26   :  { %v1769_v12 = vpop.permute.xlu1 %1768 }
0x1a27   :  { %v1771_v47 = vmul.f32 %v1769_v12, %v1766_v38  ;;  %v2479_v12 = vld [vmem:[%s3356_s1 + $0x184] ss:$8 sps:$4 sm:$0xff]  }
0x1a29   :  { %v3215_v49 = vadd.f32 %v1772_v45, %v1771_v47  ;;  %v2477_v47 = vld [vmem:[%s3356_s1 + $0x180] ss:$8 sps:$4 sm:$0xff]  }
0x1a2b   :  { %v1781_v52 = vpack.c.bf16 %v3215_v49, %v3215_v49 }
0x1a2d   :  { %1783 = vrot.lane.b32.xlu0 %v1781_v52, %s2594_s9 }
0x1a9f   :  { %v1784_v43 = vpop.permute.xlu0 %1783 }
0x1aa0   :  { %2366 = vmatmul.mubr.msk.bf16.vlgmr.msra.gmra.mxu0 %vm291_vm1, %v1784_v43 }
0x1aa1   :  { %2095 = vmatprep.mubr.bf16.mxu0 %v2593_v1  ;;  %2072 = vmatpush1.bf16.msra.mxu0 %v2468_v48 }
0x1aa2   :  { %2073 = vmatprep.subr.bf16.mxu0 %v2473_v53 }
0x1aa5   :  { %2074 = vmatpush1.bf16.msra.mxu0 %v2471_v4 }
0x1b60   :  { %v1822_v56 = vpop.f32.mrf.mxu0 }
0x1b61   :  { %v1829_v37 = vadd.f32 %v1822_v56, %v3102_v16 }
0x1b62   :  { %v1824_v58 = vpop.f32.mrf.mxu0 }
0x1b63   :  { %v2367_v60 = vmul.f32 -1.442695, %v1829_v37  ;;  %v1836_v8 = vadd.f32 %v1824_v58, %v3118_v25 }
0x1b64   :  { %v1826_v61 = vpop.f32.mrf.mxu0 }
0x1b65   :  { %2564 = vpow2.f32 %v2367_v60 }
0x1b66   :  { %v1827_v62 = vpop.f32.mrf.mxu0 }
0x1b72   :  { %v2565_v29 = vpop.eup %2564 }
0x1b73   :  { %v1833_v42 = vadd.f32 1.0, %v2565_v29 }
0x1b75   :  { %2566 = vrcp.f32 %v1833_v42 }
0x1b82   :  { %v2567_v13 = vpop.eup %2566 }
0x1b83   :  { %v1837_v0 = vmul.f32 %v2567_v13, %v1836_v8  ;;  %v1840_v39 = vsub.f32 1.0, %v2567_v13  ;;  %v1846_v59 = vmul.f32 %v2567_v13, %v3215_v49 }
0x1b85   :  { %v1838_v40 = vadd.f32 %v1837_v0, %v1780_v2 }
0x1b87   :  { %2568 = vtanh.f32 %v1838_v40 }
0x1b94   :  { %v2569_v3 = vpop.eup %2568 }
0x1b95   :  { %1842 = vrot.lane.b32.xlu1 %v2569_v3, %s2594_s9 }
0x1c07   :  { %v1843_v16 = vpop.permute.xlu1 %1842 }
0x1c08   :  { %v1845_v7 = vmul.f32 %v1843_v16, %v1840_v39 }
0x1c0a   :  { %v3226_v9 = vadd.f32 %v1846_v59, %v1845_v7 }
0x1c0c   :  { %v1855_v10 = vpack.c.bf16 %v3226_v9, %v3226_v9 }
0x1c0e   :  { %1857 = vrot.lane.b32.xlu0 %v1855_v10, %s2594_s9 }
0x1c12   :  { %1405 = vrot.lane.b32.xlu0 %v3122_v24, %s2594_s9 }
0x1c16   :  { %1849 = vrot.lane.b32.xlu0 %v3226_v9, %s2594_s9 }
0x1c1a   :  { %1553 = vrot.lane.b32.xlu0 %v3160_v32, %s2594_s9 }
0x1c1e   :  { %1701 = vrot.lane.b32.xlu0 %v3197_v6, %s2594_s9 }
0x1c80   :  { %v1858_v46 = vpop.permute.xlu0 %1857 }
0x1c81   :  { %2368 = vmatmul.mubr.msk.bf16.vlgmr.msra.gmra.mxu1 %vm291_vm1, %v1858_v46 }
0x1c82   :  { %2212 = vmatprep.mubr.bf16.mxu1 %v2593_v1 }
0x1c84   :  { %v1406_v11 = vpop.permute.xlu0 %1405 }
0x1c85   :  { %1408 = vst.msk [vmem:[#allocation3] sm:$0xff] %vm291_vm1, %v1406_v11 }
0x1c88   :  { %v1850_v14 = vpop.permute.xlu0 %1849 }
0x1c89   :  { %1852 = vst.msk [vmem:[#allocation3 + $0x30] sm:$0xff] %vm291_vm1, %v1850_v14 }
0x1c8c   :  { %v1554_v24 = vpop.permute.xlu0 %1553  ;;  %v1927_v58 = vld [vmem:[#allocation3] sm:$0xff] }
0x1c8d   :  { %1556 = vst.msk [vmem:[#allocation3 + $0x10] sm:$0xff] %vm291_vm1, %v1554_v24  ;;  %v1950_v60 = vmul.f32 0.01, %v1927_v58  ;;  %vm1942_vm2 = vcmp.ge.f32.partialorder %v1927_v58, 0.0 }
0x1c8f   :  { %v1958_v29 = vsel %vm1942_vm2, %v1927_v58, %v1950_v60 }
0x1c90   :  { %v1702_v19 = vpop.permute.xlu0 %1701  ;;  %v1936_v2 = vld [vmem:[#allocation3 + $0x30] sm:$0xff] }
0x1c91   :  { %1704 = vst.msk [vmem:[#allocation3 + $0x20] sm:$0xff] %vm291_vm1, %v1702_v19  ;;  %v1974_v40 = vmul.f32 0.01, %v1936_v2  ;;  %vm1967_vm4 = vcmp.ge.f32.partialorder %v1936_v2, 0.0 }
0x1c93   :  { %v1981_v7 = vsel %vm1967_vm4, %v1936_v2, %v1974_v40 }
0x1c94   :  { %v1929_v39 = vld [vmem:[#allocation3 + $0x10] sm:$0xff] }
0x1c95   :  { %vm1944_vm6 = vcmp.ge.f32.partialorder %v1929_v39, 0.0 }
0x1c98   :  { %v1938_v11 = vld [vmem:[#allocation3 + $0x20] sm:$0xff] }
0x1c99   :  { %vm1969_vm8 = vcmp.ge.f32.partialorder %v1938_v11, 0.0 }
0x1d41   :  { %v1896_v32 = vpop.f32.mrf.mxu1 }
0x1d42   :  { %v1903_v22 = vadd.f32 %v1896_v32, %v3107_v23  ;;  %v2456_v23 = vld [vmem:[%s3356_s1 + $0x170] ss:$8 sps:$4 sm:$0xff]   ;;  %v1976_v32 = vmul.f32 0.01, %v1938_v11 }
0x1d43   :  { %v1898_v17 = vpop.f32.mrf.mxu1  ;;  %2189 = vmatpush1.bf16.msra.mxu1 %v2456_v23  ;;  %v2247_v23 = vsub.s32 4, %v2749_v34 }
0x1d44   :  { %v2369_v26 = vmul.f32 -1.442695, %v1903_v22  ;;  %v1910_v6 = vadd.f32 %v1898_v17, %v3118_v25  ;;  %v2459_v25 = vld [vmem:[%s3356_s1 + $0x160] ss:$8 sps:$4 sm:$0xff]   ;;  %2190 = vmatprep.subr.bf16.mxu1 %v2461_v33 }
0x1d45   :  { %v1900_v18 = vpop.f32.mrf.mxu1  ;;  %v2248_v33 = vrot.slane %v3115_v28, %v2247_v23 }
0x1d46   :  { %2570 = vpow2.f32 %v2369_v26 }
0x1d47   :  { %v1901_v57 = vpop.f32.mrf.mxu1  ;;  %2191 = vmatpush1.bf16.msra.mxu1 %v2459_v25 }
0x1d48   :  { %2192 = vmatprep.subr.bf16.mxu1 %v2464_v44  ;;  %v1983_v57 = vsel %vm1969_vm8, %v1938_v11, %v1976_v32 }
0x1d4b   :  { %2193 = vmatpush1.bf16.msra.mxu1 %v2462_v36 }
0x1d4c   :  { %2194 = vmatprep.subr.bf16.mxu1 %v2467_v41 }
0x1d4f   :  { %2195 = vmatpush1.bf16.msra.mxu1 %v2465_v51 }
0x1d53   :  { %v2571_v27 = vpop.eup %2570 }
0x1d54   :  { %v1907_v35 = vadd.f32 1.0, %v2571_v27 }
0x1d56   :  { %2572 = vrcp.f32 %v1907_v35 }
0x1d63   :  { %v2573_v20 = vpop.eup %2572 }
0x1d64   :  { %v1911_v21 = vmul.f32 %v2573_v20, %v1910_v6  ;;  %v1914_v38 = vsub.f32 1.0, %v2573_v20  ;;  %v1920_v52 = vmul.f32 %v2573_v20, %v3226_v9  ;;  %v1952_v9 = vmul.f32 0.01, %v1929_v39 }
0x1d66   :  { %v1912_v54 = vadd.f32 %v1911_v21, %v1854_v31  ;;  %v1960_v24 = vsel %vm1944_vm6, %v1929_v39, %v1952_v9 }
0x1d68   :  { %2574 = vtanh.f32 %v1912_v54 }
0x1d75   :  { %v2575_v50 = vpop.eup %2574 }
0x1d76   :  { %1916 = vrot.lane.b32.xlu1 %v2575_v50, %s2594_s9 }
0x1d7a   :  { %1479 = vrot.lane.b32.xlu1 %v3141_v5, %s2594_s9  ;;  %v2476_v5 = vld [vmem:[%s3356_s1 + $0x194] ss:$8 sps:$4 sm:$0xff]  }
0x1d7b   :  { %2075 = vmatprep.subr.bf16.mxu0 %v2476_v5 }
0x1d7c   :  { %2076 = vmatpush1.bf16.msra.mxu0 %v2474_v55 }
0x1d7d   :  { %2077 = vmatprep.subr.bf16.mxu0 %v2479_v12 }
0x1d80   :  { %2078 = vmatpush1.bf16.msra.mxu0 %v2477_v47 }
0x1de8   :  { %v1917_v45 = vpop.permute.xlu1 %1916 }
0x1de9   :  { %v1919_v43 = vmul.f32 %v1917_v45, %v1914_v38 }
0x1deb   :  { %v1921_v56 = vadd.f32 %v1920_v52, %v1919_v43 }
0x1dec   :  { %v1480_v37 = vpop.permute.xlu1 %1479 }
0x1ded   :  { %1482 = vst.msk [vmem:[#allocation3 + $0x8] sm:$0xff] %vm291_vm1, %v1480_v37  ;;  %1923 = vrot.lane.b32.xlu1 %v1921_v56, %s2594_s9 }
0x1df1   :  { %1627 = vrot.lane.b32.xlu1 %v3179_v63, %s2594_s9 }
0x1df4   :  { %v1928_v61 = vld [vmem:[#allocation3 + $0x8] sm:$0xff] }
0x1df5   :  { %1775 = vrot.lane.b32.xlu1 %v3215_v49, %s2594_s9  ;;  %vm1943_vm3 = vcmp.ge.f32.partialorder %v1928_v61, 0.0  ;;  %v1951_v62 = vmul.f32 0.01, %v1928_v61 }
0x1df7   :  { %v1959_v42 = vsel %vm1943_vm3, %v1928_v61, %v1951_v62 }
0x1df8   :  { %v1987_v8 = vpack.c.bf16 %v1959_v42, %v1958_v29  ;;  %v2002_v13 = vpack.c.bf16 %v1958_v29, %v1959_v42 }
0x1dfa   :  { %2390 = vmatmul.mubr.msk.bf16.vlgmr.msra.gmra.mxu1 %vm291_vm1, %v1987_v8 }
0x1dfb   :  { %2220 = vmatprep.mubr.bf16.mxu1 %v2593_v1 }
0x1e5f   :  { %v1924_v0 = vpop.permute.xlu1 %1923 }
0x1e60   :  { %1926 = vst.msk [vmem:[#allocation3 + $0x38] sm:$0xff] %vm291_vm1, %v1924_v0 }
0x1e63   :  { %v1628_v63 = vpop.permute.xlu1 %1627 }
0x1e64   :  { %1630 = vst.msk [vmem:[#allocation3 + $0x18] sm:$0xff] %vm291_vm1, %v1628_v63 }
0x1e67   :  { %v1776_v3 = vpop.permute.xlu1 %1775  ;;  %v1935_v49 = vld [vmem:[#allocation3 + $0x38] sm:$0xff] }
0x1e68   :  { %1778 = vst.msk [vmem:[#allocation3 + $0x28] sm:$0xff] %vm291_vm1, %v1776_v3  ;;  %vm1966_vm5 = vcmp.ge.f32.partialorder %v1935_v49, 0.0  ;;  %v1973_v16 = vmul.f32 0.01, %v1935_v49 }
0x1e6a   :  { %v1980_v59 = vsel %vm1966_vm5, %v1935_v49, %v1973_v16 }
0x1e6b   :  { %v1999_v10 = vpack.c.bf16 %v1981_v7, %v1980_v59  ;;  %v1930_v46 = vld [vmem:[#allocation3 + $0x18] sm:$0xff]  ;;  %v1990_v20 = vpack.c.bf16 %v1980_v59, %v1981_v7 }
0x1e6c   :  { %vm1945_vm7 = vcmp.ge.f32.partialorder %v1930_v46, 0.0  ;;  %v1953_v14 = vmul.f32 0.01, %v1930_v46 }
0x1e6d   :  { %2378 = vmatmul.mubr.msk.bf16.vlgmr.msra.gmra.mxu0 %vm291_vm1, %v1999_v10 }
0x1e6e   :  { %v1961_v19 = vsel %vm1945_vm7, %v1930_v46, %v1953_v14  ;;  %2103 = vmatprep.mubr.bf16.mxu0 %v2593_v1 }
0x1e6f   :  { %v1988_v22 = vpack.c.bf16 %v1961_v19, %v1960_v24  ;;  %v1937_v17 = vld [vmem:[#allocation3 + $0x28] sm:$0xff]  ;;  %v2001_v6 = vpack.c.bf16 %v1960_v24, %v1961_v19 }
0x1e70   :  { %vm1968_vm9 = vcmp.ge.f32.partialorder %v1937_v17, 0.0  ;;  %v1975_v26 = vmul.f32 0.01, %v1937_v17 }
0x1e71   :  { %2391 = vmatmul.mubr.msk.bf16.gmra.mxu1 %vm291_vm1, %v1988_v22 }
0x1e72   :  { %v1982_v18 = vsel %vm1968_vm9, %v1937_v17, %v1975_v26  ;;  %2228 = vmatprep.mubr.bf16.mxu1 %v2593_v1 }
0x1e73   :  { %v2000_v27 = vpack.c.bf16 %v1983_v57, %v1982_v18  ;;  %v1989_v35 = vpack.c.bf16 %v1982_v18, %v1983_v57 }
0x1e75   :  { %2379 = vmatmul.mubr.msk.bf16.gmra.mxu0 %vm291_vm1, %v2000_v27 }
0x1e76   :  { %2111 = vmatprep.mubr.bf16.mxu0 %v2593_v1 }
0x1e79   :  { %2392 = vmatmul.mubr.msk.bf16.gmra.mxu1 %vm291_vm1, %v1989_v35 }
0x1e7a   :  { %2236 = vmatprep.mubr.bf16.mxu1 %v2593_v1 }
0x1e7d   :  { %2380 = vmatmul.mubr.msk.bf16.gmra.mxu0 %vm291_vm1, %v2001_v6 }
0x1e7e   :  { %2119 = vmatprep.mubr.bf16.mxu0 %v2593_v1 }
0x1e81   :  { %2393 = vmatmul.mubr.msk.bf16.gmra.mxu1 %vm291_vm1, %v1990_v20 }
0x1e85   :  { %2381 = vmatmul.mubr.msk.bf16.gmra.mxu0 %vm291_vm1, %v2002_v13 }
0x1eba   :  { %v2214_v21 = vpop.f32.mrf.mxu1 }
0x1ebc   :  { %v2216_v31 = vpop.f32.mrf.mxu1 }
0x1ebe   :  { %v2217_v54 = vpop.f32.mrf.mxu1 }
0x1ec0   :  { %v2219_v30 = vpop.f32.mrf.mxu1 }
0x1f2d   :  { %v2097_v25 = vpop.f32.mrf.mxu0 }
0x1f2e   :  { %v2215_v44 = vadd.f32 %v2214_v21, %v2097_v25 }
0x1f2f   :  { %v2099_v36 = vpop.f32.mrf.mxu0 }
0x1f30   :  { %v2249_v41 = vadd.f32 %v2248_v33, %v2215_v44 }
0x1f31   :  { %v2100_v50 = vpop.f32.mrf.mxu0  ;;  %v2222_v51 = vpop.f32.mrf.mxu1 }
0x1f32   :  { %2576 = vtanh.f32 %v2249_v41  ;;  %v2218_v1 = vadd.f32 %v2217_v54, %v2100_v50 }
0x1f33   :  { %v2102_v48 = vpop.f32.mrf.mxu0  ;;  %v2224_v15 = vpop.f32.mrf.mxu1 }
0x1f34   :  { %v2250_v53 = vadd.f32 %v2248_v33, %v2218_v1 }
0x1f35   :  { %v2105_v4 = vpop.f32.mrf.mxu0  ;;  %v2225_v5 = vpop.f32.mrf.mxu1 }
0x1f36   :  { %2578 = vtanh.f32 %v2250_v53  ;;  %v2223_v55 = vadd.f32 %v2222_v51, %v2105_v4 }
0x1f37   :  { %v2107_v38 = vpop.f32.mrf.mxu0  ;;  %v2227_v12 = vpop.f32.mrf.mxu1 }
0x1f38   :  { %v2251_v34 = vadd.f32 %v2248_v33, %v2223_v55 }
0x1f39   :  { %v2108_v45 = vpop.f32.mrf.mxu0  ;;  %v2230_v28 = vpop.f32.mrf.mxu1 }
0x1f3a   :  { %2580 = vtanh.f32 %v2251_v34  ;;  %v2226_v47 = vadd.f32 %v2225_v5, %v2108_v45 }
0x1f3b   :  { %v2110_v52 = vpop.f32.mrf.mxu0  ;;  %v2232_v43 = vpop.f32.mrf.mxu1 }
0x1f3c   :  { %v2252_v56 = vadd.f32 %v2248_v33, %v2226_v47 }
0x1f3d   :  { %v2113_v37 = vpop.f32.mrf.mxu0  ;;  %v2233_v58 = vpop.f32.mrf.mxu1 }
0x1f3e   :  { %2582 = vtanh.f32 %v2252_v56  ;;  %v2231_v60 = vadd.f32 %v2230_v28, %v2113_v37 }
0x1f3f   :  { %v2577_v61 = vpop.eup %2576  ;;  %v2115_v62 = vpop.f32.mrf.mxu0 }
0x1f40   :  { %v2235_v29 = vpop.f32.mrf.mxu1  ;;  %2265 = vst.msk [vmem:[%s3359_s3] sm:$0xff] %vm75_vm0, %v2577_v61  ;;  %v2253_v42 = vadd.f32 %v2248_v33, %v2231_v60 }
0x1f41   :  { %v2116_v8 = vpop.f32.mrf.mxu0 }
0x1f42   :  { %v2238_v13 = vpop.f32.mrf.mxu1  ;;  %2584 = vtanh.f32 %v2253_v42  ;;  %v2234_v0 = vadd.f32 %v2233_v58, %v2116_v8 }
0x1f43   :  { %v2579_v63 = vpop.eup %2578  ;;  %v2118_v2 = vpop.f32.mrf.mxu0 }
0x1f44   :  { %v2240_v40 = vpop.f32.mrf.mxu1  ;;  %2266 = vst.msk [vmem:[%s3359_s3 + $0x8] sm:$0xff] %vm75_vm0, %v2579_v63  ;;  %v2254_v3 = vadd.f32 %v2248_v33, %v2234_v0 }
0x1f45   :  { %v2121_v49 = vpop.f32.mrf.mxu0 }
0x1f46   :  { %v2241_v39 = vpop.f32.mrf.mxu1  ;;  %2586 = vtanh.f32 %v2254_v3  ;;  %v2239_v16 = vadd.f32 %v2238_v13, %v2121_v49 }
0x1f47   :  { %v2581_v59 = vpop.eup %2580  ;;  %v2123_v7 = vpop.f32.mrf.mxu0 }
0x1f48   :  { %v2243_v9 = vpop.f32.mrf.mxu1  ;;  %2267 = vst.msk [vmem:[%s3359_s3 + $0x10] sm:$0xff] %vm75_vm0, %v2581_v59  ;;  %v2255_v10 = vadd.f32 %v2248_v33, %v2239_v16 }
0x1f49   :  { %v2124_v46 = vpop.f32.mrf.mxu0 }
0x1f4a   :  { %2588 = vtanh.f32 %v2255_v10  ;;  %v2242_v11 = vadd.f32 %v2241_v39, %v2124_v46 }
0x1f4b   :  { %v2583_v14 = vpop.eup %2582  ;;  %v2126_v24 = vpop.f32.mrf.mxu0 }
0x1f4c   :  { %2268 = vst.msk [vmem:[%s3359_s3 + $0x18] sm:$0xff] %vm75_vm0, %v2583_v14  ;;  %v2256_v19 = vadd.f32 %v2248_v33, %v2242_v11 }
0x1f4e   :  { %2590 = vtanh.f32 %v2256_v19 }
0x1f4f   :  { %v2585_v32 = vpop.eup %2584 }
0x1f50   :  { %2269 = vst.msk [vmem:[%s3359_s3 + $0x20] sm:$0xff] %vm75_vm0, %v2585_v32 }
0x1f53   :  { %v2587_v22 = vpop.eup %2586 }
0x1f54   :  { %2270 = vst.msk [vmem:[%s3359_s3 + $0x28] sm:$0xff] %vm75_vm0, %v2587_v22 }
0x1f57   :  { %v2589_v17 = vpop.eup %2588 }
0x1f58   :  { %2271 = vst.msk [vmem:[%s3359_s3 + $0x30] sm:$0xff] %vm75_vm0, %v2589_v17 }
0x1f5b   :  { %v2591_v26 = vpop.eup %2590 }
0x1f5c   :  { %2272 = vst.msk [vmem:[%s3359_s3 + $0x38] sm:$0xff] %vm75_vm0, %v2591_v26 }

</bundles_post_ra>
